<compile_context>
chip_gen: v7x
topology: tpu7x:2x2x1
jax: 0.10.0
libtpu: 0.0.40
codegen_flags: <defaults>
</compile_context>

<pallas_src>
import numpy as np
import jax
import jax.numpy as jnp
from jax.experimental import pallas as pl
from jax.experimental.pallas import tpu as pltpu


# ----------------------------------------------------------------------------
# host-side glue: faithful copy of CAWN.subgraph_tree2walk (pure numpy)
# ----------------------------------------------------------------------------
def subgraph_tree2walk_one_component(record_list):
    batch = record_list[0].shape[0]
    n_walks = record_list[-1].shape[-1]
    walk_len = len(record_list)
    dtype = record_list[0].dtype
    record_matrix = np.empty((batch, n_walks, walk_len), dtype=dtype)
    for hop_idx, hop_record in enumerate(record_list):
        assert n_walks % hop_record.shape[-1] == 0
        record_matrix[:, :, hop_idx] = np.repeat(
            hop_record, repeats=n_walks // hop_record.shape[-1], axis=1)
    return record_matrix


def subgraph_tree2walk_nodes(src_idx_l, node_records):
    record_list = [np.expand_dims(src_idx_l, 1)] + list(node_records)
    return subgraph_tree2walk_one_component(record_list)


# ----------------------------------------------------------------------------
# Pallas kernel
# ----------------------------------------------------------------------------
OUT_LANES = 128  # lane-dense output slab width


def make_cawn_kernel(TB, W, Vp, D, max_train_node_set):
    MAX_TRAIN = int(max_train_node_set)
    THIRD = np.float32(1.0 / 3.0)

    def kernel(st_ref, ngh_ref, emb_ref, out_ref, lhs_ref):
        # st_ref : (2, TB, 1)  int32   [src; tgt]
        # ngh_ref: (4, TB, W)  int32   [src_hop1, src_hop2, tgt_hop1, tgt_hop2]
        # emb_ref: (Vp, D)     bf16    (resident across the batch grid)
        # out_ref: (TB, 128)   f32     score broadcast across lanes
        # lhs_ref: (TB, Vp)    f32     fused matmul-LHS accumulator (VMEM scratch)
        vids2 = jax.lax.broadcasted_iota(jnp.int32, (TB, Vp), 1)
        vids3 = jax.lax.broadcasted_iota(jnp.int32, (TB, W, Vp), 2)

        src = st_ref[0]                                         # (TB, 1)
        tgt = st_ref[1]                                         # (TB, 1)
        # NOTE: indices >= Vp (never happens for in-range node ids) would select an
        # all-zero row, matching the clamped-gather assumption of the previous revision.
        lhs_ref[...] = ((src == vids2).astype(jnp.float32)
                        - (tgt == vids2).astype(jnp.float32))   # (TB, Vp)

        # accumulate the four masked-mean groups one at a time (bounds live ranges of
        # the (TB, W, Vp) hits tensor); groups 0,1 belong to src (+), 2,3 to tgt (-).
        @pl.loop(0, 4)
        def _(g):
            nghs = ngh_ref[g]                                   # (TB, W)
            mask = jnp.logical_and(nghs <= MAX_TRAIN, nghs != 0)
            # fold the mask into the compare: sentinel -1 never matches a vocab id
            nghs_m = jnp.where(mask, nghs, -1)                  # (TB, W)
            hits = (nghs_m[:, :, None] == vids3)                # (TB, W, Vp) bool
            counts = jnp.sum(hits.astype(jnp.float32), axis=1)  # (TB, Vp)
            den = jnp.sum(mask.astype(jnp.float32), axis=1,
                          keepdims=True) + 1e-12                # (TB, 1)
            sign = jnp.where(g < 2, jnp.float32(1.0), jnp.float32(-1.0))
            lhs_ref[...] += counts * (sign / den)               # exact divide (tiny)

        # one fused MXU call: (TB, Vp) bf16 @ (Vp, D) bf16 -> (TB, D) f32
        g_diff = jnp.dot(lhs_ref[...].astype(jnp.bfloat16), emb_ref[...],
                         preferred_element_type=jnp.float32)    # (TB, D)
        score = jnp.sqrt(jnp.sum(g_diff * g_diff, axis=-1, keepdims=True)) * THIRD
        out_ref[...] = jnp.broadcast_to(score, (TB, OUT_LANES))

    return kernel


def cawn_forward(src_idx, tgt_idx, src_walk_nodes, tgt_walk_nodes,
                 emb_table, max_train_node_set, tb=128):
    """Pallas implementation of CAWN.forward -> score of shape (B,)."""
    B = int(src_idx.shape[0])
    W = int(src_walk_nodes.shape[1])
    V, D = int(emb_table.shape[0]), int(emb_table.shape[1])

    TB = int(tb)
    assert TB % 8 == 0
    Bp = int(pl.cdiv(B, TB)) * TB
    Vp = int(pl.cdiv(V, 128)) * 128

    # lane-aligned index packing: leading axis = group, so the kernel indexes groups
    # along the first (free) ref axis and never does lane-offset slices.
    st = jnp.stack(
        [jnp.asarray(src_idx, jnp.int32).reshape(B, 1),
         jnp.asarray(tgt_idx, jnp.int32).reshape(B, 1)], axis=0)          # (2, B, 1)
    ngh = jnp.stack(
        [jnp.asarray(src_walk_nodes[:, :, 1], jnp.int32),
         jnp.asarray(src_walk_nodes[:, :, 2], jnp.int32),
         jnp.asarray(tgt_walk_nodes[:, :, 1], jnp.int32),
         jnp.asarray(tgt_walk_nodes[:, :, 2], jnp.int32)], axis=0)        # (4, B, W)
    if Bp > B:
        st = jnp.pad(st, ((0, 0), (0, Bp - B), (0, 0)))
        ngh = jnp.pad(ngh, ((0, 0), (0, Bp - B), (0, 0)))

    # V padded to a multiple of 128 (aligned MXU K dim), cast to bf16 once host-side
    emb = jnp.asarray(emb_table, jnp.float32)
    emb_p = jnp.pad(emb, ((0, Vp - V), (0, 0))).astype(jnp.bfloat16)      # (Vp, D)

    kernel = make_cawn_kernel(TB, W, Vp, D, max_train_node_set)

    out = pl.pallas_call(
        kernel,
        out_shape=jax.ShapeDtypeStruct((Bp, OUT_LANES), jnp.float32),
        grid=(Bp // TB,),
        in_specs=[
            pl.BlockSpec((2, TB, 1), lambda i: (0, i, 0)),    # src/tgt ids per tile
            pl.BlockSpec((4, TB, W), lambda i: (0, i, 0)),    # 4 neighbor groups
            pl.BlockSpec((Vp, D), lambda i: (0, 0)),          # emb stays resident
        ],
        out_specs=pl.BlockSpec((TB, OUT_LANES), lambda i: (i, 0)),
        scratch_shapes=[pltpu.VMEM((TB, Vp), jnp.float32)],   # fused-LHS accumulator
        compiler_params=pltpu.CompilerParams(
            dimension_semantics=("parallel",),
            # explicit scoped-VMEM budget (emb + idx/out double-buffers + scratch +
            # (TB,W,Vp) temporaries), safe on v5e/v6e/v7x at these sizes
            vmem_limit_bytes=32 * 1024 * 1024),
    )(st, ngh, emb_p)
    return out[:B, 0]


# ----------------------------------------------------------------------------
# pure-JAX reference (mirrors the PyTorch module exactly, f32)
# ----------------------------------------------------------------------------
def cawn_forward_ref(src_idx, tgt_idx, src_walks, tgt_walks, emb_table,
                     max_train_node_set):
    emb_table = jnp.asarray(emb_table, jnp.float32)

    def gat_layer_mean(nghs):
        masks = jnp.logical_and(nghs <= max_train_node_set, nghs != 0)
        emb_nghs = emb_table[nghs]
        num = jnp.sum(masks[..., None] * emb_nghs, axis=-2)
        den = jnp.sum(masks, axis=-1, keepdims=True) + 1e-12
        return num / den

    def full_gat(idx, walks):
        src_emb = emb_table[idx]
        return (src_emb + gat_layer_mean(walks[:, :, 1])
                + gat_layer_mean(walks[:, :, 2])) / 3.0

    diff = full_gat(src_idx, src_walks) - full_gat(tgt_idx, tgt_walks)
    return jnp.sqrt(jnp.sum(diff * diff, axis=-1))


# ----------------------------------------------------------------------------
if __name__ == "__main__":
    # small, module-consistent shapes (two batch tiles of TB=128 -> grid=(2,),
    # exercises batch padding as well: Bp = 256 > B = 200)
    B = 200                  # batch
    D = 32                   # pos_dim (embedding dim)
    MAX_IDX = 63
    V = MAX_IDX + 1          # embedding table rows
    NUM_NEIGHBORS = [4, 4]   # per-hop fanout -> n_walks = 16, walk_len = 3
    train_node_set = list(range(1, 41))
    max_train_node_set = max(train_node_set)          # == len(train_node_set)
    assert max_train_node_set == len(train_node_set)

    key = jax.random.PRNGKey(0)
    k_emb, k_src, k_tgt, k_h1s, k_h2s, k_h1t, k_h2t = jax.random.split(key, 7)

    # nn.Embedding(max_idx+1, pos_dim) with xavier_normal_ init
    xav_std = float(np.sqrt(2.0 / (V + D)))
    emb_table = jax.random.normal(k_emb, (V, D), jnp.float32) * xav_std

    src_idx_l = np.asarray(jax.random.randint(k_src, (B,), 0, V), dtype=np.int64)
    tgt_idx_l = np.asarray(jax.random.randint(k_tgt, (B,), 0, V), dtype=np.int64)
    cut_time_l = np.linspace(1.0, 2.0, B).astype(np.float32)  # unused by node path

    # TODO(synk): ngh_finder.find_k_hop is a host-side temporal graph sampler
    # with no Pallas equivalent; synthetic neighbor trees stand in for it.
    n2 = NUM_NEIGHBORS[0] * NUM_NEIGHBORS[1]
    hop1_src = np.asarray(jax.random.randint(k_h1s, (B, NUM_NEIGHBORS[0]), 0, V), np.int64)
    hop2_src = np.asarray(jax.random.randint(k_h2s, (B, n2), 0, V), np.int64)
    hop1_tgt = np.asarray(jax.random.randint(k_h1t, (B, NUM_NEIGHBORS[0]), 0, V), np.int64)
    hop2_tgt = np.asarray(jax.random.randint(k_h2t, (B, n2), 0, V), np.int64)

    # host-side tree -> walk conversion (same code path as the module)
    src_walk_nodes = subgraph_tree2walk_nodes(src_idx_l, [hop1_src, hop2_src])
    tgt_walk_nodes = subgraph_tree2walk_nodes(tgt_idx_l, [hop1_tgt, hop2_tgt])

    score = cawn_forward(jnp.asarray(src_idx_l), jnp.asarray(tgt_idx_l),
                         jnp.asarray(src_walk_nodes), jnp.asarray(tgt_walk_nodes),
                         emb_table, max_train_node_set, tb=128)
    score = jax.block_until_ready(score)

    ref = cawn_forward_ref(jnp.asarray(src_idx_l, jnp.int32),
                           jnp.asarray(tgt_idx_l, jnp.int32),
                           jnp.asarray(src_walk_nodes, jnp.int32),
                           jnp.asarray(tgt_walk_nodes, jnp.int32),
                           emb_table, max_train_node_set)
    # bf16 MXU operands (f32 accumulation) -> slightly relaxed tolerance vs f32 reference
    np.testing.assert_allclose(np.asarray(score), np.asarray(ref),
                               rtol=2e-2, atol=2e-2)
    print("KERNEL_OK")
</pallas_src>

<mosaic_0001>
module attributes {stable_mosaic.version = 11 : i64} {
  func.func @kernel(%arg0: i32, %arg1: memref<2x128x1xi32, #tpu.memory_space<vmem>>, %arg2: memref<4x128x16xi32, #tpu.memory_space<vmem>>, %arg3: memref<128x32xbf16, #tpu.memory_space<vmem>>, %arg4: memref<128x128xf32, #tpu.memory_space<vmem>>, %arg5: memref<128x128xf32, #tpu.memory_space<vmem>>) attributes {dimension_semantics = [#tpu.dimension_semantics<parallel>], iteration_bounds = array<i64: 2>, scalar_prefetch = 0 : i64, scratch_operands = 1 : i64, tpu.core_type = #tpu.core_type<tc>, window_params = [{transform_indices = @transform_0, window_bounds = array<i64: 2, 128, 1>}, {transform_indices = @transform_1, window_bounds = array<i64: 4, 128, 16>}, {pipeline_mode = #tpu.pipeline_mode<synchronous>, transform_indices = @transform_2, window_bounds = array<i64: 128, 32>}, {transform_indices = @transform_3, window_bounds = array<i64: 128, 128>}]} {
    %0 = tpu.iota {dimensions = array<i32: 1>} : vector<128x128xi32>
    %1 = tpu.iota {dimensions = array<i32: 2>} : vector<128x16x128xi32>
    %c0 = arith.constant 0 : index
    %c0_0 = arith.constant 0 : index
    %c0_1 = arith.constant 0 : index
    %2 = vector.load %arg1[%c0, %c0_0, %c0_1] : memref<2x128x1xi32, #tpu.memory_space<vmem>>, vector<1x128x1xi32>
    %3 = vector.shape_cast %2 : vector<1x128x1xi32> to vector<128x1xi32>
    %c1 = arith.constant 1 : index
    %c0_2 = arith.constant 0 : index
    %c0_3 = arith.constant 0 : index
    %4 = vector.load %arg1[%c1, %c0_2, %c0_3] : memref<2x128x1xi32, #tpu.memory_space<vmem>>, vector<1x128x1xi32>
    %5 = vector.shape_cast %4 : vector<1x128x1xi32> to vector<128x1xi32>
    %6 = vector.broadcast %3 : vector<128x1xi32> to vector<128x128xi32>
    %7 = arith.cmpi eq, %6, %0 : vector<128x128xi32>
    %8 = arith.extui %7 : vector<128x128xi1> to vector<128x128xi32>
    %9 = arith.sitofp %8 : vector<128x128xi32> to vector<128x128xf32>
    %10 = vector.broadcast %5 : vector<128x1xi32> to vector<128x128xi32>
    %11 = arith.cmpi eq, %10, %0 : vector<128x128xi32>
    %12 = arith.extui %11 : vector<128x128xi1> to vector<128x128xi32>
    %13 = arith.sitofp %12 : vector<128x128xi32> to vector<128x128xf32>
    %14 = arith.subf %9, %13 : vector<128x128xf32>
    %c0_4 = arith.constant 0 : index
    %c0_5 = arith.constant 0 : index
    %15 = vector.load %arg5[%c0_4, %c0_5] : memref<128x128xf32, #tpu.memory_space<vmem>>, vector<128x128xf32>
    tpu.vector_store %arg5[%c0_4, %c0_5], %14 {strides = array<i32>} : memref<128x128xf32, #tpu.memory_space<vmem>>, vector<128x128xf32>,
    %c0_i32 = arith.constant 0 : i32
    %c4_i32 = arith.constant 4 : i32
    %16 = arith.addi %c0_i32, %c4_i32 : i32
    %c1_i32 = arith.constant 1 : i32
    scf.for %arg6 = %c0_i32 to %16 step %c1_i32  : i32 {
      %c1_i32_15 = arith.constant 1 : i32
      %30 = arith.muli %arg6, %c1_i32_15 : i32
      %c0_i32_16 = arith.constant 0 : i32
      %31 = arith.addi %c0_i32_16, %30 : i32
      %32 = arith.index_cast %31 : i32 to index
      %c0_17 = arith.constant 0 : index
      %c0_18 = arith.constant 0 : index
      %33 = vector.load %arg2[%32, %c0_17, %c0_18] : memref<4x128x16xi32, #tpu.memory_space<vmem>>, vector<1x128x16xi32>
      %34 = vector.shape_cast %33 : vector<1x128x16xi32> to vector<128x16xi32>
      %c40_i32 = arith.constant 40 : i32
      %35 = vector.broadcast %c40_i32 : i32 to vector<128x16xi32>
      %36 = arith.cmpi sle, %34, %35 : vector<128x16xi32>
      %c0_i32_19 = arith.constant 0 : i32
      %37 = vector.broadcast %c0_i32_19 : i32 to vector<128x16xi32>
      %38 = arith.cmpi ne, %34, %37 : vector<128x16xi32>
      %39 = arith.andi %36, %38 : vector<128x16xi1>
      %c-1_i32 = arith.constant -1 : i32
      %40 = vector.broadcast %c-1_i32 : i32 to vector<128x16xi32>
      %41 = arith.select %39, %34, %40 : vector<128x16xi1>, vector<128x16xi32>
      %42 = vector.shape_cast %41 : vector<128x16xi32> to vector<128x16x1xi32>
      %43 = vector.broadcast %42 : vector<128x16x1xi32> to vector<128x16x128xi32>
      %44 = arith.cmpi eq, %43, %1 : vector<128x16x128xi32>
      %45 = arith.extui %44 : vector<128x16x128xi1> to vector<128x16x128xi32>
      %46 = arith.sitofp %45 : vector<128x16x128xi32> to vector<128x16x128xf32>
      %cst_20 = arith.constant dense<0.000000e+00> : vector<128x128xf32>
      %47 = vector.multi_reduction <add>, %46, %cst_20 [1] : vector<128x16x128xf32> to vector<128x128xf32>
      %48 = arith.extui %39 : vector<128x16xi1> to vector<128x16xi32>
      %49 = arith.sitofp %48 : vector<128x16xi32> to vector<128x16xf32>
      %cst_21 = arith.constant dense<0.000000e+00> : vector<128xf32>
      %50 = vector.multi_reduction <add>, %49, %cst_21 [1] : vector<128x16xf32> to vector<128xf32>
      %51 = vector.shape_cast %50 : vector<128xf32> to vector<128x1xf32>
      %cst_22 = arith.constant 9.99999996E-13 : f32
      %52 = vector.broadcast %cst_22 : f32 to vector<128x1xf32>
      %53 = arith.addf %51, %52 : vector<128x1xf32>
      %c2_i32 = arith.constant 2 : i32
      %54 = arith.cmpi slt, %31, %c2_i32 : i32
      %cst_23 = arith.constant 1.000000e+00 : f32
      %cst_24 = arith.constant -1.000000e+00 : f32
      %55 = arith.select %54, %cst_23, %cst_24 : f32
      %c0_25 = arith.constant 0 : index
      %c0_26 = arith.constant 0 : index
      %56 = vector.load %arg5[%c0_25, %c0_26] : memref<128x128xf32, #tpu.memory_space<vmem>>, vector<128x128xf32>
      %57 = vector.broadcast %55 : f32 to vector<128x1xf32>
      %58 = arith.divf %57, %53 : vector<128x1xf32>
      %59 = vector.broadcast %58 : vector<128x1xf32> to vector<128x128xf32>
      %60 = arith.mulf %47, %59 : vector<128x128xf32>
      %61 = arith.addf %56, %60 : vector<128x128xf32>
      %c0_27 = arith.constant 0 : index
      %c0_28 = arith.constant 0 : index
      %62 = vector.load %arg5[%c0_27, %c0_28] : memref<128x128xf32, #tpu.memory_space<vmem>>, vector<128x128xf32>
      tpu.vector_store %arg5[%c0_27, %c0_28], %61 {strides = array<i32>} : memref<128x128xf32, #tpu.memory_space<vmem>>, vector<128x128xf32>,
    }
    %c4_i32_6 = arith.constant 4 : i32
    %c0_7 = arith.constant 0 : index
    %c0_8 = arith.constant 0 : index
    %17 = vector.load %arg5[%c0_7, %c0_8] : memref<128x128xf32, #tpu.memory_space<vmem>>, vector<128x128xf32>
    %18 = arith.truncf %17 : vector<128x128xf32> to vector<128x128xbf16>
    %c0_9 = arith.constant 0 : index
    %c0_10 = arith.constant 0 : index
    %19 = vector.load %arg3[%c0_9, %c0_10] : memref<128x32xbf16, #tpu.memory_space<vmem>>, vector<128x32xbf16>
    %cst = arith.constant dense<0.000000e+00> : vector<128x32xf32>
    %20 = tpu.matmul %18, %19, %cst {dimension_numbers = #tpu.dot_dimension_numbers<[1], [0], [0], [1], [0, 0, 1, 1], [], []>} : vector<128x128xbf16>, vector<128x32xbf16>, vector<128x32xf32> -> vector<128x32xf32>
    %21 = arith.mulf %20, %20 : vector<128x32xf32>
    %cst_11 = arith.constant dense<0.000000e+00> : vector<128xf32>
    %22 = vector.multi_reduction <add>, %21, %cst_11 [1] : vector<128x32xf32> to vector<128xf32>
    %23 = vector.shape_cast %22 : vector<128xf32> to vector<128x1xf32>
    %24 = math.sqrt %23 : vector<128x1xf32>
    %cst_12 = arith.constant 0.333333343 : f32
    %25 = vector.broadcast %cst_12 : f32 to vector<128x1xf32>
    %26 = arith.mulf %24, %25 : vector<128x1xf32>
    %27 = vector.shape_cast %26 : vector<128x1xf32> to vector<128x1xf32>
    %28 = vector.broadcast %27 : vector<128x1xf32> to vector<128x128xf32>
    %c0_13 = arith.constant 0 : index
    %c0_14 = arith.constant 0 : index
    %29 = vector.load %arg4[%c0_13, %c0_14] : memref<128x128xf32, #tpu.memory_space<vmem>>, vector<128x128xf32>
    tpu.vector_store %arg4[%c0_13, %c0_14], %28 {strides = array<i32>} : memref<128x128xf32, #tpu.memory_space<vmem>>, vector<128x128xf32>,
    return
  }
  func.func @transform_0(%arg0: i32) -> (i32, i32, i32) {
    %c0_i32 = arith.constant 0 : i32
    %c0_i32_0 = arith.constant 0 : i32
    %c0_i32_1 = arith.constant 0 : i32
    return %c0_i32, %arg0, %c0_i32_0 : i32, i32, i32
  }
  func.func @transform_1(%arg0: i32) -> (i32, i32, i32) {
    %c0_i32 = arith.constant 0 : i32
    %c0_i32_0 = arith.constant 0 : i32
    %c0_i32_1 = arith.constant 0 : i32
    return %c0_i32, %arg0, %c0_i32_0 : i32, i32, i32
  }
  func.func @transform_2(%arg0: i32) -> (i32, i32) {
    %c0_i32 = arith.constant 0 : i32
    %c0_i32_0 = arith.constant 0 : i32
    %c0_i32_1 = arith.constant 0 : i32
    return %c0_i32, %c0_i32_0 : i32, i32
  }
  func.func @transform_3(%arg0: i32) -> (i32, i32) {
    %c0_i32 = arith.constant 0 : i32
    %c0_i32_0 = arith.constant 0 : i32
    return %arg0, %c0_i32 : i32, i32
  }
}

</mosaic_0001>

<bundles_post_ra>
// kernel: tpu_custom_call.1
= control target key start
LH: loop header
LB: loop body
LE: loop exit
PB: predicated region body
PF: predicated region fallthrough
CT: control target
= control target key end

     0   :  { %8 = vsyncpa [#allocation6], 0  ;;  %s9308_s0 = inlined_call_operand.vmem [shape: s32[2,256,1], index: 0, kind: input, shape index: {}]   ;;  %s9309_s1 = inlined_call_operand.vmem [shape: s32[4,256,16], index: 1, kind: input, shape index: {}]   ;;  %s9310_s2 = inlined_call_operand.vmem [shape: bf16[128,32], index: 2, kind: input, shape index: {}]   ;;  %s9311_s3 = inlined_call_operand.hbm [shape: f32[256,128], index: 3, kind: output, shape index: {}]  }
   0x1   :  { %10 = vsyncpa [#allocation6 + $0x1], 0  ;;  %s6136_s12 = smov 0   ;;  %s6138_s13 = smov 0  }
   0x2   :  { %s6140_s14 = smov 0   ;;  %s6142_s15 = smov 0  }
   0x3 LB: > { %s5497_s16 = sadd.s32 4294967295, %s6104_s15   ;;  %s5498_s17 = sadd.s32 4294967294, %s6104_s15   ;;  %s6104_s15 = sphi %s6142_s15, %s9913_s15   ;;  %s6100_s14 = sphi %s6140_s14, %s9912_s14   ;;  %s6096_s13 = sphi %s6138_s13, %s9911_s13   ;;  %s6092_s12 = sphi %s6136_s12, %s9910_s12  }
   0x4   : > { %s6159_s18 = sadd.s32 1, %s6104_s15   ;;  %s23_s19 = sadd.s32 1, %s6100_s14 }
   0x5   : > { %s20_s20 = ssub.s32 %s6104_s15, %s6159_s18  ;;  %p30_p0 = scmp.ne.s32.totalorder %s6100_s14, %s6096_s13 }
   0x6   : > { %p21_p1 = scmp.eq.s32.totalorder %s20_s20, 0  ;;  %p31_p2 = scmp.eq.s32.totalorder %s6104_s15, 0 }
   0x7   : > { %p107_p3 = scmp.eq.s32.totalorder %s5497_s16, 1  ;;  %p112_p4 = scmp.ne.s32.totalorder %s6096_s13, %s6092_s12 }
   0x8   : > { %s6172_s21 = scalar_select %p21_p1, %s6100_s14, %s23_s19  }
   0x9   : > { %p6174_p5 = por %p31_p2, %p30_p0  ;;  %p6178_p6 = por %p107_p3, %p30_p0 }
   0xa   : > { %p113_p7 = scmp.eq.s32.totalorder %s5498_s17, 1  ;;  %p5500_p9 = scmp.ge.s32.totalorder %s6104_s15, 2 }
   0xc   : > { %p6182_p8 = por %p113_p7, %p112_p4  ;;  %132 = sbr.rel (%p5500_p9) target bundleno = 75 (0x4b), region = 20 }
  0x13   : > { %135 = sbr.rel (!%p6174_p5) target bundleno = 39 (0x27), region = 24  ;;  %s137_s25 = sand.u32 (%p6174_p5), 1, %s6100_s14  }
  0x14   : > { %s5845_s26 = sshll.u32 (%p6174_p5), %s6104_s15, 7  ;;  %s5501_s27 = sshll.u32 (%p6174_p5), %s137_s25, 8 }
  0x15   : > { %s6196_s30 = scalar_lea.vmem (%p6174_p5), %s9308_s0, %s5845_s26  ;;  %s6201_s4 = scalar_lea.vmem (%p6174_p5), [#allocation3], %s5501_s27 }
  0x16   : > { %v232_v0 = vld [vmem:[%s6196_s30] sm:$0xff] (%p6174_p5)  ;;  %v234_v1 = vld [vmem:[%s6196_s30 + $0x8] sm:$0xff] (%p6174_p5)  ;;  %v236_v2 = vld [vmem:[%s6196_s30 + $0x10] sm:$0xff] (%p6174_p5) }
  0x17   : > { %233 = vst [vmem:[%s6201_s4] sm:$0xff] (%p6174_p5), %v232_v0  ;;  %235 = vst [vmem:[%s6201_s4 + $0x8] sm:$0xff] (%p6174_p5), %v234_v1  ;;  %v238_v3 = vld [vmem:[%s6196_s30 + $0x18] sm:$0xff] (%p6174_p5)  ;;  %v240_v4 = vld [vmem:[%s6196_s30 + $0x20] sm:$0xff] (%p6174_p5) }
  0x18   : > { %237 = vst [vmem:[%s6201_s4 + $0x10] sm:$0xff] (%p6174_p5), %v236_v2  ;;  %v242_v5 = vld [vmem:[%s6196_s30 + $0x28] sm:$0xff] (%p6174_p5)  ;;  %239 = vst [vmem:[%s6201_s4 + $0x18] sm:$0xff] (%p6174_p5), %v238_v3  ;;  %v244_v6 = vld [vmem:[%s6196_s30 + $0x30] sm:$0xff] (%p6174_p5) }
  0x19   : > { %241 = vst [vmem:[%s6201_s4 + $0x20] sm:$0xff] (%p6174_p5), %v240_v4  ;;  %243 = vst [vmem:[%s6201_s4 + $0x28] sm:$0xff] (%p6174_p5), %v242_v5  ;;  %v246_v7 = vld [vmem:[%s6196_s30 + $0x38] sm:$0xff] (%p6174_p5)  ;;  %v248_v8 = vld [vmem:[%s6196_s30 + $0x40] sm:$0xff] (%p6174_p5) }
  0x1a   : > { %245 = vst [vmem:[%s6201_s4 + $0x30] sm:$0xff] %v244_v6  ;;  %247 = vst [vmem:[%s6201_s4 + $0x38] sm:$0xff] %v246_v7  ;;  %v250_v9 = vld [vmem:[%s6196_s30 + $0x48] sm:$0xff]  ;;  %v252_v10 = vld [vmem:[%s6196_s30 + $0x50] sm:$0xff] }
  0x1b   : > { %249 = vst [vmem:[%s6201_s4 + $0x40] sm:$0xff] %v248_v8  ;;  %v254_v11 = vld [vmem:[%s6196_s30 + $0x58] sm:$0xff]  ;;  %251 = vst [vmem:[%s6201_s4 + $0x48] sm:$0xff] %v250_v9  ;;  %v256_v12 = vld [vmem:[%s6196_s30 + $0x60] sm:$0xff] }
  0x1c   : > { %253 = vst [vmem:[%s6201_s4 + $0x50] sm:$0xff] %v252_v10  ;;  %255 = vst [vmem:[%s6201_s4 + $0x58] sm:$0xff] %v254_v11  ;;  %v258_v13 = vld [vmem:[%s6196_s30 + $0x68] sm:$0xff]  ;;  %v260_v14 = vld [vmem:[%s6196_s30 + $0x70] sm:$0xff] }
  0x1d   : > { %257 = vst [vmem:[%s6201_s4 + $0x60] sm:$0xff] %v256_v12  ;;  %259 = vst [vmem:[%s6201_s4 + $0x68] sm:$0xff] %v258_v13  ;;  %v262_v15 = vld [vmem:[%s6196_s30 + $0x78] sm:$0xff]  ;;  %v264_v16 = vld [vmem:[%s6196_s30 + $0x100] sm:$0xff] }
  0x1e   : > { %261 = vst [vmem:[%s6201_s4 + $0x70] sm:$0xff] %v260_v14  ;;  %v266_v17 = vld [vmem:[%s6196_s30 + $0x108] sm:$0xff]  ;;  %263 = vst [vmem:[%s6201_s4 + $0x78] sm:$0xff] %v262_v15  ;;  %v268_v18 = vld [vmem:[%s6196_s30 + $0x110] sm:$0xff] }
  0x1f   : > { %265 = vst [vmem:[%s6201_s4 + $0x80] sm:$0xff] %v264_v16  ;;  %267 = vst [vmem:[%s6201_s4 + $0x88] sm:$0xff] %v266_v17  ;;  %v270_v19 = vld [vmem:[%s6196_s30 + $0x118] sm:$0xff]  ;;  %v272_v20 = vld [vmem:[%s6196_s30 + $0x120] sm:$0xff] }
  0x20   : > { %269 = vst [vmem:[%s6201_s4 + $0x90] sm:$0xff] %v268_v18  ;;  %271 = vst [vmem:[%s6201_s4 + $0x98] sm:$0xff] %v270_v19  ;;  %v274_v21 = vld [vmem:[%s6196_s30 + $0x128] sm:$0xff]  ;;  %v276_v22 = vld [vmem:[%s6196_s30 + $0x130] sm:$0xff] }
  0x21   : > { %273 = vst [vmem:[%s6201_s4 + $0xa0] sm:$0xff] %v272_v20  ;;  %v278_v23 = vld [vmem:[%s6196_s30 + $0x138] sm:$0xff]  ;;  %275 = vst [vmem:[%s6201_s4 + $0xa8] sm:$0xff] %v274_v21  ;;  %v280_v24 = vld [vmem:[%s6196_s30 + $0x140] sm:$0xff] }
  0x22   : > { %277 = vst [vmem:[%s6201_s4 + $0xb0] sm:$0xff] %v276_v22  ;;  %279 = vst [vmem:[%s6201_s4 + $0xb8] sm:$0xff] %v278_v23  ;;  %v282_v25 = vld [vmem:[%s6196_s30 + $0x148] sm:$0xff]  ;;  %v284_v26 = vld [vmem:[%s6196_s30 + $0x150] sm:$0xff] }
  0x23   : > { %281 = vst [vmem:[%s6201_s4 + $0xc0] sm:$0xff] %v280_v24  ;;  %283 = vst [vmem:[%s6201_s4 + $0xc8] sm:$0xff] %v282_v25  ;;  %v286_v27 = vld [vmem:[%s6196_s30 + $0x158] sm:$0xff]  ;;  %v288_v28 = vld [vmem:[%s6196_s30 + $0x160] sm:$0xff] }
  0x24   : > { %285 = vst [vmem:[%s6201_s4 + $0xd0] sm:$0xff] %v284_v26  ;;  %v290_v29 = vld [vmem:[%s6196_s30 + $0x168] sm:$0xff]  ;;  %287 = vst [vmem:[%s6201_s4 + $0xd8] sm:$0xff] %v286_v27  ;;  %v292_v30 = vld [vmem:[%s6196_s30 + $0x170] sm:$0xff] }
  0x25   : > { %289 = vst [vmem:[%s6201_s4 + $0xe0] sm:$0xff] %v288_v28  ;;  %291 = vst [vmem:[%s6201_s4 + $0xe8] sm:$0xff] %v290_v29  ;;  %v294_v31 = vld [vmem:[%s6196_s30 + $0x178] sm:$0xff] }
  0x26   : > { %293 = vst [vmem:[%s6201_s4 + $0xf0] sm:$0xff] %v292_v30  ;;  %295 = vst [vmem:[%s6201_s4 + $0xf8] sm:$0xff] %v294_v31 }
  0x27 PF: > { %301 = sbr.rel (!%p6174_p5) target bundleno = 75 (0x4b), region = 62  ;;  %s303_s5 = sand.u32 (%p6174_p5), 1, %s6100_s14  }
  0x28   : > { %s5846_s6 = sshll.u32 (%p6174_p5), %s6104_s15, 7  ;;  %s5504_s7 = sshll.u32 (%p6174_p5), %s303_s5, 9 }
  0x29   : > { %s6271_s10 = scalar_lea.vmem (%p6174_p5), %s9309_s1, %s5846_s6  ;;  %s6276_s11 = scalar_lea.vmem (%p6174_p5), [#allocation4], %s5504_s7 }
  0x2a   : > { %v462_v32 = vld [vmem:[%s6271_s10] sm:$0xff] (%p6174_p5)  ;;  %v464_v33 = vld [vmem:[%s6271_s10 + $0x8] sm:$0xff] (%p6174_p5)  ;;  %v466_v34 = vld [vmem:[%s6271_s10 + $0x10] sm:$0xff] (%p6174_p5) }
  0x2b   : > { %463 = vst [vmem:[%s6276_s11] sm:$0xff] (%p6174_p5), %v462_v32  ;;  %465 = vst [vmem:[%s6276_s11 + $0x8] sm:$0xff] (%p6174_p5), %v464_v33  ;;  %v468_v35 = vld [vmem:[%s6271_s10 + $0x18] sm:$0xff] (%p6174_p5)  ;;  %v470_v36 = vld [vmem:[%s6271_s10 + $0x20] sm:$0xff] (%p6174_p5) }
  0x2c   : > { %467 = vst [vmem:[%s6276_s11 + $0x10] sm:$0xff] (%p6174_p5), %v466_v34  ;;  %v472_v37 = vld [vmem:[%s6271_s10 + $0x28] sm:$0xff] (%p6174_p5)  ;;  %469 = vst [vmem:[%s6276_s11 + $0x18] sm:$0xff] (%p6174_p5), %v468_v35  ;;  %v474_v38 = vld [vmem:[%s6271_s10 + $0x30] sm:$0xff] (%p6174_p5) }
  0x2d   : > { %471 = vst [vmem:[%s6276_s11 + $0x20] sm:$0xff] (%p6174_p5), %v470_v36  ;;  %473 = vst [vmem:[%s6276_s11 + $0x28] sm:$0xff] (%p6174_p5), %v472_v37  ;;  %v476_v39 = vld [vmem:[%s6271_s10 + $0x38] sm:$0xff] (%p6174_p5)  ;;  %v478_v40 = vld [vmem:[%s6271_s10 + $0x40] sm:$0xff] (%p6174_p5) }
  0x2e   : > { %475 = vst [vmem:[%s6276_s11 + $0x30] sm:$0xff] %v474_v38  ;;  %477 = vst [vmem:[%s6276_s11 + $0x38] sm:$0xff] %v476_v39  ;;  %v480_v41 = vld [vmem:[%s6271_s10 + $0x48] sm:$0xff]  ;;  %v482_v42 = vld [vmem:[%s6271_s10 + $0x50] sm:$0xff] }
  0x2f   : > { %479 = vst [vmem:[%s6276_s11 + $0x40] sm:$0xff] %v478_v40  ;;  %v484_v43 = vld [vmem:[%s6271_s10 + $0x58] sm:$0xff]  ;;  %481 = vst [vmem:[%s6276_s11 + $0x48] sm:$0xff] %v480_v41  ;;  %v486_v44 = vld [vmem:[%s6271_s10 + $0x60] sm:$0xff] }
  0x30   : > { %483 = vst [vmem:[%s6276_s11 + $0x50] sm:$0xff] %v482_v42  ;;  %485 = vst [vmem:[%s6276_s11 + $0x58] sm:$0xff] %v484_v43  ;;  %v488_v45 = vld [vmem:[%s6271_s10 + $0x68] sm:$0xff]  ;;  %v490_v46 = vld [vmem:[%s6271_s10 + $0x70] sm:$0xff] }
  0x31   : > { %487 = vst [vmem:[%s6276_s11 + $0x60] sm:$0xff] %v486_v44  ;;  %489 = vst [vmem:[%s6276_s11 + $0x68] sm:$0xff] %v488_v45  ;;  %v492_v47 = vld [vmem:[%s6271_s10 + $0x78] sm:$0xff]  ;;  %v494_v48 = vld [vmem:[%s6271_s10 + $0x100] sm:$0xff] }
  0x32   : > { %491 = vst [vmem:[%s6276_s11 + $0x70] sm:$0xff] %v490_v46  ;;  %v496_v49 = vld [vmem:[%s6271_s10 + $0x108] sm:$0xff]  ;;  %493 = vst [vmem:[%s6276_s11 + $0x78] sm:$0xff] %v492_v47  ;;  %v498_v50 = vld [vmem:[%s6271_s10 + $0x110] sm:$0xff] }
  0x33   : > { %495 = vst [vmem:[%s6276_s11 + $0x80] sm:$0xff] %v494_v48  ;;  %497 = vst [vmem:[%s6276_s11 + $0x88] sm:$0xff] %v496_v49  ;;  %v500_v51 = vld [vmem:[%s6271_s10 + $0x118] sm:$0xff]  ;;  %v502_v52 = vld [vmem:[%s6271_s10 + $0x120] sm:$0xff] }
  0x34   : > { %499 = vst [vmem:[%s6276_s11 + $0x90] sm:$0xff] %v498_v50  ;;  %501 = vst [vmem:[%s6276_s11 + $0x98] sm:$0xff] %v500_v51  ;;  %v504_v53 = vld [vmem:[%s6271_s10 + $0x128] sm:$0xff]  ;;  %v506_v54 = vld [vmem:[%s6271_s10 + $0x130] sm:$0xff] }
  0x35   : > { %503 = vst [vmem:[%s6276_s11 + $0xa0] sm:$0xff] %v502_v52  ;;  %v508_v55 = vld [vmem:[%s6271_s10 + $0x138] sm:$0xff]  ;;  %505 = vst [vmem:[%s6276_s11 + $0xa8] sm:$0xff] %v504_v53  ;;  %v510_v56 = vld [vmem:[%s6271_s10 + $0x140] sm:$0xff] }
  0x36   : > { %507 = vst [vmem:[%s6276_s11 + $0xb0] sm:$0xff] %v506_v54  ;;  %509 = vst [vmem:[%s6276_s11 + $0xb8] sm:$0xff] %v508_v55  ;;  %v512_v57 = vld [vmem:[%s6271_s10 + $0x148] sm:$0xff]  ;;  %v514_v58 = vld [vmem:[%s6271_s10 + $0x150] sm:$0xff] }
  0x37   : > { %511 = vst [vmem:[%s6276_s11 + $0xc0] sm:$0xff] %v510_v56  ;;  %513 = vst [vmem:[%s6276_s11 + $0xc8] sm:$0xff] %v512_v57  ;;  %v516_v59 = vld [vmem:[%s6271_s10 + $0x158] sm:$0xff]  ;;  %v518_v60 = vld [vmem:[%s6271_s10 + $0x160] sm:$0xff] }
  0x38   : > { %515 = vst [vmem:[%s6276_s11 + $0xd0] sm:$0xff] %v514_v58  ;;  %v520_v61 = vld [vmem:[%s6271_s10 + $0x168] sm:$0xff]  ;;  %517 = vst [vmem:[%s6276_s11 + $0xd8] sm:$0xff] %v516_v59  ;;  %v522_v62 = vld [vmem:[%s6271_s10 + $0x170] sm:$0xff] }
  0x39   : > { %519 = vst [vmem:[%s6276_s11 + $0xe0] sm:$0xff] %v518_v60  ;;  %521 = vst [vmem:[%s6276_s11 + $0xe8] sm:$0xff] %v520_v61  ;;  %v524_v63 = vld [vmem:[%s6271_s10 + $0x178] sm:$0xff]  ;;  %v526_v0 = vld [vmem:[%s6271_s10 + $0x200] sm:$0xff] }
  0x3a   : > { %523 = vst [vmem:[%s6276_s11 + $0xf0] sm:$0xff] %v522_v62  ;;  %525 = vst [vmem:[%s6276_s11 + $0xf8] sm:$0xff] %v524_v63  ;;  %v528_v1 = vld [vmem:[%s6271_s10 + $0x208] sm:$0xff]  ;;  %v530_v2 = vld [vmem:[%s6271_s10 + $0x210] sm:$0xff] }
  0x3b   : > { %527 = vst [vmem:[%s6276_s11 + $0x100] sm:$0xff] %v526_v0  ;;  %v532_v3 = vld [vmem:[%s6271_s10 + $0x218] sm:$0xff]  ;;  %529 = vst [vmem:[%s6276_s11 + $0x108] sm:$0xff] %v528_v1  ;;  %v534_v4 = vld [vmem:[%s6271_s10 + $0x220] sm:$0xff] }
  0x3c   : > { %531 = vst [vmem:[%s6276_s11 + $0x110] sm:$0xff] %v530_v2  ;;  %533 = vst [vmem:[%s6276_s11 + $0x118] sm:$0xff] %v532_v3  ;;  %v536_v5 = vld [vmem:[%s6271_s10 + $0x228] sm:$0xff]  ;;  %v538_v6 = vld [vmem:[%s6271_s10 + $0x230] sm:$0xff] }
  0x3d   : > { %535 = vst [vmem:[%s6276_s11 + $0x120] sm:$0xff] %v534_v4  ;;  %537 = vst [vmem:[%s6276_s11 + $0x128] sm:$0xff] %v536_v5  ;;  %v540_v7 = vld [vmem:[%s6271_s10 + $0x238] sm:$0xff]  ;;  %v542_v8 = vld [vmem:[%s6271_s10 + $0x240] sm:$0xff] }
  0x3e   : > { %539 = vst [vmem:[%s6276_s11 + $0x130] sm:$0xff] %v538_v6  ;;  %v544_v9 = vld [vmem:[%s6271_s10 + $0x248] sm:$0xff]  ;;  %541 = vst [vmem:[%s6276_s11 + $0x138] sm:$0xff] %v540_v7  ;;  %v546_v10 = vld [vmem:[%s6271_s10 + $0x250] sm:$0xff] }
  0x3f   : > { %543 = vst [vmem:[%s6276_s11 + $0x140] sm:$0xff] %v542_v8  ;;  %545 = vst [vmem:[%s6276_s11 + $0x148] sm:$0xff] %v544_v9  ;;  %v548_v11 = vld [vmem:[%s6271_s10 + $0x258] sm:$0xff]  ;;  %v550_v12 = vld [vmem:[%s6271_s10 + $0x260] sm:$0xff] }
  0x40   : > { %547 = vst [vmem:[%s6276_s11 + $0x150] sm:$0xff] %v546_v10  ;;  %549 = vst [vmem:[%s6276_s11 + $0x158] sm:$0xff] %v548_v11  ;;  %v552_v13 = vld [vmem:[%s6271_s10 + $0x268] sm:$0xff]  ;;  %v554_v14 = vld [vmem:[%s6271_s10 + $0x270] sm:$0xff] }
  0x41   : > { %551 = vst [vmem:[%s6276_s11 + $0x160] sm:$0xff] %v550_v12  ;;  %v556_v15 = vld [vmem:[%s6271_s10 + $0x278] sm:$0xff]  ;;  %553 = vst [vmem:[%s6276_s11 + $0x168] sm:$0xff] %v552_v13  ;;  %v558_v16 = vld [vmem:[%s6271_s10 + $0x300] sm:$0xff] }
  0x42   : > { %555 = vst [vmem:[%s6276_s11 + $0x170] sm:$0xff] %v554_v14  ;;  %557 = vst [vmem:[%s6276_s11 + $0x178] sm:$0xff] %v556_v15  ;;  %v560_v17 = vld [vmem:[%s6271_s10 + $0x308] sm:$0xff]  ;;  %v562_v18 = vld [vmem:[%s6271_s10 + $0x310] sm:$0xff] }
  0x43   : > { %559 = vst [vmem:[%s6276_s11 + $0x180] sm:$0xff] %v558_v16  ;;  %561 = vst [vmem:[%s6276_s11 + $0x188] sm:$0xff] %v560_v17  ;;  %v564_v19 = vld [vmem:[%s6271_s10 + $0x318] sm:$0xff]  ;;  %v566_v20 = vld [vmem:[%s6271_s10 + $0x320] sm:$0xff] }
  0x44   : > { %563 = vst [vmem:[%s6276_s11 + $0x190] sm:$0xff] %v562_v18  ;;  %v568_v21 = vld [vmem:[%s6271_s10 + $0x328] sm:$0xff]  ;;  %565 = vst [vmem:[%s6276_s11 + $0x198] sm:$0xff] %v564_v19  ;;  %v570_v22 = vld [vmem:[%s6271_s10 + $0x330] sm:$0xff] }
  0x45   : > { %567 = vst [vmem:[%s6276_s11 + $0x1a0] sm:$0xff] %v566_v20  ;;  %569 = vst [vmem:[%s6276_s11 + $0x1a8] sm:$0xff] %v568_v21  ;;  %v572_v23 = vld [vmem:[%s6271_s10 + $0x338] sm:$0xff]  ;;  %v574_v24 = vld [vmem:[%s6271_s10 + $0x340] sm:$0xff] }
  0x46   : > { %571 = vst [vmem:[%s6276_s11 + $0x1b0] sm:$0xff] %v570_v22  ;;  %573 = vst [vmem:[%s6276_s11 + $0x1b8] sm:$0xff] %v572_v23  ;;  %v576_v25 = vld [vmem:[%s6271_s10 + $0x348] sm:$0xff]  ;;  %v578_v26 = vld [vmem:[%s6271_s10 + $0x350] sm:$0xff] }
  0x47   : > { %575 = vst [vmem:[%s6276_s11 + $0x1c0] sm:$0xff] %v574_v24  ;;  %v580_v27 = vld [vmem:[%s6271_s10 + $0x358] sm:$0xff]  ;;  %577 = vst [vmem:[%s6276_s11 + $0x1c8] sm:$0xff] %v576_v25  ;;  %v582_v28 = vld [vmem:[%s6271_s10 + $0x360] sm:$0xff] }
  0x48   : > { %579 = vst [vmem:[%s6276_s11 + $0x1d0] sm:$0xff] %v578_v26  ;;  %581 = vst [vmem:[%s6276_s11 + $0x1d8] sm:$0xff] %v580_v27  ;;  %v584_v29 = vld [vmem:[%s6271_s10 + $0x368] sm:$0xff]  ;;  %v586_v30 = vld [vmem:[%s6271_s10 + $0x370] sm:$0xff] }
  0x49   : > { %583 = vst [vmem:[%s6276_s11 + $0x1e0] sm:$0xff] %v582_v28  ;;  %585 = vst [vmem:[%s6276_s11 + $0x1e8] sm:$0xff] %v584_v29  ;;  %v588_v31 = vld [vmem:[%s6271_s10 + $0x378] sm:$0xff] }
  0x4a   : > { %587 = vst [vmem:[%s6276_s11 + $0x1f0] sm:$0xff] %v586_v30  ;;  %589 = vst [vmem:[%s6276_s11 + $0x1f8] sm:$0xff] %v588_v31 }
  0x4b PF: > { %p5507_p10 = scmp.ge.s32.totalorder %s6104_s15, 1  ;;  %p594_p11 = scmp.lt.s32.totalorder %s6104_s15, 3 }
  0x4d   : > { %p595_p12 = pnand %p5507_p10, %p594_p11 }
  0x4f   : > { %598 = sbr.rel (%p595_p12) target bundleno = 1548 (0x60c), region = 100 }
  0x56   : > { %s6406_s17 = sand.u32 1, %s6096_s13   ;;  %v6110_v32 = vmov 0   ;;  %v9312_v13 = vlaneseq  ;;  %v6111_v21 = vmov 0.0   ;;  %s6544_s28 = smov 0  }
  0x57   : > { %5965 = vset.pattern.permute.xlu1 %v6110_v32  ;;  %5964 = vset.pattern.permute.xlu0 %v6110_v32  ;;  %s5508_s19 = sshll.u32 %s6406_s17, 8  ;;  %s5509_s20 = sshll.u32 %s6406_s17, 9 }
  0x58   : > { %s5510_s22 = sshll.u32 %s6406_s17, 7  ;;  %s6411_s25 = scalar_lea.vmem [#allocation3], %s5508_s19  ;;  %v6458_v16 = vand.u32 127, %v9312_v13 }
  0x59   : > { %v643_v33 = vld [vmem:[%s6411_s25 + $0x10] sm:$0xff]  ;;  %v641_v34 = vld [vmem:[%s6411_s25] sm:$0xff]  ;;  %v644_v35 = vld [vmem:[%s6411_s25 + $0x18] sm:$0xff]  ;;  %s6538_s26 = scalar_lea.vmem [#allocation4], %s5509_s20  ;;  %s6542_s27 = scalar_lea.vmem [#allocation5], %s5510_s22 }
  0x5a   : > { %681 = vperm.xlu1 %5965, %v643_v33   ;;  %675 = vperm.xlu0 %5964, %v641_v34   ;;  %v642_v36 = vld [vmem:[%s6411_s25 + $0x8] sm:$0xff]  ;;  %v645_v38 = vld [vmem:[%s6411_s25 + $0x20] sm:$0xff]  ;;  %v648_v39 = vld [vmem:[%s6411_s25 + $0x38] sm:$0xff]  ;;  %9399 = vst [vmem:[#allocation8_spill] sm:$0xff] %v6458_v16 }
  0x5b   : > { %v646_v37 = vld [vmem:[%s6411_s25 + $0x28] sm:$0xff]  ;;  %v647_v40 = vld [vmem:[%s6411_s25 + $0x30] sm:$0xff]  ;;  %v649_v42 = vld [vmem:[%s6411_s25 + $0x40] sm:$0xff] }
  0x5c   : > { %v650_v41 = vld [vmem:[%s6411_s25 + $0x48] sm:$0xff]  ;;  %v652_v43 = vld [vmem:[%s6411_s25 + $0x58] sm:$0xff]  ;;  %v651_v44 = vld [vmem:[%s6411_s25 + $0x50] sm:$0xff] }
  0x5d   : > { %v654_v45 = vld [vmem:[%s6411_s25 + $0x68] sm:$0xff]  ;;  %v653_v46 = vld [vmem:[%s6411_s25 + $0x60] sm:$0xff]  ;;  %v656_v47 = vld [vmem:[%s6411_s25 + $0x78] sm:$0xff] }
  0x5e   : > { %684 = vperm.xlu1 %5965, %v644_v35   ;;  %678 = vperm.xlu0 %5964, %v642_v36   ;;  %v655_v48 = vld [vmem:[%s6411_s25 + $0x70] sm:$0xff]  ;;  %v5512_v49 = vld [vmem:[%s6411_s25 + $0x88] sm:$0xff]  ;;  %v5511_v50 = vld [vmem:[%s6411_s25 + $0x80] sm:$0xff] }
  0x5f   : > { %v5514_v51 = vld [vmem:[%s6411_s25 + $0x98] sm:$0xff]  ;;  %v5513_v52 = vld [vmem:[%s6411_s25 + $0x90] sm:$0xff]  ;;  %v5516_v53 = vld [vmem:[%s6411_s25 + $0xa8] sm:$0xff] }
  0x60   : > { %v5515_v54 = vld [vmem:[%s6411_s25 + $0xa0] sm:$0xff]  ;;  %v5518_v55 = vld [vmem:[%s6411_s25 + $0xb8] sm:$0xff]  ;;  %v5517_v56 = vld [vmem:[%s6411_s25 + $0xb0] sm:$0xff] }
  0x61   : > { %v5520_v57 = vld [vmem:[%s6411_s25 + $0xc8] sm:$0xff]  ;;  %v5519_v58 = vld [vmem:[%s6411_s25 + $0xc0] sm:$0xff]  ;;  %v5522_v59 = vld [vmem:[%s6411_s25 + $0xd8] sm:$0xff] }
  0x62   : > { %690 = vperm.xlu1 %5965, %v646_v37   ;;  %687 = vperm.xlu0 %5964, %v645_v38   ;;  %v5521_v60 = vld [vmem:[%s6411_s25 + $0xd0] sm:$0xff]  ;;  %v5524_v61 = vld [vmem:[%s6411_s25 + $0xe8] sm:$0xff]  ;;  %v5523_v62 = vld [vmem:[%s6411_s25 + $0xe0] sm:$0xff] }
  0x63   : > { %v5526_v63 = vld [vmem:[%s6411_s25 + $0xf8] sm:$0xff]  ;;  %v5525_v0 = vld [vmem:[%s6411_s25 + $0xf0] sm:$0xff] }
  0x66   : > { %696 = vperm.xlu1 %5965, %v648_v39   ;;  %693 = vperm.xlu0 %5964, %v647_v40  }
  0x6a   : > { %702 = vperm.xlu1 %5965, %v650_v41   ;;  %699 = vperm.xlu0 %5964, %v649_v42  }
  0x6e   : > { %708 = vperm.xlu1 %5965, %v652_v43   ;;  %705 = vperm.xlu0 %5964, %v651_v44  }
  0x72   : > { %714 = vperm.xlu1 %5965, %v654_v45   ;;  %711 = vperm.xlu0 %5964, %v653_v46  }
  0x76   : > { %720 = vperm.xlu1 %5965, %v656_v47   ;;  %717 = vperm.xlu0 %5964, %v655_v48  }
  0x7a   : > { %774 = vperm.xlu1 %5965, %v5512_v49   ;;  %771 = vperm.xlu0 %5964, %v5511_v50  }
  0x7e   : > { %780 = vperm.xlu1 %5965, %v5514_v51   ;;  %777 = vperm.xlu0 %5964, %v5513_v52  }
  0x82   : > { %786 = vperm.xlu1 %5965, %v5516_v53   ;;  %783 = vperm.xlu0 %5964, %v5515_v54  }
  0x86   : > { %792 = vperm.xlu1 %5965, %v5518_v55   ;;  %789 = vperm.xlu0 %5964, %v5517_v56  }
  0x8a   : > { %798 = vperm.xlu1 %5965, %v5520_v57   ;;  %795 = vperm.xlu0 %5964, %v5519_v58  }
  0x8e   : > { %804 = vperm.xlu1 %5965, %v5522_v59   ;;  %801 = vperm.xlu0 %5964, %v5521_v60  }
  0x92   : > { %810 = vperm.xlu1 %5965, %v5524_v61   ;;  %807 = vperm.xlu0 %5964, %v5523_v62  }
  0x96   : > { %816 = vperm.xlu1 %5965, %v5526_v63   ;;  %813 = vperm.xlu0 %5964, %v5525_v0  }
  0xd9   : > { %v682_v1 = vpop.permute.xlu1 %681  ;;  %v676_v2 = vpop.permute.xlu0 %675 }
  0xda   : > { %vm722_vm0 = vcmp.eq.s32.totalorder %v676_v2, %v6458_v16  ;;  %vm724_vm4 = vcmp.eq.s32.totalorder %v682_v1, %v6458_v16 }
  0xdb   : > { %v5527_v22 = vsel %vm722_vm0, 1.0, %v6111_v21  ;;  %v5529_v30 = vsel %vm724_vm4, 1.0, %v6111_v21 }
  0xdd   : > { %v685_v3 = vpop.permute.xlu1 %684  ;;  %v679_v4 = vpop.permute.xlu0 %678 }
  0xde   : > { %vm723_vm1 = vcmp.eq.s32.totalorder %v679_v4, %v6458_v16  ;;  %vm725_vm5 = vcmp.eq.s32.totalorder %v685_v3, %v6458_v16 }
  0xdf   : > { %v5528_v23 = vsel %vm723_vm1, 1.0, %v6111_v21  ;;  %v5530_v31 = vsel %vm725_vm5, 1.0, %v6111_v21 }
  0xe1   : > { %v691_v5 = vpop.permute.xlu1 %690  ;;  %v688_v6 = vpop.permute.xlu0 %687 }
  0xe2   : > { %vm727_vm8 = vcmp.eq.s32.totalorder %v691_v5, %v6458_v16  ;;  %vm726_vm9 = vcmp.eq.s32.totalorder %v688_v6, %v6458_v16 }
  0xe3   : > { %v5532_v38 = vsel %vm727_vm8, 1.0, %v6111_v21  ;;  %v5531_v39 = vsel %vm726_vm9, 1.0, %v6111_v21 }
  0xe5   : > { %v697_v7 = vpop.permute.xlu1 %696  ;;  %v694_v8 = vpop.permute.xlu0 %693 }
  0xe6   : > { %vm729_vm12 = vcmp.eq.s32.totalorder %v697_v7, %v6458_v16  ;;  %vm728_vm13 = vcmp.eq.s32.totalorder %v694_v8, %v6458_v16 }
  0xe7   : > { %v5534_v46 = vsel %vm729_vm12, 1.0, %v6111_v21  ;;  %v5533_v47 = vsel %vm728_vm13, 1.0, %v6111_v21 }
  0xe9   : > { %v6445_v9 = vpop.permute.xlu1 %702  ;;  %v6447_v10 = vpop.permute.xlu0 %699 }
  0xea   : > { %vm731_vm0 = vcmp.eq.s32.totalorder %v6445_v9, %v6458_v16  ;;  %vm730_vm1 = vcmp.eq.s32.totalorder %v6447_v10, %v6458_v16 }
  0xeb   : > { %v5536_v54 = vsel %vm731_vm0, 1.0, %v6111_v21  ;;  %v5535_v55 = vsel %vm730_vm1, 1.0, %v6111_v21 }
  0xed   : > { %v6449_v11 = vpop.permute.xlu1 %708  ;;  %v6451_v12 = vpop.permute.xlu0 %705 }
  0xee   : > { %vm733_vm4 = vcmp.eq.s32.totalorder %v6449_v11, %v6458_v16  ;;  %vm732_vm5 = vcmp.eq.s32.totalorder %v6451_v12, %v6458_v16 }
  0xef   : > { %v5538_v62 = vsel %vm733_vm4, 1.0, %v6111_v21  ;;  %v5537_v63 = vsel %vm732_vm5, 1.0, %v6111_v21 }
  0xf1   : > { %v6453_v14 = vpop.permute.xlu1 %714  ;;  %v6455_v15 = vpop.permute.xlu0 %711 }
  0xf2   : > { %vm735_vm8 = vcmp.eq.s32.totalorder %v6453_v14, %v6458_v16  ;;  %vm734_vm9 = vcmp.eq.s32.totalorder %v6455_v15, %v6458_v16 }
  0xf3   : > { %v5540_v6 = vsel %vm735_vm8, 1.0, %v6111_v21  ;;  %v5539_v7 = vsel %vm734_vm9, 1.0, %v6111_v21 }
  0xf5   : > { %v6460_v17 = vpop.permute.xlu1 %720  ;;  %v6462_v18 = vpop.permute.xlu0 %717 }
  0xf6   : > { %vm737_vm12 = vcmp.eq.s32.totalorder %v6460_v17, %v6458_v16  ;;  %vm736_vm13 = vcmp.eq.s32.totalorder %v6462_v18, %v6458_v16 }
  0xf7   : > { %v5542_v15 = vsel %vm737_vm12, 1.0, %v6111_v21 }
  0xf9   : > { %v775_v19 = vpop.permute.xlu1 %774  ;;  %v772_v20 = vpop.permute.xlu0 %771 }
  0xfa   : > { %vm819_vm2 = vcmp.eq.s32.totalorder %v775_v19, %v6458_v16  ;;  %vm818_vm3 = vcmp.eq.s32.totalorder %v772_v20, %v6458_v16  ;;  %v5541_v19 = vsel %vm736_vm13, 1.0, %v6111_v21 }
  0xfb   : > { %v5544_v24 = vsel %vm819_vm2, 1.0, %v6111_v21  ;;  %v5543_v25 = vsel %vm818_vm3, 1.0, %v6111_v21 }
  0xfc   : > { %v867_v26 = vsub.f32 %v5528_v23, %v5544_v24  ;;  %v866_v27 = vsub.f32 %v5527_v22, %v5543_v25 }
  0xfd   : > { %v781_v28 = vpop.permute.xlu1 %780  ;;  %v778_v29 = vpop.permute.xlu0 %777 }
  0xfe   : > { %883 = vst [vmem:[#allocation2 + $0x8] sm:$0xff] %v867_v26  ;;  %882 = vst [vmem:[#allocation2] sm:$0xff] %v866_v27  ;;  %vm821_vm6 = vcmp.eq.s32.totalorder %v781_v28, %v6458_v16  ;;  %vm820_vm7 = vcmp.eq.s32.totalorder %v778_v29, %v6458_v16 }
  0xff   : > { %v5546_v32 = vsel %vm821_vm6, 1.0, %v6111_v21  ;;  %v5545_v33 = vsel %vm820_vm7, 1.0, %v6111_v21 }
 0x100   : > { %v869_v34 = vsub.f32 %v5530_v31, %v5546_v32  ;;  %v868_v35 = vsub.f32 %v5529_v30, %v5545_v33 }
 0x101   : > { %v787_v36 = vpop.permute.xlu1 %786  ;;  %v784_v37 = vpop.permute.xlu0 %783 }
 0x102   : > { %885 = vst [vmem:[#allocation2 + $0x18] sm:$0xff] %v869_v34  ;;  %884 = vst [vmem:[#allocation2 + $0x10] sm:$0xff] %v868_v35  ;;  %vm823_vm10 = vcmp.eq.s32.totalorder %v787_v36, %v6458_v16  ;;  %vm822_vm11 = vcmp.eq.s32.totalorder %v784_v37, %v6458_v16 }
 0x103   : > { %v5548_v40 = vsel %vm823_vm10, 1.0, %v6111_v21  ;;  %v5547_v41 = vsel %vm822_vm11, 1.0, %v6111_v21 }
 0x104   : > { %v871_v42 = vsub.f32 %v5532_v38, %v5548_v40  ;;  %v870_v43 = vsub.f32 %v5531_v39, %v5547_v41 }
 0x105   : > { %v793_v44 = vpop.permute.xlu1 %792  ;;  %v790_v45 = vpop.permute.xlu0 %789 }
 0x106   : > { %887 = vst [vmem:[#allocation2 + $0x28] sm:$0xff] %v871_v42  ;;  %886 = vst [vmem:[#allocation2 + $0x20] sm:$0xff] %v870_v43  ;;  %vm825_vm14 = vcmp.eq.s32.totalorder %v793_v44, %v6458_v16  ;;  %vm824_vm15 = vcmp.eq.s32.totalorder %v790_v45, %v6458_v16 }
 0x107   : > { %v5550_v48 = vsel %vm825_vm14, 1.0, %v6111_v21  ;;  %v5549_v49 = vsel %vm824_vm15, 1.0, %v6111_v21 }
 0x108   : > { %v873_v50 = vsub.f32 %v5534_v46, %v5550_v48  ;;  %v872_v51 = vsub.f32 %v5533_v47, %v5549_v49 }
 0x109   : > { %v799_v52 = vpop.permute.xlu1 %798  ;;  %v796_v53 = vpop.permute.xlu0 %795 }
 0x10a   : > { %889 = vst [vmem:[#allocation2 + $0x38] sm:$0xff] %v873_v50  ;;  %888 = vst [vmem:[#allocation2 + $0x30] sm:$0xff] %v872_v51  ;;  %vm827_vm2 = vcmp.eq.s32.totalorder %v799_v52, %v6458_v16  ;;  %vm826_vm3 = vcmp.eq.s32.totalorder %v796_v53, %v6458_v16 }
 0x10b   : > { %v5552_v56 = vsel %vm827_vm2, 1.0, %v6111_v21  ;;  %v5551_v57 = vsel %vm826_vm3, 1.0, %v6111_v21 }
 0x10c   : > { %v875_v58 = vsub.f32 %v5536_v54, %v5552_v56  ;;  %v874_v59 = vsub.f32 %v5535_v55, %v5551_v57 }
 0x10d   : > { %v805_v60 = vpop.permute.xlu1 %804  ;;  %v802_v61 = vpop.permute.xlu0 %801 }
 0x10e   : > { %891 = vst [vmem:[#allocation2 + $0x48] sm:$0xff] %v875_v58  ;;  %890 = vst [vmem:[#allocation2 + $0x40] sm:$0xff] %v874_v59  ;;  %vm829_vm6 = vcmp.eq.s32.totalorder %v805_v60, %v6458_v16  ;;  %vm828_vm7 = vcmp.eq.s32.totalorder %v802_v61, %v6458_v16 }
 0x10f   : > { %v5554_v0 = vsel %vm829_vm6, 1.0, %v6111_v21  ;;  %v5553_v1 = vsel %vm828_vm7, 1.0, %v6111_v21 }
 0x110   : > { %v877_v2 = vsub.f32 %v5538_v62, %v5554_v0  ;;  %v876_v3 = vsub.f32 %v5537_v63, %v5553_v1 }
 0x111   : > { %v811_v4 = vpop.permute.xlu1 %810  ;;  %v808_v5 = vpop.permute.xlu0 %807 }
 0x112   : > { %893 = vst [vmem:[#allocation2 + $0x58] sm:$0xff] %v877_v2  ;;  %892 = vst [vmem:[#allocation2 + $0x50] sm:$0xff] %v876_v3  ;;  %vm831_vm10 = vcmp.eq.s32.totalorder %v811_v4, %v6458_v16  ;;  %vm830_vm11 = vcmp.eq.s32.totalorder %v808_v5, %v6458_v16 }
 0x113   : > { %v5556_v8 = vsel %vm831_vm10, 1.0, %v6111_v21  ;;  %v5555_v9 = vsel %vm830_vm11, 1.0, %v6111_v21 }
 0x114   : > { %v879_v10 = vsub.f32 %v5540_v6, %v5556_v8  ;;  %v878_v11 = vsub.f32 %v5539_v7, %v5555_v9 }
 0x115   : > { %v817_v12 = vpop.permute.xlu1 %816  ;;  %v814_v14 = vpop.permute.xlu0 %813 }
 0x116   : > { %895 = vst [vmem:[#allocation2 + $0x68] sm:$0xff] %v879_v10  ;;  %894 = vst [vmem:[#allocation2 + $0x60] sm:$0xff] %v878_v11  ;;  %vm833_vm14 = vcmp.eq.s32.totalorder %v817_v12, %v6458_v16  ;;  %vm832_vm15 = vcmp.eq.s32.totalorder %v814_v14, %v6458_v16 }
 0x117   : > { %v5558_v17 = vsel %vm833_vm14, 1.0, %v6111_v21  ;;  %v5557_v18 = vsel %vm832_vm15, 1.0, %v6111_v21 }
 0x118   : > { %v881_v20 = vsub.f32 %v5542_v15, %v5558_v17  ;;  %v880_v22 = vsub.f32 %v5541_v19, %v5557_v18 }
 0x11a   : > { %897 = vst [vmem:[#allocation2 + $0x78] sm:$0xff] %v881_v20  ;;  %896 = vst [vmem:[#allocation2 + $0x70] sm:$0xff] %v880_v22 }
 0x11b LB: >> { %v9400_v16 = vld [vmem:[#allocation8_spill] sm:$0xff]  ;;  %v9401_v13 = vlaneseq  ;;  %s5559_s29 = sshll.u32 %s6108_s28, 7  ;;  %v9402_v26 = vmov 0  ;;  %v9407_v42 = vmov 0  ;;  %v9410_v53 = vmov 0  ;;  %p4155_p13 = scmp.lt.s32.totalorder %s6108_s28, 2  ;;  %s6108_s28 = sphi %s6544_s28, %s903_s28  }
 0x11c   : >> { %s6552_s30 = scalar_lea.vmem %s6538_s26, %s5559_s29 [#allocation4]  ;;  %v9413_v0 = vmov 0  ;;  %v9416_v19 = vmov 0  ;;  %s903_s28 = sadd.s32 1, %s6108_s28  }
 0x11d   : >> { %v987_v21 = vshrl.u32 %v9401_v13, 7  ;;  %v906_v23 = vld [vmem:[%s6552_s30] sm:$0xff]  ;;  %v907_v39 = vld [vmem:[%s6552_s30 + $0x8] sm:$0xff]  ;;  %v908_v51 = vld [vmem:[%s6552_s30 + $0x10] sm:$0xff]  ;;  %s4156_s4 = scalar_select %p4155_p13, 1.0, -1.0 }
 0x11e   : >> { %vm922_vm0 = vcmp.le.s32.totalorder %v906_v23, 40  ;;  %vm938_vm1 = vcmp.ne.s32.totalorder %v906_v23, 0  ;;  %vm923_vm3 = vcmp.le.s32.totalorder %v907_v39, 40  ;;  %vm939_vm4 = vcmp.ne.s32.totalorder %v907_v39, 0  ;;  %v909_v62 = vld [vmem:[%s6552_s30 + $0x18] sm:$0xff]  ;;  %v910_v9 = vld [vmem:[%s6552_s30 + $0x20] sm:$0xff] }
 0x11f   : >> { %v6555_v24 = vsub.s32 1, %v987_v21  ;;  %v6557_v25 = vsub.s32 0, %v987_v21  ;;  %vm6559_vm2 = vmand %vm922_vm0, %vm938_vm1  ;;  %v6567_v30 = vsub.s32 2, %v987_v21  ;;  %v6570_v32 = vsub.s32 3, %v987_v21  ;;  %p900_p0 = scmp.ge.s32.totalorder %s903_s28, 4  }
 0x120   : >> { %v9403_v26 = vsel %vm6559_vm2, 4294967295, %v9402_v26  ;;  %v970_v27 = vsel %vm6559_vm2, %v906_v23, 4294967295  ;;  %v6573_v34 = vsub.s32 4, %v987_v21  ;;  %v6576_v36 = vsub.s32 5, %v987_v21  ;;  %vm6585_vm5 = vmand %vm923_vm3, %vm939_vm4  ;;  %s5847_s5 = sshll.u32 (%p900_p0), %s5497_s16, 11  ;;  %s5405_s6 = sshll.u32 (%p900_p0), %s6542_s27, 4  ;;  %s9262_s6 = int_to_ptr.vmem [resolvable:$true] %s5405_s6 }
 0x121   : >> { %9404 = vst [vmem:[#allocation9_spill] sm:$0xff] %v9403_v26  ;;  %v1000_v28 = vrot.slane %v970_v27, %v6555_v24  ;;  %v989_v29 = vrot.slane %v970_v27, %v6557_v25  ;;  %v1011_v31 = vrot.slane %v970_v27, %v6567_v30  ;;  %v1022_v33 = vrot.slane %v970_v27, %v6570_v32  ;;  %s9260_s8 = scalar_lea.hbm (%p900_p0), %s9311_s3, %s5847_s5  ;;  %s5392_s9 = scalar_lea.sflag (%p900_p0), [#allocation6], %s6406_s17 }
 0x122   : >> { %v1033_v35 = vrot.slane %v970_v27, %v6573_v34  ;;  %v1044_v37 = vrot.slane %v970_v27, %v6576_v36  ;;  %v6579_v38 = vsub.s32 6, %v987_v21  ;;  %v6583_v41 = vsub.s32 7, %v987_v21  ;;  %s6038_s10 = scalar_lea.vmem (%p900_p0), %s9262_s6, 2048  ;;  %s6113_s11 = smov (%p900_p0), [#allocation5]  }
 0x123   : >> { %1002 = vbcast.lane.b32.xlu1 %v1000_v28, 256  ;;  %991 = vbcast.lane.b32.xlu0 %v989_v29, 256  ;;  %v9408_v42 = vsel %vm6585_vm5, 4294967295, %v9407_v42  ;;  %v971_v44 = vsel %vm6585_vm5, %v907_v39, 4294967295  ;;  %vm924_vm6 = vcmp.le.s32.totalorder %v908_v51, 40  ;;  %vm940_vm7 = vcmp.ne.s32.totalorder %v908_v51, 0  ;;  %p6039_p1 = scmp.ne.s32.totalorder (%p900_p0), %s9262_s6, %s6038_s10 }
 0x124   : >> { %9405 = vst [vmem:[#allocation10_spill] sm:$0xff] %v6579_v38  ;;  %v1055_v40 = vrot.slane %v970_v27, %v6579_v38  ;;  %9406 = vst [vmem:[#allocation11_spill] sm:$0xff] %v6583_v41  ;;  %v1066_v43 = vrot.slane %v970_v27, %v6583_v41  ;;  %v1077_v45 = vrot.slane %v971_v44, %v6557_v25  ;;  %vm925_vm9 = vcmp.le.s32.totalorder %v909_v62, 40  ;;  %s6042_s19 = sshll.u32 (%p900_p0), %s6113_s11, 4  ;;  %s6043_s19 = int_to_ptr.vmem [resolvable:$false] %s6042_s19 }
 0x125   : >> { %9409 = vst [vmem:[#allocation12_spill] sm:$0xff] %v9408_v42  ;;  %v1088_v46 = vrot.slane %v971_v44, %v6555_v24  ;;  %v1099_v47 = vrot.slane %v971_v44, %v6567_v30  ;;  %v1110_v48 = vrot.slane %v971_v44, %v6570_v32  ;;  %v1121_v49 = vrot.slane %v971_v44, %v6573_v34  ;;  %vm6600_vm8 = vmand %vm924_vm6, %vm940_vm7  ;;  %p6040_p2 = pnand (%p900_p0), %p6039_p1, %p6178_p6  ;;  %s6044_s20 = scalar_lea.vmem (%p900_p0), %s6043_s19, 4096 }
 0x126   : >> { %v1132_v50 = vrot.slane %v971_v44, %v6576_v36  ;;  %v1143_v52 = vrot.slane %v971_v44, %v6579_v38  ;;  %v9411_v53 = vsel %vm6600_vm8, 4294967295, %v9410_v53  ;;  %v1154_v54 = vrot.slane %v971_v44, %v6583_v41  ;;  %p6045_p4 = scmp.lt.s32.totalorder (%p900_p0), %s9262_s6, %s6043_s19  ;;  %p6046_p5 = scmp.lt.s32.totalorder (%p900_p0), %s6044_s20, %s6038_s10 }
 0x127   : >> { %1006 = vbcast.lane.b32.xlu1 %v1000_v28, 264  ;;  %995 = vbcast.lane.b32.xlu0 %v989_v29, 264  ;;  %9412 = vst [vmem:[#allocation13_spill] sm:$0xff] %v9411_v53  ;;  %v972_v55 = vsel %vm6600_vm8, %v908_v51, 4294967295  ;;  %vm941_vm10 = vcmp.ne.s32.totalorder %v909_v62, 0  ;;  %vm926_vm12 = vcmp.le.s32.totalorder %v910_v9, 40  ;;  %p6041_p3 = pneg (%p900_p0), %p6040_p2 }
 0x128   : >> { %v1165_v56 = vrot.slane %v972_v55, %v6557_v25  ;;  %v1176_v57 = vrot.slane %v972_v55, %v6555_v24  ;;  %v1187_v58 = vrot.slane %v972_v55, %v6567_v30  ;;  %v1198_v59 = vrot.slane %v972_v55, %v6570_v32  ;;  %vm6615_vm11 = vmand %vm925_vm9, %vm941_vm10  ;;  %v913_v53 = vld [vmem:[%s6552_s30 + $0x38] sm:$0xff]  ;;  %p6047_p7 = por (%p900_p0), %p6046_p5, %p6045_p4 }
 0x129   : >> { %v1209_v60 = vrot.slane %v972_v55, %v6573_v34  ;;  %v1220_v61 = vrot.slane %v972_v55, %v6576_v36  ;;  %v1231_v63 = vrot.slane %v972_v55, %v6579_v38  ;;  %v9414_v0 = vsel %vm6615_vm11, 4294967295, %v9413_v0 }
 0x12a   : >> { %9415 = vst [vmem:[#allocation14_spill] sm:$0xff] %v9414_v0  ;;  %v1242_v1 = vrot.slane %v972_v55, %v6583_v41  ;;  %v973_v2 = vsel %vm6615_vm11, %v909_v62, 4294967295  ;;  %vm942_vm13 = vcmp.ne.s32.totalorder %v910_v9, 0  ;;  %v9419_v55 = vmov 0  ;;  %p6048_p10 = pnand (%p900_p0), %p6047_p7, %p6041_p3 }
 0x12b   : >> { %1017 = vbcast.lane.b32.xlu1 %v1011_v31, 264  ;;  %1013 = vbcast.lane.b32.xlu0 %v1011_v31, 256  ;;  %v1253_v3 = vrot.slane %v973_v2, %v6557_v25  ;;  %v1264_v4 = vrot.slane %v973_v2, %v6555_v24  ;;  %v1275_v5 = vrot.slane %v973_v2, %v6567_v30  ;;  %vm6638_vm14 = vmand %vm926_vm12, %vm942_vm13  ;;  %vm929_vm7 = vcmp.le.s32.totalorder %v913_v53, 40 }
 0x12c   : >> { %v1286_v6 = vrot.slane %v973_v2, %v6570_v32  ;;  %v1297_v7 = vrot.slane %v973_v2, %v6573_v34  ;;  %v1308_v8 = vrot.slane %v973_v2, %v6576_v36  ;;  %v1319_v12 = vrot.slane %v973_v2, %v6579_v38 }
 0x12d   : >> { %v9417_v19 = vsel %vm6638_vm14, 4294967295, %v9416_v19  ;;  %v1330_v17 = vrot.slane %v973_v2, %v6583_v41  ;;  %v974_v18 = vsel %vm6638_vm14, %v910_v9, 4294967295  ;;  %vm945_vm9 = vcmp.ne.s32.totalorder %v913_v53, 0 }
 0x12e   : >> { %9418 = vst [vmem:[#allocation15_spill] sm:$0xff] %v9417_v19  ;;  %v1341_v21 = vrot.slane %v974_v18, %v6557_v25  ;;  %v1352_v28 = vrot.slane %v974_v18, %v6555_v24  ;;  %v1374_v39 = vrot.slane %v974_v18, %v6570_v32  ;;  %v1385_v44 = vrot.slane %v974_v18, %v6573_v34  ;;  %vm6779_vm10 = vmand %vm929_vm7, %vm945_vm9 }
 0x12f   : >> { %1028 = vbcast.lane.b32.xlu1 %v1022_v33, 264  ;;  %1024 = vbcast.lane.b32.xlu0 %v1022_v33, 256  ;;  %v1363_v33 = vrot.slane %v974_v18, %v6567_v30  ;;  %v1407_v51 = vrot.slane %v974_v18, %v6579_v38 }
 0x133   : >> { %1039 = vbcast.lane.b32.xlu1 %v1033_v35, 264  ;;  %1035 = vbcast.lane.b32.xlu0 %v1033_v35, 256 }
 0x137   : >> { %1050 = vbcast.lane.b32.xlu1 %v1044_v37, 264  ;;  %1046 = vbcast.lane.b32.xlu0 %v1044_v37, 256 }
 0x13b   : >> { %1061 = vbcast.lane.b32.xlu1 %v1055_v40, 264  ;;  %1057 = vbcast.lane.b32.xlu0 %v1055_v40, 256 }
 0x13f   : >> { %1072 = vbcast.lane.b32.xlu1 %v1066_v43, 264  ;;  %1068 = vbcast.lane.b32.xlu0 %v1066_v43, 256 }
 0x143   : >> { %1083 = vbcast.lane.b32.xlu1 %v1077_v45, 264  ;;  %1079 = vbcast.lane.b32.xlu0 %v1077_v45, 256 }
 0x147   : >> { %1094 = vbcast.lane.b32.xlu1 %v1088_v46, 264  ;;  %1090 = vbcast.lane.b32.xlu0 %v1088_v46, 256 }
 0x14b   : >> { %1105 = vbcast.lane.b32.xlu1 %v1099_v47, 264  ;;  %1101 = vbcast.lane.b32.xlu0 %v1099_v47, 256  ;;  %v1396_v47 = vrot.slane %v974_v18, %v6576_v36 }
 0x14f   : >> { %1116 = vbcast.lane.b32.xlu1 %v1110_v48, 264  ;;  %1112 = vbcast.lane.b32.xlu0 %v1110_v48, 256  ;;  %v911_v48 = vld [vmem:[%s6552_s30 + $0x28] sm:$0xff] }
 0x150   : >> { %vm927_vm15 = vcmp.le.s32.totalorder %v911_v48, 40  ;;  %vm943_vm0 = vcmp.ne.s32.totalorder %v911_v48, 0 }
 0x151   : >> { %vm6685_vm1 = vmand %vm927_vm15, %vm943_vm0 }
 0x152   : >> { %v9420_v55 = vsel %vm6685_vm1, 4294967295, %v9419_v55 }
 0x153   : >> { %1127 = vbcast.lane.b32.xlu1 %v1121_v49, 264  ;;  %1123 = vbcast.lane.b32.xlu0 %v1121_v49, 256  ;;  %9421 = vst [vmem:[#allocation16_spill] sm:$0xff] %v9420_v55 }
 0x157   : >> { %1138 = vbcast.lane.b32.xlu1 %v1132_v50, 264  ;;  %1134 = vbcast.lane.b32.xlu0 %v1132_v50, 256 }
 0x15b   : >> { %1149 = vbcast.lane.b32.xlu1 %v1143_v52, 264  ;;  %1145 = vbcast.lane.b32.xlu0 %v1143_v52, 256 }
 0x15f   : >> { %1160 = vbcast.lane.b32.xlu1 %v1154_v54, 264  ;;  %1156 = vbcast.lane.b32.xlu0 %v1154_v54, 256 }
 0x163   : >> { %1171 = vbcast.lane.b32.xlu1 %v1165_v56, 264  ;;  %1167 = vbcast.lane.b32.xlu0 %v1165_v56, 256  ;;  %v1418_v56 = vrot.slane %v974_v18, %v6583_v41 }
 0x167   : >> { %1182 = vbcast.lane.b32.xlu1 %v1176_v57, 264  ;;  %1178 = vbcast.lane.b32.xlu0 %v1176_v57, 256  ;;  %v975_v57 = vsel %vm6685_vm1, %v911_v48, 4294967295  ;;  %v9422_v48 = vmov 0 }
 0x168   : >> { %v1473_v9 = vrot.slane %v975_v57, %v6573_v34  ;;  %v1484_v18 = vrot.slane %v975_v57, %v6576_v36 }
 0x16b   : >> { %1193 = vbcast.lane.b32.xlu1 %v1187_v58, 264  ;;  %1189 = vbcast.lane.b32.xlu0 %v1187_v58, 256 }
 0x16f   : >> { %1204 = vbcast.lane.b32.xlu1 %v1198_v59, 264  ;;  %1200 = vbcast.lane.b32.xlu0 %v1198_v59, 256 }
 0x173   : >> { %1215 = vbcast.lane.b32.xlu1 %v1209_v60, 264  ;;  %1211 = vbcast.lane.b32.xlu0 %v1209_v60, 256  ;;  %v1429_v60 = vrot.slane %v975_v57, %v6557_v25 }
 0x177   : >> { %1226 = vbcast.lane.b32.xlu1 %v1220_v61, 264  ;;  %1222 = vbcast.lane.b32.xlu0 %v1220_v61, 256 }
 0x17b   : >> { %1237 = vbcast.lane.b32.xlu1 %v1231_v63, 264  ;;  %1233 = vbcast.lane.b32.xlu0 %v1231_v63, 256  ;;  %v1440_v63 = vrot.slane %v975_v57, %v6555_v24 }
 0x17f   : >> { %1248 = vbcast.lane.b32.xlu1 %v1242_v1, 264  ;;  %1244 = vbcast.lane.b32.xlu0 %v1242_v1, 256 }
 0x183   : >> { %1259 = vbcast.lane.b32.xlu1 %v1253_v3, 264  ;;  %1255 = vbcast.lane.b32.xlu0 %v1253_v3, 256  ;;  %v1451_v3 = vrot.slane %v975_v57, %v6567_v30 }
 0x187   : >> { %1270 = vbcast.lane.b32.xlu1 %v1264_v4, 264  ;;  %1266 = vbcast.lane.b32.xlu0 %v1264_v4, 256 }
 0x18b   : >> { %1281 = vbcast.lane.b32.xlu1 %v1275_v5, 264  ;;  %1277 = vbcast.lane.b32.xlu0 %v1275_v5, 256 }
 0x18f   : >> { %1292 = vbcast.lane.b32.xlu1 %v1286_v6, 264  ;;  %1288 = vbcast.lane.b32.xlu0 %v1286_v6, 256  ;;  %v1462_v6 = vrot.slane %v975_v57, %v6570_v32 }
 0x193   : >> { %1303 = vbcast.lane.b32.xlu1 %v1297_v7, 264  ;;  %1299 = vbcast.lane.b32.xlu0 %v1297_v7, 256 }
 0x195   : >> { %v6629_v10 = vpop.permute.xlu1 %1002  ;;  %v6631_v11 = vpop.permute.xlu0 %991 }
 0x196   : >> { %vm2396_vm9 = vcmp.eq.s32.totalorder %v6629_v10, %v9400_v16 }
 0x197   : >> { %1314 = vbcast.lane.b32.xlu1 %v1308_v8, 264  ;;  %1310 = vbcast.lane.b32.xlu0 %v1308_v8, 256 }
 0x199   : >> { %v6634_v14 = vpop.permute.xlu1 %1006  ;;  %v6636_v15 = vpop.permute.xlu0 %995 }
 0x19a   : >> { %vm2397_vm7 = vcmp.eq.s32.totalorder %v6634_v14, %v9400_v16 }
 0x19b   : >> { %1325 = vbcast.lane.b32.xlu1 %v1319_v12, 264  ;;  %1321 = vbcast.lane.b32.xlu0 %v1319_v12, 256 }
 0x19d   : >> { %v6645_v20 = vpop.permute.xlu1 %1017  ;;  %v6647_v22 = vpop.permute.xlu0 %1013 }
 0x19f   : >> { %1336 = vbcast.lane.b32.xlu1 %v1330_v17, 264  ;;  %1332 = vbcast.lane.b32.xlu0 %v1330_v17, 256 }
 0x1a1   : >> { %v6650_v23 = vpop.permute.xlu1 %1028  ;;  %v6652_v27 = vpop.permute.xlu0 %1024 }
 0x1a3   : >> { %1347 = vbcast.lane.b32.xlu1 %v1341_v21, 264  ;;  %1343 = vbcast.lane.b32.xlu0 %v1341_v21, 256  ;;  %v912_v21 = vld [vmem:[%s6552_s30 + $0x30] sm:$0xff] }
 0x1a4   : >> { %vm928_vm3 = vcmp.le.s32.totalorder %v912_v21, 40  ;;  %vm944_vm4 = vcmp.ne.s32.totalorder %v912_v21, 0 }
 0x1a5   : >> { %v6655_v29 = vpop.permute.xlu1 %1039  ;;  %v6657_v31 = vpop.permute.xlu0 %1035  ;;  %vm6732_vm6 = vmand %vm928_vm3, %vm944_vm4 }
 0x1a6   : >> { %v9423_v48 = vsel %vm6732_vm6, 4294967295, %v9422_v48 }
 0x1a7   : >> { %1358 = vbcast.lane.b32.xlu1 %v1352_v28, 264  ;;  %1354 = vbcast.lane.b32.xlu0 %v1352_v28, 256  ;;  %9424 = vst [vmem:[#allocation17_spill] sm:$0xff] %v9423_v48 }
 0x1a9   : >> { %v6660_v35 = vpop.permute.xlu1 %1050  ;;  %v6662_v37 = vpop.permute.xlu0 %1046 }
 0x1ab   : >> { %1369 = vbcast.lane.b32.xlu1 %v1363_v33, 264  ;;  %1365 = vbcast.lane.b32.xlu0 %v1363_v33, 256 }
 0x1ad   : >> { %v6665_v40 = vpop.permute.xlu1 %1061  ;;  %v6667_v43 = vpop.permute.xlu0 %1057 }
 0x1af   : >> { %1380 = vbcast.lane.b32.xlu1 %v1374_v39, 264  ;;  %1376 = vbcast.lane.b32.xlu0 %v1374_v39, 256  ;;  %v1495_v39 = vrot.slane %v975_v57, %v6579_v38 }
 0x1b1   : >> { %v6670_v45 = vpop.permute.xlu1 %1072  ;;  %v6672_v46 = vpop.permute.xlu0 %1068 }
 0x1b3   : >> { %1391 = vbcast.lane.b32.xlu1 %v1385_v44, 264  ;;  %1387 = vbcast.lane.b32.xlu0 %v1385_v44, 256 }
 0x1b5   : >> { %v6676_v49 = vpop.permute.xlu1 %1083  ;;  %v6678_v50 = vpop.permute.xlu0 %1079 }
 0x1b7   : >> { %1402 = vbcast.lane.b32.xlu1 %v1396_v47, 264  ;;  %1398 = vbcast.lane.b32.xlu0 %v1396_v47, 256 }
 0x1b9   : >> { %v6681_v52 = vpop.permute.xlu1 %1094  ;;  %v6683_v54 = vpop.permute.xlu0 %1090 }
 0x1bb   : >> { %1413 = vbcast.lane.b32.xlu1 %v1407_v51, 264  ;;  %1409 = vbcast.lane.b32.xlu0 %v1407_v51, 256  ;;  %v1506_v51 = vrot.slane %v975_v57, %v6583_v41 }
 0x1bd   : >> { %v6692_v58 = vpop.permute.xlu1 %1105  ;;  %v6694_v59 = vpop.permute.xlu0 %1101 }
 0x1bf   : >> { %1424 = vbcast.lane.b32.xlu1 %v1418_v56, 264  ;;  %1420 = vbcast.lane.b32.xlu0 %v1418_v56, 256  ;;  %v976_v56 = vsel %vm6732_vm6, %v912_v21, 4294967295 }
 0x1c0   : >> { %v1539_v21 = vrot.slane %v976_v56, %v6567_v30  ;;  %v1550_v48 = vrot.slane %v976_v56, %v6570_v32  ;;  %v1561_v19 = vrot.slane %v976_v56, %v6573_v34  ;;  %v1572_v42 = vrot.slane %v976_v56, %v6576_v36 }
 0x1c1   : >> { %v6697_v61 = vpop.permute.xlu1 %1116  ;;  %v6699_v62 = vpop.permute.xlu0 %1112 }
 0x1c3   : >> { %1435 = vbcast.lane.b32.xlu1 %v1429_v60, 264  ;;  %1431 = vbcast.lane.b32.xlu0 %v1429_v60, 256 }
 0x1c5   : >> { %v6702_v1 = vpop.permute.xlu1 %1127  ;;  %v6704_v2 = vpop.permute.xlu0 %1123 }
 0x1c7   : >> { %1446 = vbcast.lane.b32.xlu1 %v1440_v63, 264  ;;  %1442 = vbcast.lane.b32.xlu0 %v1440_v63, 256 }
 0x1c9   : >> { %v6707_v4 = vpop.permute.xlu1 %1138  ;;  %v6709_v5 = vpop.permute.xlu0 %1134 }
 0x1cb   : >> { %1457 = vbcast.lane.b32.xlu1 %v1451_v3, 264  ;;  %1453 = vbcast.lane.b32.xlu0 %v1451_v3, 256  ;;  %v1517_v3 = vrot.slane %v976_v56, %v6557_v25 }
 0x1cd   : >> { %v6712_v7 = vpop.permute.xlu1 %1149  ;;  %v6714_v8 = vpop.permute.xlu0 %1145 }
 0x1cf   : >> { %1468 = vbcast.lane.b32.xlu1 %v1462_v6, 264  ;;  %1464 = vbcast.lane.b32.xlu0 %v1462_v6, 256 }
 0x1d1   : >> { %v6717_v12 = vpop.permute.xlu1 %1160  ;;  %v6719_v17 = vpop.permute.xlu0 %1156 }
 0x1d3   : >> { %1479 = vbcast.lane.b32.xlu1 %v1473_v9, 264  ;;  %1475 = vbcast.lane.b32.xlu0 %v1473_v9, 256 }
 0x1d5   : >> { %v6723_v28 = vpop.permute.xlu1 %1171  ;;  %v6725_v33 = vpop.permute.xlu0 %1167 }
 0x1d7   : >> { %1490 = vbcast.lane.b32.xlu1 %v1484_v18, 264  ;;  %1486 = vbcast.lane.b32.xlu0 %v1484_v18, 256  ;;  %v1528_v18 = vrot.slane %v976_v56, %v6555_v24 }
 0x1d9   : >> { %v6728_v44 = vpop.permute.xlu1 %1182  ;;  %v6730_v47 = vpop.permute.xlu0 %1178 }
 0x1db   : >> { %1501 = vbcast.lane.b32.xlu1 %v1495_v39, 264  ;;  %1497 = vbcast.lane.b32.xlu0 %v1495_v39, 256 }
 0x1dd   : >> { %v6739_v60 = vpop.permute.xlu1 %1193  ;;  %v6741_v63 = vpop.permute.xlu0 %1189 }
 0x1df   : >> { %1512 = vbcast.lane.b32.xlu1 %v1506_v51, 264  ;;  %1508 = vbcast.lane.b32.xlu0 %v1506_v51, 256 }
 0x1e1   : >> { %v6744_v6 = vpop.permute.xlu1 %1204  ;;  %v6746_v9 = vpop.permute.xlu0 %1200 }
 0x1e3   : >> { %1523 = vbcast.lane.b32.xlu1 %v1517_v3, 264  ;;  %1519 = vbcast.lane.b32.xlu0 %v1517_v3, 256 }
 0x1e5   : >> { %v6749_v57 = vpop.permute.xlu1 %1215  ;;  %v6751_v39 = vpop.permute.xlu0 %1211 }
 0x1e7   : >> { %1534 = vbcast.lane.b32.xlu1 %v1528_v18, 264  ;;  %1530 = vbcast.lane.b32.xlu0 %v1528_v18, 256 }
 0x1e9   : >> { %v6754_v51 = vpop.permute.xlu1 %1226  ;;  %v6756_v13 = vpop.permute.xlu0 %1222 }
 0x1ea   : >> { %9425 = vst [vmem:[#allocation18_spill] sm:$0xff] %v6754_v51  ;;  %9426 = vst [vmem:[#allocation19_spill] sm:$0xff] %v6756_v13 }
 0x1eb   : >> { %1545 = vbcast.lane.b32.xlu1 %v1539_v21, 264  ;;  %1541 = vbcast.lane.b32.xlu0 %v1539_v21, 256 }
 0x1ed   : >> { %v6759_v3 = vpop.permute.xlu1 %1237  ;;  %v6761_v55 = vpop.permute.xlu0 %1233 }
 0x1ee   : >> { %9427 = vst [vmem:[#allocation20_spill] sm:$0xff] %v6759_v3  ;;  %9428 = vst [vmem:[#allocation21_spill] sm:$0xff] %v6761_v55 }
 0x1ef   : >> { %1556 = vbcast.lane.b32.xlu1 %v1550_v48, 264  ;;  %1552 = vbcast.lane.b32.xlu0 %v1550_v48, 256  ;;  %v1583_v48 = vrot.slane %v976_v56, %v6579_v38 }
 0x1f1   : >> { %v6764_v18 = vpop.permute.xlu1 %1248  ;;  %v6766_v0 = vpop.permute.xlu0 %1244 }
 0x1f2   : >> { %9429 = vst [vmem:[#allocation22_spill] sm:$0xff] %v6764_v18  ;;  %9430 = vst [vmem:[#allocation23_spill] sm:$0xff] %v6766_v0  ;;  %v9435_v0 = vmov 0 }
 0x1f3   : >> { %1567 = vbcast.lane.b32.xlu1 %v1561_v19, 264  ;;  %1563 = vbcast.lane.b32.xlu0 %v1561_v19, 256  ;;  %v9436_v0 = vsel %vm6779_vm10, 4294967295, %v9435_v0  ;;  %v1594_v19 = vrot.slane %v976_v56, %v6583_v41 }
 0x1f4   : >> { %9437 = vst [vmem:[#allocation28_spill] sm:$0xff] %v9436_v0 }
 0x1f5   : >> { %v6770_v21 = vpop.permute.xlu1 %1259  ;;  %v6772_v26 = vpop.permute.xlu0 %1255 }
 0x1f6   : >> { %9431 = vst [vmem:[#allocation24_spill] sm:$0xff] %v6770_v21  ;;  %9432 = vst [vmem:[#allocation25_spill] sm:$0xff] %v6772_v26  ;;  %v977_v26 = vsel %vm6779_vm10, %v913_v53, 4294967295 }
 0x1f7   : >> { %1578 = vbcast.lane.b32.xlu1 %v1572_v42, 264  ;;  %1574 = vbcast.lane.b32.xlu0 %v1572_v42, 256  ;;  %v1627_v53 = vrot.slane %v977_v26, %v6567_v30 }
 0x1f9   : >> { %v6775_v55 = vpop.permute.xlu1 %1270  ;;  %v6777_v18 = vpop.permute.xlu0 %1266 }
 0x1fa   : >> { %9433 = vst [vmem:[#allocation26_spill] sm:$0xff] %v6775_v55  ;;  %9434 = vst [vmem:[#allocation27_spill] sm:$0xff] %v6777_v18  ;;  %v1605_v55 = vrot.slane %v977_v26, %v6557_v25 }
 0x1fb   : >> { %1589 = vbcast.lane.b32.xlu1 %v1583_v48, 264  ;;  %1585 = vbcast.lane.b32.xlu0 %v1583_v48, 256  ;;  %v1616_v48 = vrot.slane %v977_v26, %v6555_v24 }
 0x1fd   : >> { %v6786_v21 = vpop.permute.xlu1 %1281  ;;  %v6788_v42 = vpop.permute.xlu0 %1277 }
 0x1fe   : >> { %9438 = vst [vmem:[#allocation29_spill] sm:$0xff] %v6786_v21  ;;  %9439 = vst [vmem:[#allocation30_spill] sm:$0xff] %v6788_v42 }
 0x1ff   : >> { %1600 = vbcast.lane.b32.xlu1 %v1594_v19, 264  ;;  %1596 = vbcast.lane.b32.xlu0 %v1594_v19, 256 }
 0x201   : >> { %v6791_v18 = vpop.permute.xlu1 %1292  ;;  %v6793_v3 = vpop.permute.xlu0 %1288 }
 0x202   : >> { %9440 = vst [vmem:[#allocation31_spill] sm:$0xff] %v6791_v18  ;;  %9441 = vst [vmem:[#allocation32_spill] sm:$0xff] %v6793_v3  ;;  %v1638_v3 = vrot.slane %v977_v26, %v6570_v32 }
 0x203   : >> { %1611 = vbcast.lane.b32.xlu1 %v1605_v55, 264  ;;  %1607 = vbcast.lane.b32.xlu0 %v1605_v55, 256 }
 0x205   : >> { %v6796_v56 = vpop.permute.xlu1 %1303  ;;  %v6798_v0 = vpop.permute.xlu0 %1299 }
 0x206   : >> { %9442 = vst [vmem:[#allocation33_spill] sm:$0xff] %v6796_v56  ;;  %9443 = vst [vmem:[#allocation34_spill] sm:$0xff] %v6798_v0  ;;  %v1649_v0 = vrot.slane %v977_v26, %v6573_v34 }
 0x207   : >> { %1622 = vbcast.lane.b32.xlu1 %v1616_v48, 264  ;;  %1618 = vbcast.lane.b32.xlu0 %v1616_v48, 256 }
 0x209   : >> { %v6801_v19 = vpop.permute.xlu1 %1314  ;;  %v6803_v42 = vpop.permute.xlu0 %1310 }
 0x20a   : >> { %9444 = vst [vmem:[#allocation35_spill] sm:$0xff] %v6801_v19  ;;  %9445 = vst [vmem:[#allocation36_spill] sm:$0xff] %v6803_v42  ;;  %v1660_v42 = vrot.slane %v977_v26, %v6576_v36  ;;  %v914_v19 = vld [vmem:[%s6552_s30 + $0x40] sm:$0xff] }
 0x20b   : >> { %1633 = vbcast.lane.b32.xlu1 %v1627_v53, 264  ;;  %1629 = vbcast.lane.b32.xlu0 %v1627_v53, 256  ;;  %vm930_vm12 = vcmp.le.s32.totalorder %v914_v19, 40  ;;  %vm946_vm13 = vcmp.ne.s32.totalorder %v914_v19, 0 }
 0x20c   : >> { %vm6826_vm15 = vmand %vm930_vm12, %vm946_vm13  ;;  %vm2394_vm12 = vcmp.eq.s32.totalorder %v6631_v11, %v9400_v16  ;;  %vm2395_vm13 = vcmp.eq.s32.totalorder %v6636_v15, %v9400_v16 }
 0x20d   : >> { %v6806_v55 = vpop.permute.xlu1 %1325  ;;  %v6808_v18 = vpop.permute.xlu0 %1321 }
 0x20e   : >> { %9446 = vst [vmem:[#allocation37_spill] sm:$0xff] %v6806_v55  ;;  %9447 = vst [vmem:[#allocation38_spill] sm:$0xff] %v6808_v18 }
 0x20f   : >> { %1644 = vbcast.lane.b32.xlu1 %v1638_v3, 264  ;;  %1640 = vbcast.lane.b32.xlu0 %v1638_v3, 256  ;;  %v1671_v3 = vrot.slane %v977_v26, %v6579_v38 }
 0x211   : >> { %v6811_v48 = vpop.permute.xlu1 %1336  ;;  %v6813_v56 = vpop.permute.xlu0 %1332 }
 0x212   : >> { %9448 = vst [vmem:[#allocation39_spill] sm:$0xff] %v6811_v48  ;;  %9449 = vst [vmem:[#allocation40_spill] sm:$0xff] %v6813_v56  ;;  %v9454_v56 = vmov 0 }
 0x213   : >> { %1655 = vbcast.lane.b32.xlu1 %v1649_v0, 264  ;;  %1651 = vbcast.lane.b32.xlu0 %v1649_v0, 256  ;;  %v9455_v56 = vsel %vm6826_vm15, 4294967295, %v9454_v56  ;;  %v1682_v0 = vrot.slane %v977_v26, %v6583_v41 }
 0x214   : >> { %9456 = vst [vmem:[#allocation45_spill] sm:$0xff] %v9455_v56 }
 0x215   : >> { %v6817_v53 = vpop.permute.xlu1 %1347  ;;  %v6819_v21 = vpop.permute.xlu0 %1343 }
 0x216   : >> { %9450 = vst [vmem:[#allocation41_spill] sm:$0xff] %v6817_v53  ;;  %9451 = vst [vmem:[#allocation42_spill] sm:$0xff] %v6819_v21  ;;  %v978_v21 = vsel %vm6826_vm15, %v914_v19, 4294967295 }
 0x217   : >> { %1666 = vbcast.lane.b32.xlu1 %v1660_v42, 264  ;;  %1662 = vbcast.lane.b32.xlu0 %v1660_v42, 256  ;;  %v1715_v19 = vrot.slane %v978_v21, %v6567_v30 }
 0x219   : >> { %v6822_v18 = vpop.permute.xlu1 %1358  ;;  %v6824_v48 = vpop.permute.xlu0 %1354 }
 0x21a   : >> { %9452 = vst [vmem:[#allocation43_spill] sm:$0xff] %v6822_v18  ;;  %9453 = vst [vmem:[#allocation44_spill] sm:$0xff] %v6824_v48  ;;  %v1693_v18 = vrot.slane %v978_v21, %v6557_v25 }
 0x21b   : >> { %1677 = vbcast.lane.b32.xlu1 %v1671_v3, 264  ;;  %1673 = vbcast.lane.b32.xlu0 %v1671_v3, 256  ;;  %v1704_v3 = vrot.slane %v978_v21, %v6555_v24 }
 0x21d   : >> { %v6833_v53 = vpop.permute.xlu1 %1369  ;;  %v6835_v42 = vpop.permute.xlu0 %1365 }
 0x21e   : >> { %9457 = vst [vmem:[#allocation46_spill] sm:$0xff] %v6833_v53  ;;  %9458 = vst [vmem:[#allocation47_spill] sm:$0xff] %v6835_v42 }
 0x21f   : >> { %1688 = vbcast.lane.b32.xlu1 %v1682_v0, 264  ;;  %1684 = vbcast.lane.b32.xlu0 %v1682_v0, 256 }
 0x221   : >> { %v6838_v48 = vpop.permute.xlu1 %1380  ;;  %v6840_v55 = vpop.permute.xlu0 %1376 }
 0x222   : >> { %9459 = vst [vmem:[#allocation48_spill] sm:$0xff] %v6838_v48  ;;  %9460 = vst [vmem:[#allocation49_spill] sm:$0xff] %v6840_v55  ;;  %v1726_v55 = vrot.slane %v978_v21, %v6570_v32 }
 0x223   : >> { %1699 = vbcast.lane.b32.xlu1 %v1693_v18, 264  ;;  %1695 = vbcast.lane.b32.xlu0 %v1693_v18, 256 }
 0x225   : >> { %v6843_v26 = vpop.permute.xlu1 %1391  ;;  %v6845_v56 = vpop.permute.xlu0 %1387 }
 0x226   : >> { %9461 = vst [vmem:[#allocation50_spill] sm:$0xff] %v6843_v26  ;;  %9462 = vst [vmem:[#allocation51_spill] sm:$0xff] %v6845_v56  ;;  %v1737_v56 = vrot.slane %v978_v21, %v6573_v34 }
 0x227   : >> { %1710 = vbcast.lane.b32.xlu1 %v1704_v3, 264  ;;  %1706 = vbcast.lane.b32.xlu0 %v1704_v3, 256 }
 0x229   : >> { %v6848_v0 = vpop.permute.xlu1 %1402  ;;  %v6850_v42 = vpop.permute.xlu0 %1398 }
 0x22a   : >> { %9463 = vst [vmem:[#allocation52_spill] sm:$0xff] %v6848_v0  ;;  %9464 = vst [vmem:[#allocation53_spill] sm:$0xff] %v6850_v42  ;;  %v1748_v42 = vrot.slane %v978_v21, %v6576_v36  ;;  %v915_v0 = vld [vmem:[%s6552_s30 + $0x48] sm:$0xff] }
 0x22b   : >> { %1721 = vbcast.lane.b32.xlu1 %v1715_v19, 264  ;;  %1717 = vbcast.lane.b32.xlu0 %v1715_v19, 256  ;;  %vm931_vm0 = vcmp.le.s32.totalorder %v915_v0, 40  ;;  %vm947_vm3 = vcmp.ne.s32.totalorder %v915_v0, 0 }
 0x22c   : >> { %vm6873_vm4 = vmand %vm931_vm0, %vm947_vm3  ;;  %vm2399_vm0 = vcmp.eq.s32.totalorder %v6645_v20, %v9400_v16  ;;  %vm2398_vm3 = vcmp.eq.s32.totalorder %v6647_v22, %v9400_v16 }
 0x22d   : >> { %v6853_v18 = vpop.permute.xlu1 %1413  ;;  %v6855_v48 = vpop.permute.xlu0 %1409 }
 0x22e   : >> { %9465 = vst [vmem:[#allocation54_spill] sm:$0xff] %v6853_v18  ;;  %9466 = vst [vmem:[#allocation55_spill] sm:$0xff] %v6855_v48 }
 0x22f   : >> { %1732 = vbcast.lane.b32.xlu1 %v1726_v55, 264  ;;  %1728 = vbcast.lane.b32.xlu0 %v1726_v55, 256  ;;  %v1759_v55 = vrot.slane %v978_v21, %v6579_v38 }
 0x231   : >> { %v6858_v3 = vpop.permute.xlu1 %1424  ;;  %v6860_v26 = vpop.permute.xlu0 %1420 }
 0x232   : >> { %9467 = vst [vmem:[#allocation56_spill] sm:$0xff] %v6858_v3  ;;  %9468 = vst [vmem:[#allocation57_spill] sm:$0xff] %v6860_v26  ;;  %v9473_v26 = vmov 0 }
 0x233   : >> { %1743 = vbcast.lane.b32.xlu1 %v1737_v56, 264  ;;  %1739 = vbcast.lane.b32.xlu0 %v1737_v56, 256  ;;  %v9474_v26 = vsel %vm6873_vm4, 4294967295, %v9473_v26  ;;  %v1770_v56 = vrot.slane %v978_v21, %v6583_v41 }
 0x234   : >> { %9475 = vst [vmem:[#allocation62_spill] sm:$0xff] %v9474_v26  ;;  %v9341_v26 = vmov 0.0  }
 0x235   : >> { %v6864_v19 = vpop.permute.xlu1 %1435  ;;  %v6866_v53 = vpop.permute.xlu0 %1431  ;;  %v5562_v10 = vsel %vm2396_vm9, 1.0, %v9341_v26  ;;  %v5560_v15 = vsel %vm2394_vm12, 1.0, %v9341_v26  ;;  %vm2400_vm9 = vcmp.eq.s32.totalorder %v6652_v27, %v9400_v16  ;;  %vm2403_vm12 = vcmp.eq.s32.totalorder %v6655_v29, %v9400_v16  ;;  %v916_v27 = vld [vmem:[%s6552_s30 + $0x50] sm:$0xff] }
 0x236   : >> { %9469 = vst [vmem:[#allocation58_spill] sm:$0xff] %v6864_v19  ;;  %9470 = vst [vmem:[#allocation59_spill] sm:$0xff] %v6866_v53  ;;  %v6880_v53 = vsel %vm6873_vm4, %v915_v0, 4294967295  ;;  %vm2407_vm4 = vcmp.eq.s32.totalorder %v6665_v40, %v9400_v16  ;;  %vm932_vm15 = vcmp.le.s32.totalorder %v916_v27, 40  ;;  %vm948_vm10 = vcmp.ne.s32.totalorder %v916_v27, 0 }
 0x237   : >> { %1754 = vbcast.lane.b32.xlu1 %v1748_v42, 264  ;;  %1750 = vbcast.lane.b32.xlu0 %v1748_v42, 256  ;;  %v1792_v21 = vrot.slane %v6880_v53, %v6555_v24  ;;  %v1814_v11 = vrot.slane %v6880_v53, %v6570_v32 }
 0x239   : >> { %v6869_v48 = vpop.permute.xlu1 %1446  ;;  %v6871_v3 = vpop.permute.xlu0 %1442 }
 0x23a   : >> { %9471 = vst [vmem:[#allocation60_spill] sm:$0xff] %v6869_v48  ;;  %9472 = vst [vmem:[#allocation61_spill] sm:$0xff] %v6871_v3  ;;  %v1781_v3 = vrot.slane %v6880_v53, %v6557_v25 }
 0x23b   : >> { %1765 = vbcast.lane.b32.xlu1 %v1759_v55, 264  ;;  %1761 = vbcast.lane.b32.xlu0 %v1759_v55, 256 }
 0x23d   : >> { %v6882_v19 = vpop.permute.xlu1 %1457  ;;  %v6884_v42 = vpop.permute.xlu0 %1453 }
 0x23e   : >> { %9476 = vst [vmem:[#allocation63_spill] sm:$0xff] %v6882_v19  ;;  %9477 = vst [vmem:[#allocation64_spill] sm:$0xff] %v6884_v42 }
 0x23f   : >> { %1776 = vbcast.lane.b32.xlu1 %v1770_v56, 264  ;;  %1772 = vbcast.lane.b32.xlu0 %v1770_v56, 256  ;;  %v1803_v56 = vrot.slane %v6880_v53, %v6567_v30 }
 0x241   : >> { %v6888_v48 = vpop.permute.xlu1 %1468  ;;  %v6890_v18 = vpop.permute.xlu0 %1464 }
 0x242   : >> { %9478 = vst [vmem:[#allocation65_spill] sm:$0xff] %v6888_v48  ;;  %9479 = vst [vmem:[#allocation66_spill] sm:$0xff] %v6890_v18 }
 0x243   : >> { %1787 = vbcast.lane.b32.xlu1 %v1781_v3, 264  ;;  %1783 = vbcast.lane.b32.xlu0 %v1781_v3, 256  ;;  %v5563_v3 = vsel %vm2397_vm7, 1.0, %v9341_v26  ;;  %vm2401_vm7 = vcmp.eq.s32.totalorder %v6650_v23, %v9400_v16  ;;  %v1836_v23 = vrot.slane %v6880_v53, %v6576_v36 }
 0x245   : >> { %v6896_v0 = vpop.permute.xlu1 %1479  ;;  %v6898_v55 = vpop.permute.xlu0 %1475 }
 0x246   : >> { %9480 = vst [vmem:[#allocation67_spill] sm:$0xff] %v6896_v0  ;;  %9481 = vst [vmem:[#allocation68_spill] sm:$0xff] %v6898_v55  ;;  %v5564_v0 = vsel %vm2398_vm3, 1.0, %v9341_v26  ;;  %vm2404_vm3 = vcmp.eq.s32.totalorder %v6662_v37, %v9400_v16 }
 0x247   : >> { %1798 = vbcast.lane.b32.xlu1 %v1792_v21, 264  ;;  %1794 = vbcast.lane.b32.xlu0 %v1792_v21, 256  ;;  %v3169_v21 = vadd.f32 %v5563_v3, %v5562_v10 }
 0x249   : >> { %v6909_v14 = vpop.permute.xlu1 %1490  ;;  %v6911_v55 = vpop.permute.xlu0 %1486  ;;  %v3170_v48 = vrot.slane %v3169_v21, 4 }
 0x24a   : >> { %9482 = vst [vmem:[#allocation69_spill] sm:$0xff] %v6909_v14  ;;  %9483 = vst [vmem:[#allocation70_spill] sm:$0xff] %v6911_v55  ;;  %v5561_v14 = vsel %vm2395_vm13, 1.0, %v9341_v26  ;;  %v5565_v55 = vsel %vm2399_vm0, 1.0, %v9341_v26  ;;  %vm2402_vm13 = vcmp.eq.s32.totalorder %v6657_v31, %v9400_v16  ;;  %vm2405_vm0 = vcmp.eq.s32.totalorder %v6660_v35, %v9400_v16 }
 0x24b   : >> { %1809 = vbcast.lane.b32.xlu1 %v1803_v56, 264  ;;  %1805 = vbcast.lane.b32.xlu0 %v1803_v56, 256  ;;  %v3162_v22 = vadd.f32 %v5561_v14, %v5560_v15  ;;  %v1825_v56 = vrot.slane %v6880_v53, %v6573_v34  ;;  %v3176_v3 = vadd.f32 %v5565_v55, %v5564_v0 }
 0x24c   : >> { %v6944_v0 = vadd.f32 %v3170_v48, %v3169_v21 }
 0x24d   : >> { %v6924_v18 = vpop.permute.xlu1 %1501  ;;  %v6926_v20 = vpop.permute.xlu0 %1497  ;;  %v3163_v55 = vrot.slane %v3162_v22, 4  ;;  %v3177_v14 = vrot.slane %v3176_v3, 4 }
 0x24e   : >> { %9484 = vst [vmem:[#allocation71_spill] sm:$0xff] %v6924_v18  ;;  %9485 = vst [vmem:[#allocation72_spill] sm:$0xff] %v6926_v20 }
 0x24f   : >> { %1820 = vbcast.lane.b32.xlu1 %v1814_v11, 264  ;;  %1816 = vbcast.lane.b32.xlu0 %v1814_v11, 256  ;;  %v9488_v11 = vmov 0.0  }
 0x250   : >> { %v5567_v15 = vsel %vm2401_vm7, 1.0, %v9488_v11  ;;  %v5566_v29 = vsel %vm2400_vm9, 1.0, %v9488_v11  ;;  %v5569_v31 = vsel %vm2403_vm12, 1.0, %v9488_v11  ;;  %v5568_v35 = vsel %vm2402_vm13, 1.0, %v9488_v11  ;;  %vm6993_vm13 = vmand %vm932_vm15, %vm948_vm10 }
 0x251   : >> { %v6934_v10 = vpop.permute.xlu1 %1512  ;;  %v6936_v26 = vpop.permute.xlu0 %1508  ;;  %v5571_v48 = vsel %vm2405_vm0, 1.0, %v9488_v11  ;;  %vm2406_vm7 = vcmp.eq.s32.totalorder %v6667_v43, %v9400_v16  ;;  %v5570_v37 = vsel %vm2404_vm3, 1.0, %v9488_v11  ;;  %vm2408_vm12 = vcmp.eq.s32.totalorder %v6672_v46, %v9400_v16 }
 0x252   : >> { %9486 = vst [vmem:[#allocation73_spill] sm:$0xff] %v6934_v10  ;;  %9487 = vst [vmem:[#allocation74_spill] sm:$0xff] %v6936_v26  ;;  %vm2410_vm0 = vcmp.eq.s32.totalorder %v6678_v50, %v9400_v16  ;;  %vm2413_vm9 = vcmp.eq.s32.totalorder %v6681_v52, %v9400_v16  ;;  %vm2412_vm3 = vcmp.eq.s32.totalorder %v6683_v54, %v9400_v16  ;;  %v9493_v52 = vmov 0 }
 0x253   : >> { %1831 = vbcast.lane.b32.xlu1 %v1825_v56, 264  ;;  %1827 = vbcast.lane.b32.xlu0 %v1825_v56, 256  ;;  %v3164_v26 = vadd.f32 %v3163_v55, %v3162_v22  ;;  %v3190_v10 = vadd.f32 %v5569_v31, %v5568_v35  ;;  %v9494_v52 = vsel %vm6993_vm13, 4294967295, %v9493_v52  ;;  %v3197_v54 = vadd.f32 %v5571_v48, %v5570_v37 }
 0x254   : >> { %9495 = vst [vmem:[#allocation79_spill] sm:$0xff] %v9494_v52  ;;  %v5574_v43 = vsel %vm2408_vm12, 1.0, %v9488_v11  ;;  %v5576_v55 = vsel %vm2410_vm0, 1.0, %v9488_v11  ;;  %v5579_v31 = vsel %vm2413_vm9, 1.0, %v9488_v11  ;;  %v5578_v35 = vsel %vm2412_vm3, 1.0, %v9488_v11 }
 0x255   : >> { %v6958_v21 = vpop.permute.xlu1 %1523  ;;  %v6960_v56 = vpop.permute.xlu0 %1519  ;;  %v3178_v48 = vadd.f32 %v3177_v14, %v3176_v3  ;;  %v3165_v13 = vrot.slane %v3164_v26, 2  ;;  %v3198_v51 = vrot.slane %v3197_v54, 4  ;;  %vm2415_vm10 = vcmp.eq.s32.totalorder %v6692_v58, %v9400_v16 }
 0x256   : >> { %9489 = vst [vmem:[#allocation75_spill] sm:$0xff] %v6958_v21  ;;  %9490 = vst [vmem:[#allocation76_spill] sm:$0xff] %v6960_v56  ;;  %v1847_v56 = vrot.slane %v6880_v53, %v6579_v38  ;;  %v3183_v21 = vadd.f32 %v5567_v15, %v5566_v29  ;;  %v5572_v15 = vsel %vm2406_vm7, 1.0, %v9488_v11  ;;  %vm9497_vm7 = vcmp.eq.s32.totalorder %v6676_v49, %v9400_v16 }
 0x257   : >> { %1842 = vbcast.lane.b32.xlu1 %v1836_v23, 264  ;;  %1838 = vbcast.lane.b32.xlu0 %v1836_v23, 256  ;;  %v5573_v23 = vsel %vm2407_vm4, 1.0, %v9488_v11  ;;  %vm9496_vm4 = vcmp.eq.s32.totalorder %v6670_v45, %v9400_v16  ;;  %v5577_v22 = vsel %vm9497_vm7, 1.0, %v9488_v11  ;;  %v1858_v45 = vrot.slane %v6880_v53, %v6583_v41 }
 0x258   : >> { %v5575_v40 = vsel %vm9496_vm4, 1.0, %v9488_v11  ;;  %v3184_v37 = vrot.slane %v3183_v21, 4  ;;  %v3204_v46 = vadd.f32 %v5573_v23, %v5572_v15  ;;  %v3172_v49 = vrot.slane %v6944_v0, 2 }
 0x259   : >> { %v6987_v29 = vpop.permute.xlu1 %1534  ;;  %v6989_v50 = vpop.permute.xlu0 %1530  ;;  %v3211_v20 = vadd.f32 %v5575_v40, %v5574_v43  ;;  %v3218_v19 = vadd.f32 %v5577_v22, %v5576_v55  ;;  %v3179_v3 = vrot.slane %v3178_v48, 2  ;;  %vm2414_vm15 = vcmp.eq.s32.totalorder %v6694_v59, %v9400_v16 }
 0x25a   : >> { %9491 = vst [vmem:[#allocation77_spill] sm:$0xff] %v6987_v29  ;;  %9492 = vst [vmem:[#allocation78_spill] sm:$0xff] %v6989_v50  ;;  %v7016_v50 = vsel %vm6993_vm13, %v916_v27, 4294967295  ;;  %v3191_v29 = vrot.slane %v3190_v10, 4  ;;  %v3185_v27 = vadd.f32 %v3184_v37, %v3183_v21  ;;  %v3205_v14 = vrot.slane %v3204_v46, 4 }
 0x25b   : >> { %1853 = vbcast.lane.b32.xlu1 %v1847_v56, 264  ;;  %1849 = vbcast.lane.b32.xlu0 %v1847_v56, 256  ;;  %v3225_v56 = vadd.f32 %v5579_v31, %v5578_v35  ;;  %v1869_v53 = vrot.slane %v7016_v50, %v6557_v25  ;;  %v3173_v23 = vadd.f32 %v3172_v49, %v6944_v0  ;;  %v3212_v40 = vrot.slane %v3211_v20, 4 }
 0x25c   : >> { %v3192_v15 = vadd.f32 %v3191_v29, %v3190_v10  ;;  %v3219_v22 = vrot.slane %v3218_v19, 4  ;;  %v3166_v31 = vadd.f32 %v3165_v13, %v3164_v26  ;;  %v3199_v35 = vadd.f32 %v3198_v51, %v3197_v54 }
 0x25d   : >> { %v7019_v18 = vpop.permute.xlu1 %1545  ;;  %v7021_v42 = vpop.permute.xlu0 %1541  ;;  %v3226_v55 = vrot.slane %v3225_v56, 4  ;;  %v1880_v10 = vrot.slane %v7016_v50, %v6555_v24  ;;  %v3180_v0 = vadd.f32 %v3179_v3, %v3178_v48  ;;  %v3186_v21 = vrot.slane %v3185_v27, 2 }
 0x25e   : >> { %v3206_v29 = vadd.f32 %v3205_v14, %v3204_v46  ;;  %v3213_v37 = vadd.f32 %v3212_v40, %v3211_v20  ;;  %v5581_v49 = vsel %vm2415_vm10, 1.0, %v9488_v11  ;;  %v3220_v13 = vadd.f32 %v3219_v22, %v3218_v19 }
 0x25f   : >> { %1864 = vbcast.lane.b32.xlu1 %v1858_v45, 264  ;;  %1860 = vbcast.lane.b32.xlu0 %v1858_v45, 256  ;;  %v3193_v45 = vrot.slane %v3192_v15, 2  ;;  %v3227_v59 = vadd.f32 %v3226_v55, %v3225_v56  ;;  %vm2417_vm9 = vcmp.eq.s32.totalorder %v6697_v61, %v9400_v16  ;;  %vm2416_vm12 = vcmp.eq.s32.totalorder %v6699_v62, %v9400_v16 }
 0x260   : >> { %v3174_v51 = vrot.slane %v3173_v23, 1  ;;  %v3167_v26 = vrot.slane %v3166_v31, 1  ;;  %v3200_v54 = vrot.slane %v3199_v35, 2  ;;  %v1891_v20 = vrot.slane %v7016_v50, %v6567_v30 }
 0x261   : >> { %v7026_v43 = vpop.permute.xlu1 %1556  ;;  %v7028_v52 = vpop.permute.xlu0 %1552  ;;  %v3181_v48 = vrot.slane %v3180_v0, 1  ;;  %v7048_v46 = vadd.f32 %v3186_v21, %v3185_v27  ;;  %v7050_v56 = vadd.f32 %v3193_v45, %v3192_v15  ;;  %v3214_v3 = vrot.slane %v3213_v37, 2 }
 0x262   : >> { %9498 = vst [vmem:[#allocation80_spill] sm:$0xff] %v7026_v43  ;;  %9499 = vst [vmem:[#allocation81_spill] sm:$0xff] %v7028_v52  ;;  %v5580_v52 = vsel %vm2414_vm15, 1.0, %v9488_v11  ;;  %v5583_v61 = vsel %vm2417_vm9, 1.0, %v9488_v11  ;;  %v5582_v62 = vsel %vm2416_vm12, 1.0, %v9488_v11  ;;  %v3221_v22 = vrot.slane %v3220_v13, 2 }
 0x263   : >> { %1875 = vbcast.lane.b32.xlu1 %v1869_v53, 264  ;;  %1871 = vbcast.lane.b32.xlu0 %v1869_v53, 256  ;;  %v3207_v53 = vrot.slane %v3206_v29, 2  ;;  %v3232_v19 = vadd.f32 %v5581_v49, %v5580_v52  ;;  %v3228_v55 = vrot.slane %v3227_v59, 2  ;;  %vm2419_vm0 = vcmp.eq.s32.totalorder %v6702_v1, %v9400_v16 }
 0x264   : >> { %vm2418_vm3 = vcmp.eq.s32.totalorder %v6704_v2, %v9400_v16  ;;  %v7062_v52 = vadd.f32 %v3174_v51, %v3173_v23  ;;  %v7064_v27 = vadd.f32 %v3200_v54, %v3199_v35  ;;  %v1902_v15 = vrot.slane %v7016_v50, %v6570_v32 }
 0x265   : >> { %v7038_v58 = vpop.permute.xlu1 %1567  ;;  %v7040_v43 = vpop.permute.xlu0 %1563  ;;  %v3208_v21 = vadd.f32 %v3207_v53, %v3206_v29  ;;  %v3233_v45 = vrot.slane %v3232_v19, 4  ;;  %v3239_v49 = vadd.f32 %v5583_v61, %v5582_v62  ;;  %v3188_v1 = vrot.slane %v7048_v46, 1 }
 0x266   : >> { %9501 = vst [vmem:[#allocation83_spill] sm:$0xff] %v7062_v52  ;;  %v5585_v2 = vsel %vm2419_vm0, 1.0, %v9488_v11  ;;  %v5584_v23 = vsel %vm2418_vm3, 1.0, %v9488_v11  ;;  %v3195_v54 = vrot.slane %v7050_v56, 1  ;;  %v3202_v29 = vrot.slane %v7064_v27, 1 }
 0x267   : >> { %1886 = vbcast.lane.b32.xlu1 %v1880_v10, 264  ;;  %1882 = vbcast.lane.b32.xlu0 %v1880_v10, 256  ;;  %v7068_v10 = vadd.f32 %v3167_v26, %v3166_v31  ;;  %v3222_v31 = vadd.f32 %v3221_v22, %v3220_v13  ;;  %v3229_v26 = vadd.f32 %v3228_v55, %v3227_v59  ;;  %v3240_v61 = vrot.slane %v3239_v49, 4 }
 0x268   : >> { %vm2421_vm4 = vcmp.eq.s32.totalorder %v6707_v4, %v9400_v16  ;;  %vm2420_vm7 = vcmp.eq.s32.totalorder %v6709_v5, %v9400_v16  ;;  %v3234_v53 = vadd.f32 %v3233_v45, %v3232_v19  ;;  %v3246_v62 = vadd.f32 %v5585_v2, %v5584_v23  ;;  %v917_v45 = vld [vmem:[%s6552_s30 + $0x58] sm:$0xff] }
 0x269   : >> { %v7054_v14 = vpop.permute.xlu1 %1578  ;;  %v7056_v40 = vpop.permute.xlu0 %1574  ;;  %9502 = vst [vmem:[#allocation84_spill] sm:$0xff] %v7068_v10  ;;  %vm2423_vm10 = vcmp.eq.s32.totalorder %v6712_v7, %v9400_v16  ;;  %vm2422_vm15 = vcmp.eq.s32.totalorder %v6714_v8, %v9400_v16  ;;  %vm2425_vm9 = vcmp.eq.s32.totalorder %v6717_v12, %v9400_v16  ;;  %vm2424_vm12 = vcmp.eq.s32.totalorder %v6719_v17, %v9400_v16 }
 0x26a   : >> { %9500 = vst [vmem:[#allocation82_spill] sm:$0xff] %v7056_v40  ;;  %v7070_v40 = vadd.f32 %v3181_v48, %v3180_v0  ;;  %v1913_v0 = vrot.slane %v7016_v50, %v6573_v34  ;;  %v3209_v48 = vrot.slane %v3208_v21, 1  ;;  %v3223_v19 = vrot.slane %v3222_v31, 1 }
 0x26b   : >> { %1897 = vbcast.lane.b32.xlu1 %v1891_v20, 264  ;;  %1893 = vbcast.lane.b32.xlu0 %v1891_v20, 256  ;;  %v3215_v20 = vadd.f32 %v3214_v3, %v3213_v37  ;;  %v5587_v3 = vsel %vm2421_vm4, 1.0, %v9488_v11  ;;  %v5586_v22 = vsel %vm2420_vm7, 1.0, %v9488_v11  ;;  %v3230_v55 = vrot.slane %v3229_v26, 1 }
 0x26c   : >> { %9503 = vst [vmem:[#allocation85_spill] sm:$0xff] %v7070_v40  ;;  %vm2427_vm0 = vcmp.eq.s32.totalorder %v6723_v28, %v9400_v16  ;;  %vm2426_vm3 = vcmp.eq.s32.totalorder %v6725_v33, %v9400_v16  ;;  %v5589_v4 = vsel %vm2423_vm10, 1.0, %v9488_v11  ;;  %v5588_v5 = vsel %vm2422_vm15, 1.0, %v9488_v11 }
 0x26d   : >> { %v7075_v35 = vpop.permute.xlu1 %1589  ;;  %v7077_v51 = vpop.permute.xlu0 %1585  ;;  %v3216_v59 = vrot.slane %v3215_v20, 1  ;;  %v5591_v2 = vsel %vm2425_vm9, 1.0, %v9488_v11  ;;  %v5590_v23 = vsel %vm2424_vm12, 1.0, %v9488_v11  ;;  %v3241_v40 = vadd.f32 %v3240_v61, %v3239_v49 }
 0x26e   : >> { %v3247_v52 = vrot.slane %v3246_v62, 4  ;;  %v3253_v7 = vadd.f32 %v5587_v3, %v5586_v22  ;;  %v5593_v8 = vsel %vm2427_vm0, 1.0, %v9488_v11  ;;  %v5592_v12 = vsel %vm2426_vm3, 1.0, %v9488_v11 }
 0x26f   : >> { %1908 = vbcast.lane.b32.xlu1 %v1902_v15, 264  ;;  %1904 = vbcast.lane.b32.xlu0 %v1902_v15, 256  ;;  %v1924_v15 = vrot.slane %v7016_v50, %v6576_v36  ;;  %vm933_vm4 = vcmp.le.s32.totalorder %v917_v45, 40  ;;  %vm949_vm7 = vcmp.ne.s32.totalorder %v917_v45, 0  ;;  %v3260_v17 = vadd.f32 %v5589_v4, %v5588_v5 }
 0x270   : >> { %v3267_v49 = vadd.f32 %v5591_v2, %v5590_v23  ;;  %v1935_v61 = vrot.slane %v7016_v50, %v6579_v38  ;;  %v7145_v3 = vadd.f32 %v3188_v1, %v7048_v46  ;;  %v7148_v28 = vadd.f32 %v3195_v54, %v7050_v56  ;;  %vm7163_vm10 = vmand %vm933_vm4, %vm949_vm7 }
 0x271   : >> { %v7095_v37 = vpop.permute.xlu1 %1600  ;;  %v7097_v13 = vpop.permute.xlu0 %1596  ;;  %v7151_v22 = vadd.f32 %v3202_v29, %v7064_v27  ;;  %v7153_v33 = vadd.f32 %v3209_v48, %v3208_v21  ;;  %v3242_v5 = vrot.slane %v3241_v40, 2  ;;  %v3274_v2 = vadd.f32 %v5593_v8, %v5592_v12 }
 0x272   : >> { %9504 = vst [vmem:[#allocation86_spill] sm:$0xff] %v7097_v13  ;;  %9506 = vst [vmem:[#allocation88_spill] sm:$0xff] %v7145_v3  ;;  %v9511_v46 = vmov 0  ;;  %v7167_v56 = vadd.f32 %v3223_v19, %v3222_v31  ;;  %v7169_v27 = vadd.f32 %v3230_v55, %v3229_v26  ;;  %v3248_v21 = vadd.f32 %v3247_v52, %v3246_v62 }
 0x273   : >> { %1919 = vbcast.lane.b32.xlu1 %v1913_v0, 264  ;;  %1915 = vbcast.lane.b32.xlu0 %v1913_v0, 256  ;;  %v3235_v0 = vrot.slane %v3234_v53, 2  ;;  %9507 = vst [vmem:[#allocation89_spill] sm:$0xff] %v7148_v28  ;;  %9508 = vst [vmem:[#allocation90_spill] sm:$0xff] %v7151_v22  ;;  %v9512_v46 = vsel %vm7163_vm10, 4294967295, %v9511_v46  ;;  %vm2429_vm15 = vcmp.eq.s32.totalorder %v6728_v44, %v9400_v16 }
 0x274   : >> { %9509 = vst [vmem:[#allocation91_spill] sm:$0xff] %v7153_v33  ;;  %9513 = vst [vmem:[#allocation93_spill] sm:$0xff] %v9512_v46  ;;  %v3254_v1 = vrot.slane %v3253_v7, 4  ;;  %v3261_v54 = vrot.slane %v3260_v17, 4  ;;  %v1946_v29 = vrot.slane %v7016_v50, %v6583_v41  ;;  %vm2428_vm9 = vcmp.eq.s32.totalorder %v6730_v47, %v9400_v16 }
 0x275   : >> { %v7130_v10 = vpop.permute.xlu1 %1611  ;;  %v7132_v13 = vpop.permute.xlu0 %1607  ;;  %v3236_v4 = vadd.f32 %v3235_v0, %v3234_v53  ;;  %9514 = vst [vmem:[#allocation94_spill] sm:$0xff] %v7167_v56  ;;  %9515 = vst [vmem:[#allocation95_spill] sm:$0xff] %v7169_v27  ;;  %vm2431_vm12 = vcmp.eq.s32.totalorder %v6739_v60, %v9400_v16  ;;  %vm2430_vm0 = vcmp.eq.s32.totalorder %v6741_v63, %v9400_v16  ;;  %v7183_v44 = vsel %vm7163_vm10, %v917_v45, 4294967295  ;;  %v9524_v56 = vld [vmem:[#allocation23_spill] sm:$0xff] }
 0x276   : >> { %9505 = vst [vmem:[#allocation87_spill] sm:$0xff] %v7132_v13  ;;  %v7155_v13 = vadd.f32 %v3216_v59, %v3215_v20  ;;  %v3268_v20 = vrot.slane %v3267_v49, 4  ;;  %v7185_v31 = vadd.f32 %v3242_v5, %v3241_v40  ;;  %v3275_v26 = vrot.slane %v3274_v2, 4 }
 0x277   : >> { %1930 = vbcast.lane.b32.xlu1 %v1924_v15, 264  ;;  %1926 = vbcast.lane.b32.xlu0 %v1924_v15, 256  ;;  %v3237_v52 = vrot.slane %v3236_v4, 1  ;;  %v5595_v48 = vsel %vm2429_vm15, 1.0, %v9488_v11  ;;  %vm2433_vm3 = vcmp.eq.s32.totalorder %v6744_v6, %v9400_v16  ;;  %vm2432_vm4 = vcmp.eq.s32.totalorder %v6746_v9, %v9400_v16 }
 0x278   : >> { %9510 = vst [vmem:[#allocation92_spill] sm:$0xff] %v7155_v13  ;;  %vm2435_vm7 = vcmp.eq.s32.totalorder %v6749_v57, %v9400_v16  ;;  %vm2434_vm10 = vcmp.eq.s32.totalorder %v6751_v39, %v9400_v16  ;;  %v5594_v47 = vsel %vm2428_vm9, 1.0, %v9488_v11  ;;  %v5597_v60 = vsel %vm2431_vm12, 1.0, %v9488_v11 }
 0x279   : >> { %v7157_v15 = vpop.permute.xlu1 %1622  ;;  %v7159_v23 = vpop.permute.xlu0 %1618  ;;  %v5596_v63 = vsel %vm2430_vm0, 1.0, %v9488_v11  ;;  %v1957_v6 = vrot.slane %v7183_v44, %v6557_v25  ;;  %v3249_v40 = vrot.slane %v3248_v21, 2  ;;  %v3255_v62 = vadd.f32 %v3254_v1, %v3253_v7 }
 0x27a   : >> { %v3262_v9 = vadd.f32 %v3261_v54, %v3260_v17  ;;  %v3269_v59 = vadd.f32 %v3268_v20, %v3267_v49  ;;  %v5599_v57 = vsel %vm2433_vm3, 1.0, %v9488_v11  ;;  %v5598_v19 = vsel %vm2432_vm4, 1.0, %v9488_v11  ;;  %v9517_v17 = vld [vmem:[#allocation18_spill] sm:$0xff]  ;;  %v9518_v49 = vld [vmem:[#allocation19_spill] sm:$0xff] }
 0x27b   : >> { %1941 = vbcast.lane.b32.xlu1 %v1935_v61, 264  ;;  %1937 = vbcast.lane.b32.xlu0 %v1935_v61, 256  ;;  %v5601_v39 = vsel %vm2435_vm7, 1.0, %v9488_v11  ;;  %v5600_v55 = vsel %vm2434_vm10, 1.0, %v9488_v11  ;;  %v7213_v8 = vadd.f32 %v3237_v52, %v3236_v4  ;;  %v3276_v12 = vadd.f32 %v3275_v26, %v3274_v2  ;;  %v9519_v4 = vld [vmem:[#allocation20_spill] sm:$0xff]  ;;  %v9520_v2 = vld [vmem:[#allocation21_spill] sm:$0xff] }
 0x27c   : >> { %v3281_v61 = vadd.f32 %v5595_v48, %v5594_v47  ;;  %v3288_v5 = vadd.f32 %v5597_v60, %v5596_v63  ;;  %v3244_v7 = vrot.slane %v7185_v31, 1  ;;  %vm2437_vm15 = vcmp.eq.s32.totalorder %v9517_v17, %v9400_v16 }
 0x27d   : >> { %v7188_v50 = vpop.permute.xlu1 %1633  ;;  %v7190_v53 = vpop.permute.xlu0 %1629  ;;  %9516 = vst [vmem:[#allocation96_spill] sm:$0xff] %v7213_v8  ;;  %vm2436_vm9 = vcmp.eq.s32.totalorder %v9518_v49, %v9400_v16  ;;  %v1968_v1 = vrot.slane %v7183_v44, %v6555_v24  ;;  %v3295_v54 = vadd.f32 %v5599_v57, %v5598_v19  ;;  %v3302_v20 = vadd.f32 %v5601_v39, %v5600_v55  ;;  %v9523_v39 = vld [vmem:[#allocation22_spill] sm:$0xff] }
 0x27e   : >> { %vm2439_vm10 = vcmp.eq.s32.totalorder %v9519_v4, %v9400_v16  ;;  %vm2438_vm12 = vcmp.eq.s32.totalorder %v9520_v2, %v9400_v16  ;;  %v3256_v52 = vrot.slane %v3255_v62, 2  ;;  %v3263_v26 = vrot.slane %v3262_v9, 2 }
 0x27f   : >> { %1952 = vbcast.lane.b32.xlu1 %v1946_v29, 264  ;;  %1948 = vbcast.lane.b32.xlu0 %v1946_v29, 256  ;;  %v3250_v29 = vadd.f32 %v3249_v40, %v3248_v21  ;;  %v3270_v48 = vrot.slane %v3269_v59, 2  ;;  %v3277_v63 = vrot.slane %v3276_v12, 2  ;;  %v5603_v57 = vsel %vm2437_vm15, 1.0, %v9488_v11 }
 0x280   : >> { %v5602_v19 = vsel %vm2436_vm9, 1.0, %v9488_v11  ;;  %v5605_v21 = vsel %vm2439_vm10, 1.0, %v9488_v11  ;;  %v5604_v40 = vsel %vm2438_vm12, 1.0, %v9488_v11  ;;  %vm2441_vm0 = vcmp.eq.s32.totalorder %v9523_v39, %v9400_v16 }
 0x281   : >> { %v7209_v45 = vpop.permute.xlu1 %1644  ;;  %v7211_v0 = vpop.permute.xlu0 %1640  ;;  %v1979_v55 = vrot.slane %v7183_v44, %v6567_v30  ;;  %v3289_v4 = vrot.slane %v3288_v5, 4  ;;  %v3296_v17 = vrot.slane %v3295_v54, 4  ;;  %v3303_v2 = vrot.slane %v3302_v20, 4 }
 0x282   : >> { %vm2440_vm3 = vcmp.eq.s32.totalorder %v9524_v56, %v9400_v16  ;;  %v3251_v49 = vrot.slane %v3250_v29, 1  ;;  %v3257_v8 = vadd.f32 %v3256_v52, %v3255_v62  ;;  %v3264_v27 = vadd.f32 %v3263_v26, %v3262_v9  ;;  %v9527_v56 = vld [vmem:[#allocation24_spill] sm:$0xff]  ;;  %v9528_v62 = vld [vmem:[#allocation25_spill] sm:$0xff] }
 0x283   : >> { %1963 = vbcast.lane.b32.xlu1 %v1957_v6, 264  ;;  %1959 = vbcast.lane.b32.xlu0 %v1957_v6, 256  ;;  %v3282_v6 = vrot.slane %v3281_v61, 4  ;;  %v3309_v13 = vadd.f32 %v5603_v57, %v5602_v19  ;;  %v3271_v28 = vadd.f32 %v3270_v48, %v3269_v59  ;;  %v5607_v46 = vsel %vm2441_vm0, 1.0, %v9488_v11 }
 0x284   : >> { %vm2443_vm4 = vcmp.eq.s32.totalorder %v9527_v56, %v9400_v16  ;;  %vm2442_vm7 = vcmp.eq.s32.totalorder %v9528_v62, %v9400_v16  ;;  %v1990_v9 = vrot.slane %v7183_v44, %v6570_v32  ;;  %v3278_v59 = vadd.f32 %v3277_v63, %v3276_v12 }
 0x285   : >> { %v7226_v47 = vpop.permute.xlu1 %1655  ;;  %v7228_v60 = vpop.permute.xlu0 %1651  ;;  %v3283_v3 = vadd.f32 %v3282_v6, %v3281_v61  ;;  %v3290_v61 = vadd.f32 %v3289_v4, %v3288_v5  ;;  %v3297_v52 = vadd.f32 %v3296_v17, %v3295_v54  ;;  %v3304_v26 = vadd.f32 %v3303_v2, %v3302_v20 }
 0x286   : >> { %9521 = vst [vmem:[#allocation18_spill] sm:$0xff] %v7226_v47  ;;  %9522 = vst [vmem:[#allocation19_spill] sm:$0xff] %v7228_v60  ;;  %v5606_v60 = vsel %vm2440_vm3, 1.0, %v9488_v11  ;;  %v7262_v48 = vadd.f32 %v3244_v7, %v7185_v31  ;;  %v3258_v6 = vrot.slane %v3257_v8, 1  ;;  %v3265_v57 = vrot.slane %v3264_v27, 1 }
 0x287   : >> { %1974 = vbcast.lane.b32.xlu1 %v1968_v1, 264  ;;  %1970 = vbcast.lane.b32.xlu0 %v1968_v1, 256  ;;  %v3316_v1 = vadd.f32 %v5605_v21, %v5604_v40  ;;  %v3310_v19 = vrot.slane %v3309_v13, 4  ;;  %v5609_v12 = vsel %vm2443_vm4, 1.0, %v9488_v11  ;;  %v5608_v31 = vsel %vm2442_vm7, 1.0, %v9488_v11 }
 0x288   : >> { %9529 = vst [vmem:[#allocation22_spill] sm:$0xff] %v7262_v48  ;;  %v7276_v5 = vadd.f32 %v3251_v49, %v3250_v29  ;;  %v3272_v7 = vrot.slane %v3271_v28, 1  ;;  %v3284_v54 = vrot.slane %v3283_v3, 2  ;;  %v2001_v20 = vrot.slane %v7183_v44, %v6573_v34  ;;  %v9538_v48 = vld [vmem:[#allocation27_spill] sm:$0xff] }
 0x289   : >> { %v7246_v33 = vpop.permute.xlu1 %1666  ;;  %v7248_v22 = vpop.permute.xlu0 %1662  ;;  %v3317_v39 = vrot.slane %v3316_v1, 4  ;;  %v3298_v63 = vrot.slane %v3297_v52, 2  ;;  %v7280_v4 = vadd.f32 %v3258_v6, %v3257_v8  ;;  %v7282_v17 = vadd.f32 %v3265_v57, %v3264_v27  ;;  %v918_v27 = vld [vmem:[%s6552_s30 + $0x60] sm:$0xff] }
 0x28a   : >> { %9525 = vst [vmem:[#allocation20_spill] sm:$0xff] %v7246_v33  ;;  %9526 = vst [vmem:[#allocation21_spill] sm:$0xff] %v7248_v22  ;;  %v3323_v22 = vadd.f32 %v5607_v46, %v5606_v60  ;;  %v3279_v46 = vrot.slane %v3278_v59, 1  ;;  %v3291_v60 = vrot.slane %v3290_v61, 2  ;;  %v3311_v2 = vadd.f32 %v3310_v19, %v3309_v13 }
 0x28b   : >> { %1985 = vbcast.lane.b32.xlu1 %v1979_v55, 264  ;;  %1981 = vbcast.lane.b32.xlu0 %v1979_v55, 256  ;;  %9532 = vst [vmem:[#allocation25_spill] sm:$0xff] %v7276_v5  ;;  %v3305_v55 = vrot.slane %v3304_v26, 2  ;;  %9533 = vst [vmem:[#allocation97_spill] sm:$0xff] %v7280_v4  ;;  %v3330_v56 = vadd.f32 %v5609_v12, %v5608_v31  ;;  %v3318_v62 = vadd.f32 %v3317_v39, %v3316_v1  ;;  %v9537_v5 = vld [vmem:[#allocation26_spill] sm:$0xff] }
 0x28c   : >> { %9534 = vst [vmem:[#allocation98_spill] sm:$0xff] %v7282_v17  ;;  %vm2445_vm15 = vcmp.eq.s32.totalorder %v9537_v5, %v9400_v16  ;;  %vm2444_vm9 = vcmp.eq.s32.totalorder %v9538_v48, %v9400_v16  ;;  %v3285_v8 = vadd.f32 %v3284_v54, %v3283_v3  ;;  %v2012_v13 = vrot.slane %v7183_v44, %v6576_v36 }
 0x28d   : >> { %v7264_v21 = vpop.permute.xlu1 %1677  ;;  %v7266_v40 = vpop.permute.xlu0 %1673  ;;  %v7297_v6 = vadd.f32 %v3279_v46, %v3278_v59  ;;  %v3292_v57 = vadd.f32 %v3291_v60, %v3290_v61  ;;  %v3299_v1 = vadd.f32 %v3298_v63, %v3297_v52  ;;  %v3306_v19 = vadd.f32 %v3305_v55, %v3304_v26  ;;  %v9543_v59 = vld [vmem:[#allocation29_spill] sm:$0xff]  ;;  %v9544_v61 = vld [vmem:[#allocation30_spill] sm:$0xff] }
 0x28e   : >> { %9530 = vst [vmem:[#allocation23_spill] sm:$0xff] %v7264_v21  ;;  %9531 = vst [vmem:[#allocation24_spill] sm:$0xff] %v7266_v40  ;;  %v7292_v40 = vadd.f32 %v3272_v7, %v3271_v28  ;;  %v3312_v39 = vrot.slane %v3311_v2, 2  ;;  %v3331_v12 = vrot.slane %v3330_v56, 4  ;;  %v5611_v31 = vsel %vm2445_vm15, 1.0, %v9488_v11 }
 0x28f   : >> { %1996 = vbcast.lane.b32.xlu1 %v1990_v9, 264  ;;  %1992 = vbcast.lane.b32.xlu0 %v1990_v9, 256  ;;  %v3324_v9 = vrot.slane %v3323_v22, 4  ;;  %9540 = vst [vmem:[#allocation27_spill] sm:$0xff] %v7297_v6  ;;  %v5610_v48 = vsel %vm2444_vm9, 1.0, %v9488_v11  ;;  %v3319_v5 = vrot.slane %v3318_v62, 2  ;;  %vm2447_vm0 = vcmp.eq.s32.totalorder %v9543_v59, %v9400_v16 }
 0x290   : >> { %9539 = vst [vmem:[#allocation26_spill] sm:$0xff] %v7292_v40  ;;  %vm934_vm10 = vcmp.le.s32.totalorder %v918_v27, 40  ;;  %vm950_vm12 = vcmp.ne.s32.totalorder %v918_v27, 0  ;;  %vm2446_vm3 = vcmp.eq.s32.totalorder %v9544_v61, %v9400_v16  ;;  %v2023_v52 = vrot.slane %v7183_v44, %v6579_v38 }
 0x291   : >> { %v7284_v29 = vpop.permute.xlu1 %1688  ;;  %v7286_v49 = vpop.permute.xlu0 %1684  ;;  %v3325_v7 = vadd.f32 %v3324_v9, %v3323_v22  ;;  %v3286_v26 = vrot.slane %v3285_v8, 1  ;;  %v3337_v54 = vadd.f32 %v5611_v31, %v5610_v48  ;;  %v9546_v22 = vld [vmem:[#allocation32_spill] sm:$0xff]  ;;  %v3293_v46 = vrot.slane %v3292_v57, 1  ;;  %vm7321_vm15 = vmand %vm934_vm10, %vm950_vm12 }
 0x292   : >> { %9535 = vst [vmem:[#allocation99_spill] sm:$0xff] %v7284_v29  ;;  %9536 = vst [vmem:[#allocation100_spill] sm:$0xff] %v7286_v49  ;;  %vm2448_vm7 = vcmp.eq.s32.totalorder %v9546_v22, %v9400_v16  ;;  %v3300_v60 = vrot.slane %v3299_v1, 1  ;;  %v3307_v63 = vrot.slane %v3306_v19, 1  ;;  %v3332_v55 = vadd.f32 %v3331_v12, %v3330_v56 }
 0x293   : >> { %2007 = vbcast.lane.b32.xlu1 %v2001_v20, 264  ;;  %2003 = vbcast.lane.b32.xlu0 %v2001_v20, 256  ;;  %v9545_v20 = vld [vmem:[#allocation31_spill] sm:$0xff]  ;;  %v3313_v31 = vadd.f32 %v3312_v39, %v3311_v2  ;;  %v3320_v48 = vadd.f32 %v3319_v5, %v3318_v62  ;;  %v5612_v56 = vsel %vm2446_vm3, 1.0, %v9488_v11  ;;  %v3326_v12 = vrot.slane %v3325_v7, 2  ;;  %v9552_v39 = vld [vmem:[#allocation33_spill] sm:$0xff] }
 0x294   : >> { %vm2449_vm4 = vcmp.eq.s32.totalorder %v9545_v20, %v9400_v16  ;;  %v5613_v20 = vsel %vm2447_vm0, 1.0, %v9488_v11  ;;  %v5614_v17 = vsel %vm2448_vm7, 1.0, %v9488_v11  ;;  %v2034_v2 = vrot.slane %v7183_v44, %v6583_v41  ;;  %v9553_v5 = vld [vmem:[#allocation34_spill] sm:$0xff] }
 0x295   : >> { %v7301_v28 = vpop.permute.xlu1 %1699  ;;  %v7303_v3 = vpop.permute.xlu0 %1695  ;;  %v5615_v22 = vsel %vm2449_vm4, 1.0, %v9488_v11  ;;  %v3338_v62 = vrot.slane %v3337_v54, 4  ;;  %vm2451_vm9 = vcmp.eq.s32.totalorder %v9552_v39, %v9400_v16  ;;  %vm2450_vm10 = vcmp.eq.s32.totalorder %v9553_v5, %v9400_v16  ;;  %v9560_v5 = vld [vmem:[#allocation36_spill] sm:$0xff] }
 0x296   : >> { %9541 = vst [vmem:[#allocation101_spill] sm:$0xff] %v7301_v28  ;;  %9542 = vst [vmem:[#allocation102_spill] sm:$0xff] %v7303_v3  ;;  %v7343_v59 = vsel %vm7321_vm15, %v918_v27, 4294967295  ;;  %v7345_v61 = vadd.f32 %v3286_v26, %v3285_v8  ;;  %v7347_v4 = vadd.f32 %v3293_v46, %v3292_v57  ;;  %v3333_v6 = vrot.slane %v3332_v55, 2  ;;  %v9559_v3 = vld [vmem:[#allocation35_spill] sm:$0xff] }
 0x297   : >> { %2018 = vbcast.lane.b32.xlu1 %v2012_v13, 264  ;;  %2014 = vbcast.lane.b32.xlu0 %v2012_v13, 256  ;;  %v9549_v13 = vmov 0  ;;  %v3351_v39 = vadd.f32 %v5615_v22, %v5614_v17  ;;  %vm2453_vm12 = vcmp.eq.s32.totalorder %v9559_v3, %v9400_v16  ;;  %vm2452_vm0 = vcmp.eq.s32.totalorder %v9560_v5, %v9400_v16 }
 0x298   : >> { %v9550_v13 = vsel %vm7321_vm15, 4294967295, %v9549_v13  ;;  %9554 = vst [vmem:[#allocation32_spill] sm:$0xff] %v7345_v61  ;;  %9555 = vst [vmem:[#allocation33_spill] sm:$0xff] %v7347_v4  ;;  %v7359_v27 = vadd.f32 %v3307_v63, %v3306_v19  ;;  %v5617_v8 = vsel %vm2451_vm9, 1.0, %v9488_v11  ;;  %v5616_v57 = vsel %vm2450_vm10, 1.0, %v9488_v11 }
 0x299   : >> { %v7315_v9 = vpop.permute.xlu1 %1710  ;;  %v7317_v40 = vpop.permute.xlu0 %1706  ;;  %9551 = vst [vmem:[#allocation31_spill] sm:$0xff] %v9550_v13  ;;  %v2045_v26 = vrot.slane %v7343_v59, %v6557_v25  ;;  %v3321_v46 = vrot.slane %v3320_v48, 1  ;;  %v3327_v17 = vadd.f32 %v3326_v12, %v3325_v7  ;;  %v5618_v19 = vsel %vm2452_vm0, 1.0, %v9488_v11  ;;  %v9566_v7 = vld [vmem:[#allocation39_spill] sm:$0xff] }
 0x29a   : >> { %9547 = vst [vmem:[#allocation29_spill] sm:$0xff] %v7315_v9  ;;  %9548 = vst [vmem:[#allocation30_spill] sm:$0xff] %v7317_v40  ;;  %v7353_v9 = vadd.f32 %v3300_v60, %v3299_v1  ;;  %v3314_v1 = vrot.slane %v3313_v31, 1  ;;  %v3339_v60 = vadd.f32 %v3338_v62, %v3337_v54  ;;  %v3352_v5 = vrot.slane %v3351_v39, 4 }
 0x29b   : >> { %2029 = vbcast.lane.b32.xlu1 %v2023_v52, 264  ;;  %2025 = vbcast.lane.b32.xlu0 %v2023_v52, 256  ;;  %v3344_v52 = vadd.f32 %v5613_v20, %v5612_v56  ;;  %9561 = vst [vmem:[#allocation35_spill] sm:$0xff] %v7359_v27  ;;  %v3334_v20 = vadd.f32 %v3333_v6, %v3332_v55  ;;  %v5619_v56 = vsel %vm2453_vm12, 1.0, %v9488_v11  ;;  %v9567_v6 = vld [vmem:[#allocation40_spill] sm:$0xff]  ;;  %v3328_v62 = vrot.slane %v3327_v17, 1 }
 0x29c   : >> { %9558 = vst [vmem:[#allocation104_spill] sm:$0xff] %v7353_v9  ;;  %v3358_v27 = vadd.f32 %v5617_v8, %v5616_v57  ;;  %v9565_v9 = vld [vmem:[#allocation38_spill] sm:$0xff]  ;;  %vm2457_vm7 = vcmp.eq.s32.totalorder %v9566_v7, %v9400_v16  ;;  %vm2456_vm9 = vcmp.eq.s32.totalorder %v9567_v6, %v9400_v16  ;;  %v2056_v54 = vrot.slane %v7343_v59, %v6555_v24 }
 0x29d   : >> { %v7349_v40 = vpop.permute.xlu1 %1721  ;;  %v7351_v44 = vpop.permute.xlu0 %1717  ;;  %v3345_v3 = vrot.slane %v3344_v52, 4  ;;  %vm2454_vm4 = vcmp.eq.s32.totalorder %v9565_v9, %v9400_v16  ;;  %v7381_v55 = vadd.f32 %v3314_v1, %v3313_v31  ;;  %v7383_v12 = vadd.f32 %v3321_v46, %v3320_v48  ;;  %v9572_v1 = vld [vmem:[#allocation41_spill] sm:$0xff]  ;;  %v9573_v46 = vld [vmem:[#allocation42_spill] sm:$0xff] }
 0x29e   : >> { %9556 = vst [vmem:[#allocation34_spill] sm:$0xff] %v7349_v40  ;;  %9557 = vst [vmem:[#allocation103_spill] sm:$0xff] %v7351_v44  ;;  %v3365_v8 = vadd.f32 %v5619_v56, %v5618_v19  ;;  %v3340_v57 = vrot.slane %v3339_v60, 2  ;;  %v5620_v4 = vsel %vm2454_vm4, 1.0, %v9488_v11  ;;  %v5623_v31 = vsel %vm2457_vm7, 1.0, %v9488_v11  ;;  %v9574_v19 = vld [vmem:[#allocation43_spill] sm:$0xff] }
 0x29f   : >> { %2040 = vbcast.lane.b32.xlu1 %v2034_v2, 264  ;;  %2036 = vbcast.lane.b32.xlu0 %v2034_v2, 256  ;;  %v9564_v2 = vld [vmem:[#allocation37_spill] sm:$0xff]  ;;  %9569 = vst [vmem:[#allocation38_spill] sm:$0xff] %v7383_v12  ;;  %v5622_v48 = vsel %vm2456_vm9, 1.0, %v9488_v11  ;;  %vm2459_vm10 = vcmp.eq.s32.totalorder %v9572_v1, %v9400_v16  ;;  %vm2458_vm12 = vcmp.eq.s32.totalorder %v9573_v46, %v9400_v16 }
 0x2a0   : >> { %vm2455_vm3 = vcmp.eq.s32.totalorder %v9564_v2, %v9400_v16  ;;  %9568 = vst [vmem:[#allocation37_spill] sm:$0xff] %v7381_v55  ;;  %v3346_v2 = vadd.f32 %v3345_v3, %v3344_v52  ;;  %v3359_v52 = vrot.slane %v3358_v27, 4  ;;  %v3366_v3 = vrot.slane %v3365_v8, 4 }
 0x2a1   : >> { %v7367_v63 = vpop.permute.xlu1 %1732  ;;  %v7369_v22 = vpop.permute.xlu0 %1728  ;;  %v5621_v9 = vsel %vm2455_vm3, 1.0, %v9488_v11  ;;  %vm2461_vm0 = vcmp.eq.s32.totalorder %v9574_v19, %v9400_v16  ;;  %v7409_v7 = vadd.f32 %v3328_v62, %v3327_v17  ;;  %v7411_v6 = vadd.f32 %v3340_v57, %v3339_v60  ;;  %v9580_v19 = vld [vmem:[#allocation47_spill] sm:$0xff] }
 0x2a2   : >> { %9562 = vst [vmem:[#allocation36_spill] sm:$0xff] %v7367_v63  ;;  %9563 = vst [vmem:[#allocation105_spill] sm:$0xff] %v7369_v22  ;;  %v3353_v63 = vadd.f32 %v3352_v5, %v3351_v39  ;;  %v2067_v39 = vrot.slane %v7343_v59, %v6567_v30  ;;  %v3372_v56 = vadd.f32 %v5621_v9, %v5620_v4  ;;  %v9575_v5 = vld [vmem:[#allocation44_spill] sm:$0xff]  ;;  %v3347_v1 = vrot.slane %v3346_v2, 2  ;;  %v9579_v9 = vld [vmem:[#allocation46_spill] sm:$0xff] }
 0x2a3   : >> { %2051 = vbcast.lane.b32.xlu1 %v2045_v26, 264  ;;  %2047 = vbcast.lane.b32.xlu0 %v2045_v26, 256  ;;  %v3335_v26 = vrot.slane %v3334_v20, 1  ;;  %vm2460_vm3 = vcmp.eq.s32.totalorder %v9575_v5, %v9400_v16  ;;  %9576 = vst [vmem:[#allocation41_spill] sm:$0xff] %v7409_v7  ;;  %v3379_v12 = vadd.f32 %v5623_v31, %v5622_v48  ;;  %v5625_v55 = vsel %vm2459_vm10, 1.0, %v9488_v11 }
 0x2a4   : >> { %v5624_v4 = vsel %vm2458_vm12, 1.0, %v9488_v11  ;;  %vm2463_vm4 = vcmp.eq.s32.totalorder %v9579_v9, %v9400_v16  ;;  %vm2462_vm7 = vcmp.eq.s32.totalorder %v9580_v19, %v9400_v16  ;;  %v5627_v60 = vsel %vm2461_vm0, 1.0, %v9488_v11 }
 0x2a5   : >> { %v7387_v61 = vpop.permute.xlu1 %1743  ;;  %v7389_v22 = vpop.permute.xlu0 %1739  ;;  %v7423_v17 = vadd.f32 %v3335_v26, %v3334_v20  ;;  %v5626_v62 = vsel %vm2460_vm3, 1.0, %v9488_v11  ;;  %v2078_v57 = vrot.slane %v7343_v59, %v6570_v32  ;;  %v3354_v31 = vrot.slane %v3353_v63, 2 }
 0x2a6   : >> { %9570 = vst [vmem:[#allocation39_spill] sm:$0xff] %v7387_v61  ;;  %9571 = vst [vmem:[#allocation40_spill] sm:$0xff] %v7389_v22  ;;  %v3360_v48 = vadd.f32 %v3359_v52, %v3358_v27  ;;  %v7429_v5 = vadd.f32 %v3366_v3, %v3365_v8  ;;  %v3373_v7 = vrot.slane %v3372_v56, 4  ;;  %v3380_v9 = vrot.slane %v3379_v12, 4  ;;  %v9584_v22 = vld [vmem:[#allocation48_spill] sm:$0xff]  ;;  %v9585_v27 = vld [vmem:[#allocation49_spill] sm:$0xff] }
 0x2a7   : >> { %2062 = vbcast.lane.b32.xlu1 %v2056_v54, 264  ;;  %2058 = vbcast.lane.b32.xlu0 %v2056_v54, 256  ;;  %9581 = vst [vmem:[#allocation44_spill] sm:$0xff] %v7423_v17  ;;  %v5629_v19 = vsel %vm2463_vm4, 1.0, %v9488_v11  ;;  %v5628_v20 = vsel %vm2462_vm7, 1.0, %v9488_v11  ;;  %vm2465_vm9 = vcmp.eq.s32.totalorder %v9584_v22, %v9400_v16  ;;  %vm2464_vm10 = vcmp.eq.s32.totalorder %v9585_v27, %v9400_v16  ;;  %v9587_v52 = vld [vmem:[#allocation51_spill] sm:$0xff] }
 0x2a8   : >> { %v3342_v8 = vrot.slane %v7411_v6, 1  ;;  %vm2466_vm0 = vcmp.eq.s32.totalorder %v9587_v52, %v9400_v16  ;;  %v7450_v3 = vadd.f32 %v3354_v31, %v3353_v63  ;;  %v3368_v22 = vrot.slane %v7429_v5, 2  ;;  %v9591_v31 = vld [vmem:[#allocation53_spill] sm:$0xff]  ;;  %v9594_v52 = vld [vmem:[#allocation56_spill] sm:$0xff] }
 0x2a9   : >> { %v7413_v46 = vpop.permute.xlu1 %1754  ;;  %v7415_v54 = vpop.permute.xlu0 %1750  ;;  %v5630_v63 = vsel %vm2464_vm10, 1.0, %v9488_v11  ;;  %vm2468_vm4 = vcmp.eq.s32.totalorder %v9591_v31, %v9400_v16  ;;  %vm2473_vm10 = vcmp.eq.s32.totalorder %v9594_v52, %v9400_v16 }
 0x2aa   : >> { %9577 = vst [vmem:[#allocation42_spill] sm:$0xff] %v7413_v46  ;;  %9578 = vst [vmem:[#allocation43_spill] sm:$0xff] %v7415_v54  ;;  %v3386_v54 = vadd.f32 %v5625_v55, %v5624_v4  ;;  %v7437_v46 = vadd.f32 %v3347_v1, %v3346_v2  ;;  %v9586_v55 = vld [vmem:[#allocation50_spill] sm:$0xff]  ;;  %v2089_v2 = vrot.slane %v7343_v59, %v6573_v34  ;;  %v3361_v1 = vrot.slane %v3360_v48, 2 }
 0x2ab   : >> { %2073 = vbcast.lane.b32.xlu1 %v2067_v39, 264  ;;  %2069 = vbcast.lane.b32.xlu0 %v2067_v39, 256  ;;  %v3393_v39 = vadd.f32 %v5627_v60, %v5626_v62  ;;  %vm2467_vm12 = vcmp.eq.s32.totalorder %v9586_v55, %v9400_v16  ;;  %v3400_v4 = vadd.f32 %v5629_v19, %v5628_v20  ;;  %v919_v20 = vld [vmem:[%s6552_s30 + $0x68] sm:$0xff]  ;;  %v9593_v55 = vld [vmem:[#allocation55_spill] sm:$0xff] }
 0x2ac   : >> { %v3374_v60 = vadd.f32 %v3373_v7, %v3372_v56  ;;  %v3381_v62 = vadd.f32 %v3380_v9, %v3379_v12  ;;  %v5632_v12 = vsel %vm2466_vm0, 1.0, %v9488_v11  ;;  %v9590_v56 = vld [vmem:[#allocation52_spill] sm:$0xff]  ;;  %v9592_v9 = vld [vmem:[#allocation54_spill] sm:$0xff]  ;;  %v2100_v19 = vrot.slane %v7343_v59, %v6576_v36 }
 0x2ad   : >> { %v7433_v26 = vpop.permute.xlu1 %1765  ;;  %v7435_v17 = vpop.permute.xlu0 %1761  ;;  %vm2469_vm3 = vcmp.eq.s32.totalorder %v9590_v56, %v9400_v16  ;;  %v3394_v7 = vrot.slane %v3393_v39, 4  ;;  %vm2471_vm7 = vcmp.eq.s32.totalorder %v9592_v9, %v9400_v16  ;;  %v3401_v27 = vrot.slane %v3400_v4, 4  ;;  %v9595_v56 = vld [vmem:[#allocation57_spill] sm:$0xff] }
 0x2ae   : >> { %9582 = vst [vmem:[#allocation46_spill] sm:$0xff] %v7433_v26  ;;  %9583 = vst [vmem:[#allocation47_spill] sm:$0xff] %v7435_v17  ;;  %v3387_v17 = vrot.slane %v3386_v54, 4  ;;  %v5631_v26 = vsel %vm2465_vm9, 1.0, %v9488_v11  ;;  %vm2470_vm9 = vcmp.eq.s32.totalorder %v9593_v55, %v9400_v16  ;;  %v5635_v28 = vsel %vm2469_vm3, 1.0, %v9488_v11 }
 0x2af   : >> { %2084 = vbcast.lane.b32.xlu1 %v2078_v57, 264  ;;  %2080 = vbcast.lane.b32.xlu0 %v2078_v57, 256  ;;  %v5633_v57 = vsel %vm2467_vm12, 1.0, %v9488_v11  ;;  %vm2472_vm12 = vcmp.eq.s32.totalorder %v9595_v56, %v9400_v16  ;;  %v5634_v55 = vsel %vm2468_vm4, 1.0, %v9488_v11  ;;  %v5637_v52 = vsel %vm2471_vm7, 1.0, %v9488_v11 }
 0x2b0   : >> { %v3414_v40 = vadd.f32 %v5633_v57, %v5632_v12  ;;  %vm935_vm0 = vcmp.le.s32.totalorder %v919_v20, 40  ;;  %vm951_vm15 = vcmp.ne.s32.totalorder %v919_v20, 0  ;;  %v7504_v57 = vadd.f32 %v3342_v8, %v7411_v6 }
 0x2b1   : >> { %v7454_v61 = vpop.permute.xlu1 %1776  ;;  %v7456_v44 = vpop.permute.xlu0 %1772  ;;  %v3362_v12 = vadd.f32 %v3361_v1, %v3360_v48  ;;  %v3395_v31 = vadd.f32 %v3394_v7, %v3393_v39  ;;  %v3402_v9 = vadd.f32 %v3401_v27, %v3400_v4  ;;  %v3349_v56 = vrot.slane %v7437_v46, 1  ;;  %vm7514_vm3 = vmand %vm935_vm0, %vm951_vm15 }
 0x2b2   : >> { %9588 = vst [vmem:[#allocation48_spill] sm:$0xff] %v7454_v61  ;;  %9589 = vst [vmem:[#allocation49_spill] sm:$0xff] %v7456_v44  ;;  %v3388_v44 = vadd.f32 %v3387_v17, %v3386_v54  ;;  %v3407_v61 = vadd.f32 %v5631_v26, %v5630_v63  ;;  %v5636_v54 = vsel %vm2470_vm9, 1.0, %v9488_v11  ;;  %v5639_v17 = vsel %vm2473_vm10, 1.0, %v9488_v11 }
 0x2b3   : >> { %2095 = vbcast.lane.b32.xlu1 %v2089_v2, 264  ;;  %2091 = vbcast.lane.b32.xlu0 %v2089_v2, 256  ;;  %v5638_v26 = vsel %vm2472_vm12, 1.0, %v9488_v11  ;;  %v2111_v63 = vrot.slane %v7343_v59, %v6579_v38  ;;  %9598 = vst [vmem:[#allocation52_spill] sm:$0xff] %v7504_v57  ;;  %v3382_v49 = vrot.slane %v3381_v62, 2  ;;  %v3421_v48 = vadd.f32 %v5635_v28, %v5634_v55  ;;  %v9604_v55 = vld [vmem:[#allocation58_spill] sm:$0xff] }
 0x2b4   : >> { %v3408_v6 = vrot.slane %v3407_v61, 4  ;;  %v3428_v39 = vadd.f32 %v5637_v52, %v5636_v54  ;;  %v3435_v8 = vadd.f32 %v5639_v17, %v5638_v26  ;;  %v3369_v1 = vadd.f32 %v3368_v22, %v7429_v5  ;;  %v9605_v5 = vld [vmem:[#allocation59_spill] sm:$0xff] }
 0x2b5   : >> { %v7486_v2 = vpop.permute.xlu1 %1787  ;;  %v7488_v13 = vpop.permute.xlu0 %1783  ;;  %v3389_v4 = vrot.slane %v3388_v44, 2  ;;  %v3415_v7 = vrot.slane %v3414_v40, 4  ;;  %v2122_v27 = vrot.slane %v7343_v59, %v6583_v41  ;;  %v3363_v57 = vrot.slane %v3362_v12, 1 }
 0x2b6   : >> { %9596 = vst [vmem:[#allocation50_spill] sm:$0xff] %v7486_v2  ;;  %9597 = vst [vmem:[#allocation51_spill] sm:$0xff] %v7488_v13  ;;  %v3356_v13 = vrot.slane %v7450_v3, 1  ;;  %v3375_v2 = vrot.slane %v3374_v60, 2  ;;  %v7523_v33 = vsel %vm7514_vm3, %v919_v20, 4294967295  ;;  %v3383_v28 = vadd.f32 %v3382_v49, %v3381_v62 }
 0x2b7   : >> { %2106 = vbcast.lane.b32.xlu1 %v2100_v19, 264  ;;  %2102 = vbcast.lane.b32.xlu0 %v2100_v19, 256  ;;  %v9601_v19 = vmov 0  ;;  %vm2475_vm15 = vcmp.eq.s32.totalorder %v9604_v55, %v9400_v16  ;;  %vm2474_vm4 = vcmp.eq.s32.totalorder %v9605_v5, %v9400_v16  ;;  %v3409_v59 = vadd.f32 %v3408_v6, %v3407_v61 }
 0x2b8   : >> { %v9602_v19 = vsel %vm7514_vm3, 4294967295, %v9601_v19  ;;  %v3376_v47 = vadd.f32 %v3375_v2, %v3374_v60  ;;  %v3422_v54 = vrot.slane %v3421_v48, 4  ;;  %v3429_v17 = vrot.slane %v3428_v39, 4 }
 0x2b9   : >> { %v7508_v29 = vpop.permute.xlu1 %1798  ;;  %v7510_v21 = vpop.permute.xlu0 %1794  ;;  %9603 = vst [vmem:[#allocation55_spill] sm:$0xff] %v9602_v19  ;;  %v3436_v26 = vrot.slane %v3435_v8, 4  ;;  %v3390_v19 = vadd.f32 %v3389_v4, %v3388_v44  ;;  %v3416_v20 = vadd.f32 %v3415_v7, %v3414_v40  ;;  %v2133_v49 = vrot.slane %v7523_v33, %v6557_v25 }
 0x2ba   : >> { %9599 = vst [vmem:[#allocation53_spill] sm:$0xff] %v7508_v29  ;;  %9600 = vst [vmem:[#allocation54_spill] sm:$0xff] %v7510_v21  ;;  %v3396_v21 = vrot.slane %v3395_v31, 2  ;;  %v3403_v29 = vrot.slane %v3402_v9, 2  ;;  %v5641_v2 = vsel %vm2475_vm15, 1.0, %v9488_v11  ;;  %v5640_v61 = vsel %vm2474_vm4, 1.0, %v9488_v11 }
 0x2bb   : >> { %2117 = vbcast.lane.b32.xlu1 %v2111_v63, 264  ;;  %2113 = vbcast.lane.b32.xlu0 %v2111_v63, 256  ;;  %v3370_v63 = vrot.slane %v3369_v1, 1  ;;  %v7544_v44 = vadd.f32 %v3349_v56, %v7437_v46  ;;  %v7547_v40 = vadd.f32 %v3356_v13, %v7450_v3  ;;  %v3377_v6 = vrot.slane %v3376_v47, 1 }
 0x2bc   : >> { %v3397_v60 = vadd.f32 %v3396_v21, %v3395_v31  ;;  %v3404_v62 = vadd.f32 %v3403_v29, %v3402_v9  ;;  %v3384_v4 = vrot.slane %v3383_v28, 1  ;;  %v3410_v31 = vrot.slane %v3409_v59, 2 }
 0x2bd   : >> { %v7529_v22 = vpop.permute.xlu1 %1809  ;;  %v7531_v52 = vpop.permute.xlu0 %1805  ;;  %9607 = vst [vmem:[#allocation57_spill] sm:$0xff] %v7544_v44  ;;  %9608 = vst [vmem:[#allocation58_spill] sm:$0xff] %v7547_v40  ;;  %v3423_v9 = vadd.f32 %v3422_v54, %v3421_v48  ;;  %v3430_v7 = vadd.f32 %v3429_v17, %v3428_v39  ;;  %v3391_v55 = vrot.slane %v3390_v19, 1  ;;  %v3442_v5 = vadd.f32 %v5641_v2, %v5640_v61  ;;  %v9614_v48 = vld [vmem:[#allocation60_spill] sm:$0xff]  ;;  %v9615_v39 = vld [vmem:[#allocation61_spill] sm:$0xff] }
 0x2be   : >> { %9606 = vst [vmem:[#allocation56_spill] sm:$0xff] %v7531_v52  ;;  %v3417_v52 = vrot.slane %v3416_v20, 2  ;;  %v2144_v46 = vrot.slane %v7523_v33, %v6555_v24  ;;  %v7555_v13 = vadd.f32 %v3363_v57, %v3362_v12  ;;  %v7557_v3 = vadd.f32 %v3370_v63, %v3369_v1 }
 0x2bf   : >> { %2128 = vbcast.lane.b32.xlu1 %v2122_v27, 264  ;;  %2124 = vbcast.lane.b32.xlu0 %v2122_v27, 256  ;;  %v3437_v27 = vadd.f32 %v3436_v26, %v3435_v8  ;;  %v3398_v56 = vrot.slane %v3397_v60, 1  ;;  %v3405_v40 = vrot.slane %v3404_v62, 1  ;;  %v7559_v44 = vadd.f32 %v3377_v6, %v3376_v47 }
 0x2c0   : >> { %9610 = vst [vmem:[#allocation106_spill] sm:$0xff] %v7555_v13  ;;  %9611 = vst [vmem:[#allocation107_spill] sm:$0xff] %v7557_v3  ;;  %vm2477_vm7 = vcmp.eq.s32.totalorder %v9614_v48, %v9400_v16  ;;  %vm2476_vm9 = vcmp.eq.s32.totalorder %v9615_v39, %v9400_v16  ;;  %v3411_v57 = vadd.f32 %v3410_v31, %v3409_v59  ;;  %v3424_v12 = vrot.slane %v3423_v9, 2 }
 0x2c1   : >> { %v7549_v21 = vpop.permute.xlu1 %1820  ;;  %v7551_v29 = vpop.permute.xlu0 %1816  ;;  %9612 = vst [vmem:[#allocation108_spill] sm:$0xff] %v7559_v44  ;;  %v3431_v1 = vrot.slane %v3430_v7, 2  ;;  %v3438_v17 = vrot.slane %v3437_v27, 2  ;;  %v7571_v26 = vadd.f32 %v3391_v55, %v3390_v19  ;;  %v3418_v47 = vadd.f32 %v3417_v52, %v3416_v20  ;;  %v9619_v52 = vld [vmem:[#allocation63_spill] sm:$0xff]  ;;  %v9620_v20 = vld [vmem:[#allocation64_spill] sm:$0xff] }
 0x2c2   : >> { %9609 = vst [vmem:[#allocation59_spill] sm:$0xff] %v7551_v29  ;;  %v7561_v29 = vadd.f32 %v3384_v4, %v3383_v28  ;;  %v3443_v63 = vrot.slane %v3442_v5, 4  ;;  %v2155_v28 = vrot.slane %v7523_v33, %v6567_v30  ;;  %v7577_v2 = vadd.f32 %v3405_v40, %v3404_v62  ;;  %v9622_v62 = vld [vmem:[#allocation66_spill] sm:$0xff] }
 0x2c3   : >> { %2139 = vbcast.lane.b32.xlu1 %v2133_v49, 264  ;;  %2135 = vbcast.lane.b32.xlu0 %v2133_v49, 256  ;;  %9616 = vst [vmem:[#allocation60_spill] sm:$0xff] %v7571_v26  ;;  %v7575_v49 = vadd.f32 %v3398_v56, %v3397_v60  ;;  %v5643_v59 = vsel %vm2477_vm7, 1.0, %v9488_v11  ;;  %v5642_v19 = vsel %vm2476_vm9, 1.0, %v9488_v11  ;;  %vm2479_vm10 = vcmp.eq.s32.totalorder %v9619_v52, %v9400_v16  ;;  %v9621_v60 = vld [vmem:[#allocation65_spill] sm:$0xff] }
 0x2c4   : >> { %9613 = vst [vmem:[#allocation109_spill] sm:$0xff] %v7561_v29  ;;  %9618 = vst [vmem:[#allocation110_spill] sm:$0xff] %v7577_v2  ;;  %vm2478_vm12 = vcmp.eq.s32.totalorder %v9620_v20, %v9400_v16  ;;  %vm2481_vm0 = vcmp.eq.s32.totalorder %v9621_v60, %v9400_v16  ;;  %vm2480_vm15 = vcmp.eq.s32.totalorder %v9622_v62, %v9400_v16  ;;  %v3412_v6 = vrot.slane %v3411_v57, 1  ;;  %v9631_v52 = vld [vmem:[#allocation73_spill] sm:$0xff]  ;;  %v9632_v20 = vld [vmem:[#allocation74_spill] sm:$0xff] }
 0x2c5   : >> { %v7567_v8 = vpop.permute.xlu1 %1831  ;;  %v7569_v54 = vpop.permute.xlu0 %1827  ;;  %9617 = vst [vmem:[#allocation61_spill] sm:$0xff] %v7575_v49  ;;  %v3425_v4 = vadd.f32 %v3424_v12, %v3423_v9  ;;  %v3432_v31 = vadd.f32 %v3431_v1, %v3430_v7  ;;  %v7599_v55 = vadd.f32 %v3438_v17, %v3437_v27  ;;  %v7601_v56 = vadd.f32 %v3443_v63, %v3442_v5  ;;  %v9623_v5 = vld [vmem:[#allocation67_spill] sm:$0xff]  ;;  %v9624_v12 = vld [vmem:[#allocation68_spill] sm:$0xff]  ;;  %v9625_v1 = vld [vmem:[#allocation69_spill] sm:$0xff] }
 0x2c6   : >> { %v3449_v48 = vadd.f32 %v5643_v59, %v5642_v19  ;;  %v2166_v39 = vrot.slane %v7523_v33, %v6570_v32  ;;  %v5645_v26 = vsel %vm2479_vm10, 1.0, %v9488_v11  ;;  %v5644_v9 = vsel %vm2478_vm12, 1.0, %v9488_v11  ;;  %v9626_v17 = vld [vmem:[#allocation70_spill] sm:$0xff]  ;;  %v9629_v59 = vld [vmem:[#allocation71_spill] sm:$0xff]  ;;  %v9630_v19 = vld [vmem:[#allocation72_spill] sm:$0xff] }
 0x2c7   : >> { %2150 = vbcast.lane.b32.xlu1 %v2144_v46, 264  ;;  %2146 = vbcast.lane.b32.xlu0 %v2144_v46, 256  ;;  %v3419_v46 = vrot.slane %v3418_v47, 1  ;;  %v5647_v7 = vsel %vm2481_vm0, 1.0, %v9488_v11  ;;  %v5646_v27 = vsel %vm2480_vm15, 1.0, %v9488_v11  ;;  %vm2483_vm4 = vcmp.eq.s32.totalorder %v9623_v5, %v9400_v16 }
 0x2c8   : >> { %vm2482_vm7 = vcmp.eq.s32.totalorder %v9624_v12, %v9400_v16  ;;  %vm2485_vm9 = vcmp.eq.s32.totalorder %v9625_v1, %v9400_v16  ;;  %vm2484_vm10 = vcmp.eq.s32.totalorder %v9626_v17, %v9400_v16  ;;  %vm2487_vm12 = vcmp.eq.s32.totalorder %v9629_v59, %v9400_v16 }
 0x2c9   : >> { %v7595_v61 = vpop.permute.xlu1 %1842  ;;  %v7597_v40 = vpop.permute.xlu0 %1838  ;;  %vm2486_vm0 = vcmp.eq.s32.totalorder %v9630_v19, %v9400_v16  ;;  %vm2489_vm15 = vcmp.eq.s32.totalorder %v9631_v52, %v9400_v16  ;;  %vm2488_vm3 = vcmp.eq.s32.totalorder %v9632_v20, %v9400_v16  ;;  %v3456_v60 = vadd.f32 %v5645_v26, %v5644_v9 }
 0x2ca   : >> { %v3463_v62 = vadd.f32 %v5647_v7, %v5646_v27  ;;  %v2177_v5 = vrot.slane %v7523_v33, %v6573_v34  ;;  %v5649_v12 = vsel %vm2483_vm4, 1.0, %v9488_v11  ;;  %v5648_v1 = vsel %vm2482_vm7, 1.0, %v9488_v11 }
 0x2cb   : >> { %2161 = vbcast.lane.b32.xlu1 %v2155_v28, 264  ;;  %2157 = vbcast.lane.b32.xlu0 %v2155_v28, 256  ;;  %v5651_v17 = vsel %vm2485_vm9, 1.0, %v9488_v11  ;;  %v5650_v59 = vsel %vm2484_vm10, 1.0, %v9488_v11  ;;  %v5653_v19 = vsel %vm2487_vm12, 1.0, %v9488_v11  ;;  %v5652_v52 = vsel %vm2486_vm0, 1.0, %v9488_v11 }
 0x2cc   : >> { %v5655_v26 = vsel %vm2489_vm15, 1.0, %v9488_v11  ;;  %v7655_v27 = vadd.f32 %v3412_v6, %v3411_v57  ;;  %v7657_v20 = vadd.f32 %v3419_v46, %v3418_v47  ;;  %v3426_v2 = vrot.slane %v3425_v4, 1  ;;  %v9637_v46 = vld [vmem:[#allocation75_spill] sm:$0xff] }
 0x2cd   : >> { %v7629_v63 = vpop.permute.xlu1 %1853  ;;  %v7631_v28 = vpop.permute.xlu0 %1849  ;;  %v3433_v49 = vrot.slane %v3432_v31, 1  ;;  %v3450_v29 = vrot.slane %v3449_v48, 4  ;;  %v3470_v44 = vadd.f32 %v5649_v12, %v5648_v1  ;;  %v3477_v3 = vadd.f32 %v5651_v17, %v5650_v59  ;;  %v9638_v12 = vld [vmem:[#allocation76_spill] sm:$0xff] }
 0x2ce   : >> { %9627 = vst [vmem:[#allocation63_spill] sm:$0xff] %v7629_v63  ;;  %9628 = vst [vmem:[#allocation64_spill] sm:$0xff] %v7631_v28  ;;  %v2188_v13 = vrot.slane %v7523_v33, %v6576_v36  ;;  %v920_v28 = vld [vmem:[%s6552_s30 + $0x70] sm:$0xff]  ;;  %v3440_v63 = vrot.slane %v7599_v55, 1  ;;  %v3457_v6 = vrot.slane %v3456_v60, 4  ;;  %v3464_v47 = vrot.slane %v3463_v62, 4 }
 0x2cf   : >> { %2172 = vbcast.lane.b32.xlu1 %v2166_v39, 264  ;;  %2168 = vbcast.lane.b32.xlu0 %v2166_v39, 256  ;;  %v5654_v39 = vsel %vm2488_vm3, 1.0, %v9488_v11  ;;  %9635 = vst [vmem:[#allocation67_spill] sm:$0xff] %v7655_v27  ;;  %9636 = vst [vmem:[#allocation68_spill] sm:$0xff] %v7657_v20  ;;  %vm2491_vm3 = vcmp.eq.s32.totalorder %v9637_v46, %v9400_v16  ;;  %vm2490_vm4 = vcmp.eq.s32.totalorder %v9638_v12, %v9400_v16  ;;  %v9648_v12 = vld [vmem:[#allocation77_spill] sm:$0xff] }
 0x2d0   : >> { %v3491_v57 = vadd.f32 %v5655_v26, %v5654_v39  ;;  %v7672_v17 = vadd.f32 %v3426_v2, %v3425_v4  ;;  %v7674_v59 = vadd.f32 %v3433_v49, %v3432_v31  ;;  %vm936_vm7 = vcmp.le.s32.totalorder %v920_v28, 40 }
 0x2d1   : >> { %v7651_v9 = vpop.permute.xlu1 %1864  ;;  %v7653_v7 = vpop.permute.xlu0 %1860  ;;  %vm952_vm9 = vcmp.ne.s32.totalorder %v920_v28, 0  ;;  %v3478_v26 = vrot.slane %v3477_v3, 4  ;;  %v2199_v39 = vrot.slane %v7523_v33, %v6579_v38  ;;  %v5657_v2 = vsel %vm2491_vm3, 1.0, %v9488_v11 }
 0x2d2   : >> { %9633 = vst [vmem:[#allocation65_spill] sm:$0xff] %v7651_v9  ;;  %9634 = vst [vmem:[#allocation66_spill] sm:$0xff] %v7653_v7  ;;  %v3445_v9 = vrot.slane %v7601_v56, 2  ;;  %v3484_v7 = vadd.f32 %v5653_v19, %v5652_v52  ;;  %v7676_v19 = vadd.f32 %v3450_v29, %v3449_v48  ;;  %v3471_v52 = vrot.slane %v3470_v44, 4 }
 0x2d3   : >> { %2183 = vbcast.lane.b32.xlu1 %v2177_v5, 264  ;;  %2179 = vbcast.lane.b32.xlu0 %v2177_v5, 256  ;;  %9641 = vst [vmem:[#allocation71_spill] sm:$0xff] %v7672_v17  ;;  %9642 = vst [vmem:[#allocation72_spill] sm:$0xff] %v7674_v59  ;;  %v3492_v27 = vrot.slane %v3491_v57, 4  ;;  %v5656_v29 = vsel %vm2490_vm4, 1.0, %v9488_v11  ;;  %v7689_v49 = vadd.f32 %v3440_v63, %v7599_v55 }
 0x2d4   : >> { %v3485_v20 = vrot.slane %v3484_v7, 4  ;;  %v3458_v4 = vadd.f32 %v3457_v6, %v3456_v60  ;;  %v7694_v31 = vadd.f32 %v3464_v47, %v3463_v62  ;;  %vm7702_vm10 = vmand %vm936_vm7, %vm952_vm9  ;;  %vm2493_vm12 = vcmp.eq.s32.totalorder %v9648_v12, %v9400_v16  ;;  %v9649_v55 = vld [vmem:[#allocation78_spill] sm:$0xff] }
 0x2d5   : >> { %v7668_v1 = vpop.permute.xlu1 %1875  ;;  %v7670_v5 = vpop.permute.xlu0 %1871  ;;  %9643 = vst [vmem:[#allocation73_spill] sm:$0xff] %v7689_v49  ;;  %vm2492_vm0 = vcmp.eq.s32.totalorder %v9649_v55, %v9400_v16  ;;  %vm2495_vm15 = vcmp.eq.s32.totalorder %v7019_v18, %v9400_v16  ;;  %vm2494_vm3 = vcmp.eq.s32.totalorder %v7021_v42, %v9400_v16  ;;  %v3472_v63 = vadd.f32 %v3471_v52, %v3470_v44 }
 0x2d6   : >> { %9639 = vst [vmem:[#allocation69_spill] sm:$0xff] %v7668_v1  ;;  %9640 = vst [vmem:[#allocation70_spill] sm:$0xff] %v7670_v5  ;;  %v3498_v60 = vadd.f32 %v5657_v2, %v5656_v29  ;;  %v2210_v62 = vrot.slane %v7523_v33, %v6583_v41  ;;  %v3486_v6 = vadd.f32 %v3485_v20, %v3484_v7  ;;  %v7719_v12 = vsel %vm7702_vm10, %v920_v28, 4294967295  ;;  %v9652_v33 = vld [vmem:[#allocation80_spill] sm:$0xff]  ;;  %v9654_v2 = vld [vmem:[#allocation82_spill] sm:$0xff] }
 0x2d7   : >> { %2194 = vbcast.lane.b32.xlu1 %v2188_v13, 264  ;;  %2190 = vbcast.lane.b32.xlu0 %v2188_v13, 256  ;;  %v7692_v13 = vadd.f32 %v3445_v9, %v7601_v56  ;;  %v3452_v56 = vrot.slane %v7676_v19, 2  ;;  %v3479_v9 = vadd.f32 %v3478_v26, %v3477_v3  ;;  %v3493_v47 = vadd.f32 %v3492_v27, %v3491_v57  ;;  %v9653_v3 = vld [vmem:[#allocation81_spill] sm:$0xff] }
 0x2d8   : >> { %v5659_v18 = vsel %vm2493_vm12, 1.0, %v9488_v11  ;;  %v5658_v42 = vsel %vm2492_vm0, 1.0, %v9488_v11  ;;  %v5661_v55 = vsel %vm2495_vm15, 1.0, %v9488_v11  ;;  %v5660_v44 = vsel %vm2494_vm3, 1.0, %v9488_v11 }
 0x2d9   : >> { %v7696_v48 = vpop.permute.xlu1 %1886  ;;  %v7698_v59 = vpop.permute.xlu0 %1882  ;;  %vm2497_vm4 = vcmp.eq.s32.totalorder %v9652_v33, %v9400_v16  ;;  %vm2496_vm7 = vcmp.eq.s32.totalorder %v9653_v3, %v9400_v16  ;;  %vm2499_vm9 = vcmp.eq.s32.totalorder %v7038_v58, %v9400_v16  ;;  %vm2498_vm12 = vcmp.eq.s32.totalorder %v7040_v43, %v9400_v16 }
 0x2da   : >> { %9644 = vst [vmem:[#allocation74_spill] sm:$0xff] %v7696_v48  ;;  %9645 = vst [vmem:[#allocation75_spill] sm:$0xff] %v7698_v59  ;;  %v3459_v28 = vrot.slane %v3458_v4, 2  ;;  %v3466_v7 = vrot.slane %v7694_v31, 2  ;;  %v3499_v27 = vrot.slane %v3498_v60, 4  ;;  %v2221_v20 = vrot.slane %v7719_v12, %v6557_v25 }
 0x2db   : >> { %2205 = vbcast.lane.b32.xlu1 %v2199_v39, 264  ;;  %2201 = vbcast.lane.b32.xlu0 %v2199_v39, 256  ;;  %v3505_v57 = vadd.f32 %v5659_v18, %v5658_v42  ;;  %v3512_v26 = vadd.f32 %v5661_v55, %v5660_v44  ;;  %vm2501_vm0 = vcmp.eq.s32.totalorder %v7054_v14, %v9400_v16  ;;  %v5663_v58 = vsel %vm2497_vm4, 1.0, %v9488_v11 }
 0x2dc   : >> { %vm2500_vm15 = vcmp.eq.s32.totalorder %v9654_v2, %v9400_v16  ;;  %v5662_v43 = vsel %vm2496_vm7, 1.0, %v9488_v11  ;;  %v5665_v29 = vsel %vm2499_vm9, 1.0, %v9488_v11  ;;  %v5664_v33 = vsel %vm2498_vm12, 1.0, %v9488_v11 }
 0x2dd   : >> { %v7725_v52 = vpop.permute.xlu1 %1897  ;;  %v7727_v39 = vpop.permute.xlu0 %1893  ;;  %v3473_v18 = vrot.slane %v3472_v63, 2  ;;  %v3480_v42 = vrot.slane %v3479_v9, 2  ;;  %v3487_v55 = vrot.slane %v3486_v6, 2  ;;  %v3494_v44 = vrot.slane %v3493_v47, 2 }
 0x2de   : >> { %9650 = vst [vmem:[#allocation76_spill] sm:$0xff] %v7725_v52  ;;  %9651 = vst [vmem:[#allocation77_spill] sm:$0xff] %v7727_v39  ;;  %v3500_v14 = vadd.f32 %v3499_v27, %v3498_v60  ;;  %v5667_v49 = vsel %vm2501_vm0, 1.0, %v9488_v11  ;;  %v5666_v2 = vsel %vm2500_vm15, 1.0, %v9488_v11  ;;  %v2232_v17 = vrot.slane %v7719_v12, %v6555_v24 }
 0x2df   : >> { %2216 = vbcast.lane.b32.xlu1 %v2210_v62, 264  ;;  %2212 = vbcast.lane.b32.xlu0 %v2210_v62, 256  ;;  %v3453_v41 = vadd.f32 %v3452_v56, %v7676_v19  ;;  %v3460_v39 = vadd.f32 %v3459_v28, %v3458_v4  ;;  %v3526_v52 = vadd.f32 %v5665_v29, %v5664_v33  ;;  %v3513_v59 = vrot.slane %v3512_v26, 4 }
 0x2e0   : >> { %vm2503_vm3 = vcmp.eq.s32.totalorder %v7075_v35, %v9400_v16  ;;  %vm2502_vm4 = vcmp.eq.s32.totalorder %v7077_v51, %v9400_v16  ;;  %v3467_v48 = vadd.f32 %v3466_v7, %v7694_v31  ;;  %v3474_v19 = vadd.f32 %v3473_v18, %v3472_v63  ;;  %v9661_v35 = vld [vmem:[#allocation86_spill] sm:$0xff] }
 0x2e1   : >> { %v7748_v62 = vpop.permute.xlu1 %1908  ;;  %v7750_v3 = vpop.permute.xlu0 %1904  ;;  %v3533_v4 = vadd.f32 %v5667_v49, %v5666_v2  ;;  %v3481_v56 = vadd.f32 %v3480_v42, %v3479_v9  ;;  %v3488_v28 = vadd.f32 %v3487_v55, %v3486_v6  ;;  %v3527_v33 = vrot.slane %v3526_v52, 4 }
 0x2e2   : >> { %9655 = vst [vmem:[#allocation78_spill] sm:$0xff] %v7748_v62  ;;  %9656 = vst [vmem:[#allocation80_spill] sm:$0xff] %v7750_v3  ;;  %v3519_v62 = vadd.f32 %v5663_v58, %v5662_v43  ;;  %v3506_v3 = vrot.slane %v3505_v57, 4  ;;  %v3495_v58 = vadd.f32 %v3494_v44, %v3493_v47  ;;  %v3501_v43 = vrot.slane %v3500_v14, 2 }
 0x2e3   : >> { %2227 = vbcast.lane.b32.xlu1 %v2221_v20, 264  ;;  %2223 = vbcast.lane.b32.xlu0 %v2221_v20, 256  ;;  %v3447_v20 = vrot.slane %v7692_v13, 1  ;;  %v5668_v31 = vsel %vm2502_vm4, 1.0, %v9488_v11  ;;  %v3454_v63 = vrot.slane %v3453_v41, 1  ;;  %v3461_v49 = vrot.slane %v3460_v39, 1 }
 0x2e4   : >> { %v3520_v29 = vrot.slane %v3519_v62, 4  ;;  %v3507_v9 = vadd.f32 %v3506_v3, %v3505_v57  ;;  %v3514_v6 = vadd.f32 %v3513_v59, %v3512_v26  ;;  %v3534_v18 = vrot.slane %v3533_v4, 4 }
 0x2e5   : >> { %v7761_v60 = vpop.permute.xlu1 %1919  ;;  %v7763_v27 = vpop.permute.xlu0 %1915  ;;  %vm2505_vm7 = vcmp.eq.s32.totalorder %v7095_v37, %v9400_v16  ;;  %vm2504_vm9 = vcmp.eq.s32.totalorder %v9661_v35, %v9400_v16  ;;  %v3475_v42 = vrot.slane %v3474_v19, 1  ;;  %v3482_v55 = vrot.slane %v3481_v56, 1 }
 0x2e6   : >> { %9657 = vst [vmem:[#allocation81_spill] sm:$0xff] %v7761_v60  ;;  %9658 = vst [vmem:[#allocation82_spill] sm:$0xff] %v7763_v27  ;;  %v5669_v60 = vsel %vm2503_vm3, 1.0, %v9488_v11  ;;  %v3489_v51 = vrot.slane %v3488_v28, 1  ;;  %v3496_v2 = vrot.slane %v3495_v58, 1  ;;  %v3502_v27 = vadd.f32 %v3501_v43, %v3500_v14 }
 0x2e7   : >> { %2238 = vbcast.lane.b32.xlu1 %v2232_v17, 264  ;;  %2234 = vbcast.lane.b32.xlu0 %v2232_v17, 256  ;;  %v3468_v17 = vrot.slane %v3467_v48, 1  ;;  %v3540_v44 = vadd.f32 %v5669_v60, %v5668_v31  ;;  %v3521_v57 = vadd.f32 %v3520_v29, %v3519_v62  ;;  %v3528_v59 = vadd.f32 %v3527_v33, %v3526_v52 }
 0x2e8   : >> { %v3508_v26 = vrot.slane %v3507_v9, 2  ;;  %v3515_v3 = vrot.slane %v3514_v6, 2  ;;  %v7790_v35 = vadd.f32 %v3447_v20, %v7692_v13  ;;  %v7792_v1 = vadd.f32 %v3454_v63, %v3453_v41 }
 0x2e9   : >> { %v7775_v47 = vpop.permute.xlu1 %1930  ;;  %v7777_v7 = vpop.permute.xlu0 %1926  ;;  %v7794_v60 = vadd.f32 %v3461_v49, %v3460_v39  ;;  %v3535_v14 = vadd.f32 %v3534_v18, %v3533_v4  ;;  %v7796_v62 = vadd.f32 %v3468_v17, %v3467_v48  ;;  %v7798_v52 = vadd.f32 %v3475_v42, %v3474_v19  ;;  %v9672_v19 = vld [vmem:[#allocation87_spill] sm:$0xff] }
 0x2ea   : >> { %9659 = vst [vmem:[#allocation111_spill] sm:$0xff] %v7775_v47  ;;  %9660 = vst [vmem:[#allocation112_spill] sm:$0xff] %v7777_v7  ;;  %v5671_v7 = vsel %vm2505_vm7, 1.0, %v9488_v11  ;;  %v5670_v47 = vsel %vm2504_vm9, 1.0, %v9488_v11  ;;  %v7800_v43 = vadd.f32 %v3482_v55, %v3481_v56  ;;  %v3541_v29 = vrot.slane %v3540_v44, 4 }
 0x2eb   : >> { %9664 = vst [vmem:[#allocation114_spill] sm:$0xff] %v7790_v35  ;;  %9665 = vst [vmem:[#allocation115_spill] sm:$0xff] %v7792_v1  ;;  %v7802_v33 = vadd.f32 %v3489_v51, %v3488_v28  ;;  %v3522_v31 = vrot.slane %v3521_v57, 2  ;;  %v7804_v38 = vadd.f32 %v3496_v2, %v3495_v58  ;;  %v3503_v13 = vrot.slane %v3502_v27, 1 }
 0x2ec   : >> { %9666 = vst [vmem:[#allocation116_spill] sm:$0xff] %v7794_v60  ;;  %9667 = vst [vmem:[#allocation117_spill] sm:$0xff] %v7796_v62  ;;  %v3509_v41 = vadd.f32 %v3508_v26, %v3507_v9  ;;  %v3516_v20 = vadd.f32 %v3515_v3, %v3514_v6  ;;  %v3536_v4 = vrot.slane %v3535_v14, 2  ;;  %vm2507_vm12 = vcmp.eq.s32.totalorder %v7130_v10, %v9400_v16 }
 0x2ed   : >> { %v7785_v5 = vpop.permute.xlu1 %1941  ;;  %v7787_v37 = vpop.permute.xlu0 %1937  ;;  %9668 = vst [vmem:[#allocation118_spill] sm:$0xff] %v7798_v52  ;;  %9669 = vst [vmem:[#allocation119_spill] sm:$0xff] %v7800_v43  ;;  %v3542_v48 = vadd.f32 %v3541_v29, %v3540_v44  ;;  %vm2506_vm3 = vcmp.eq.s32.totalorder %v9672_v19, %v9400_v16  ;;  %v3523_v58 = vadd.f32 %v3522_v31, %v3521_v57  ;;  %v5673_v17 = vsel %vm2507_vm12, 1.0, %v9488_v11 }
 0x2ee   : >> { %9662 = vst [vmem:[#allocation86_spill] sm:$0xff] %v7785_v5  ;;  %9663 = vst [vmem:[#allocation113_spill] sm:$0xff] %v7787_v37  ;;  %v3529_v5 = vrot.slane %v3528_v59, 2  ;;  %v3547_v37 = vadd.f32 %v5671_v7, %v5670_v47  ;;  %v7816_v47 = vadd.f32 %v3503_v13, %v3502_v27  ;;  %v3510_v10 = vrot.slane %v3509_v41, 1 }
 0x2ef   : >> { %9670 = vst [vmem:[#allocation120_spill] sm:$0xff] %v7802_v33  ;;  %9671 = vst [vmem:[#allocation121_spill] sm:$0xff] %v7804_v38  ;;  %v3517_v7 = vrot.slane %v3516_v20, 1  ;;  %v5672_v55 = vsel %vm2506_vm3, 1.0, %v9488_v11  ;;  %vm2509_vm4 = vcmp.eq.s32.totalorder %v7157_v15, %v9400_v16  ;;  %vm2508_vm7 = vcmp.eq.s32.totalorder %v7159_v23, %v9400_v16 }
 0x2f0   : >> { %v3530_v49 = vadd.f32 %v3529_v5, %v3528_v59  ;;  %v3548_v9 = vrot.slane %v3547_v37, 4  ;;  %9673 = vst [vmem:[#allocation87_spill] sm:$0xff] %v7816_v47  ;;  %v3537_v5 = vadd.f32 %v3536_v4, %v3535_v14  ;;  %v3543_v51 = vrot.slane %v3542_v48, 2 }
 0x2f1   : >> { %v1953_v39 = vpop.permute.xlu1 %1952  ;;  %v1949_v63 = vpop.permute.xlu0 %1948  ;;  %v3524_v44 = vrot.slane %v3523_v58, 1  ;;  %v3554_v26 = vadd.f32 %v5673_v17, %v5672_v55  ;;  %v5675_v3 = vsel %vm2509_vm4, 1.0, %v9488_v11  ;;  %v5674_v15 = vsel %vm2508_vm7, 1.0, %v9488_v11 }
 0x2f2   : >> { %vm2569_vm0 = vcmp.eq.s32.totalorder %v1953_v39, %v9400_v16  ;;  %vm2568_vm15 = vcmp.eq.s32.totalorder %v1949_v63, %v9400_v16  ;;  %v3531_v2 = vrot.slane %v3530_v49, 1  ;;  %v3549_v57 = vadd.f32 %v3548_v9, %v3547_v37 }
 0x2f3   : >> { %v5735_v56 = vsel %vm2569_vm0, 1.0, %v9488_v11  ;;  %v5734_v28 = vsel %vm2568_vm15, 1.0, %v9488_v11  ;;  %vm2511_vm12 = vcmp.eq.s32.totalorder %v7188_v50, %v9400_v16  ;;  %vm2510_vm15 = vcmp.eq.s32.totalorder %v7190_v53, %v9400_v16 }
 0x2f4   : >> { %v7814_v6 = vadd.f32 %v5735_v56, %v5734_v28  ;;  %v3538_v37 = vrot.slane %v3537_v5, 1  ;;  %v3544_v14 = vadd.f32 %v3543_v51, %v3542_v48  ;;  %v7840_v63 = vadd.f32 %v3510_v10, %v3509_v41 }
 0x2f5   : >> { %v1964_v18 = vpop.permute.xlu1 %1963  ;;  %v1960_v42 = vpop.permute.xlu0 %1959  ;;  %v7842_v4 = vadd.f32 %v3517_v7, %v3516_v20  ;;  %v3550_v19 = vrot.slane %v3549_v57, 2  ;;  %v3555_v50 = vrot.slane %v3554_v26, 4  ;;  %v3561_v28 = vadd.f32 %v5675_v3, %v5674_v15  ;;  %v9680_v3 = vld [vmem:[#allocation18_spill] sm:$0xff] }
 0x2f6   : >> { %vm2571_vm9 = vcmp.eq.s32.totalorder %v1964_v18, %v9400_v16  ;;  %vm2570_vm0 = vcmp.eq.s32.totalorder %v1960_v42, %v9400_v16  ;;  %9674 = vst [vmem:[#allocation122_spill] sm:$0xff] %v7840_v63  ;;  %v5677_v53 = vsel %vm2511_vm12, 1.0, %v9488_v11  ;;  %v5676_v9 = vsel %vm2510_vm15, 1.0, %v9488_v11 }
 0x2f7   : >> { %v5737_v27 = vsel %vm2571_vm9, 1.0, %v9488_v11  ;;  %v5736_v59 = vsel %vm2570_vm0, 1.0, %v9488_v11  ;;  %9675 = vst [vmem:[#allocation123_spill] sm:$0xff] %v7842_v4  ;;  %v7848_v48 = vadd.f32 %v3524_v44, %v3523_v58  ;;  %v7850_v42 = vadd.f32 %v3531_v2, %v3530_v49 }
 0x2f8   : >> { %v7830_v29 = vadd.f32 %v5737_v27, %v5736_v59  ;;  %v7854_v41 = vadd.f32 %v3538_v37, %v3537_v5  ;;  %v3545_v20 = vrot.slane %v3544_v14, 1  ;;  %v3568_v55 = vadd.f32 %v5677_v53, %v5676_v9 }
 0x2f9   : >> { %v1975_v23 = vpop.permute.xlu1 %1974  ;;  %v1971_v31 = vpop.permute.xlu0 %1970  ;;  %9676 = vst [vmem:[#allocation124_spill] sm:$0xff] %v7848_v48  ;;  %9677 = vst [vmem:[#allocation125_spill] sm:$0xff] %v7850_v42  ;;  %v5816_v58 = vsel %vm6559_vm2, 1.0, %v9488_v11  ;;  %vm4090_vm0 = vcmask 130048   ;;  %v3551_v49 = vadd.f32 %v3550_v19, %v3549_v57  ;;  %v7863_v44 = vadd.f32 %v3555_v50, %v3554_v26  ;;  %v9681_v57 = vld [vmem:[#allocation19_spill] sm:$0xff] }
 0x2fa   : >> { %vm2573_vm3 = vcmp.eq.s32.totalorder %v1975_v23, %v9400_v16  ;;  %vm2572_vm9 = vcmp.eq.s32.totalorder %v1971_v31, %v9400_v16  ;;  %9678 = vst [vmem:[#allocation126_spill] sm:$0xff] %v7854_v41  ;;  %v3562_v2 = vrot.slane %v3561_v28, 4  ;;  %vm2513_vm12 = vcmp.eq.s32.totalorder %v7209_v45, %v9400_v16  ;;  %v9705_v41 = vld [vmem:[#allocation31_spill] sm:$0xff] }
 0x2fb   : >> { %v5739_v13 = vsel %vm2573_vm3, 1.0, %v9488_v11  ;;  %v5738_v39 = vsel %vm2572_vm9, 1.0, %v9488_v11  ;;  %vm2512_vm15 = vcmp.eq.s32.totalorder %v7211_v0, %v9400_v16  ;;  %vm2515_vm3 = vcmp.eq.s32.totalorder %v9680_v3, %v9400_v16 }
 0x2fc   : >> { %v7844_v56 = vadd.f32 %v5739_v13, %v5738_v39  ;;  %v4091_v23 = vsel %vm4090_vm0, %v5816_v58, 0.0  ;;  %v7878_v31 = vadd.f32 %v3545_v20, %v3544_v14  ;;  %v3569_v37 = vrot.slane %v3568_v55, 4 }
 0x2fd   : >> { %v1986_v17 = vpop.permute.xlu1 %1985  ;;  %v1982_v18 = vpop.permute.xlu0 %1981  ;;  %v5818_v19 = vsel %vm6600_vm8, 1.0, %v9488_v11  ;;  %v3552_v50 = vrot.slane %v3551_v49, 1  ;;  %v3557_v53 = vrot.slane %v7863_v44, 2  ;;  %v5679_v9 = vsel %vm2513_vm12, 1.0, %v9488_v11 }
 0x2fe   : >> { %vm2575_vm4 = vcmp.eq.s32.totalorder %v1986_v17, %v9400_v16  ;;  %vm2574_vm7 = vcmp.eq.s32.totalorder %v1982_v18, %v9400_v16  ;;  %9682 = vst [vmem:[#allocation9_spill] sm:$0xff] %v7878_v31  ;;  %v5817_v20 = vsel %vm6585_vm5, 1.0, %v9488_v11  ;;  %v3563_v27 = vadd.f32 %v3562_v2, %v3561_v28 }
 0x2ff   : >> { %v5741_v10 = vsel %vm2575_vm4, 1.0, %v9488_v11  ;;  %v5740_v7 = vsel %vm2574_vm7, 1.0, %v9488_v11  ;;  %vm2514_vm4 = vcmp.eq.s32.totalorder %v9681_v57, %v9400_v16  ;;  %v4097_v0 = vsel %vm4090_vm0, %v5818_v19, 0.0 }
 0x300   : >> { %v7858_v51 = vadd.f32 %v5741_v10, %v5740_v7  ;;  %v5678_v10 = vsel %vm2512_vm15, 1.0, %v9488_v11  ;;  %v5681_v7 = vsel %vm2515_vm3, 1.0, %v9488_v11  ;;  %v5680_v45 = vsel %vm2514_vm4, 1.0, %v9488_v11 }
 0x301   : >> { %v1997_v5 = vpop.permute.xlu1 %1996  ;;  %v1993_v59 = vpop.permute.xlu0 %1992  ;;  %v4094_v3 = vsel %vm4090_vm0, %v5817_v20, 0.0  ;;  %v5819_v57 = vsel %vm6615_vm11, 1.0, %v9488_v11  ;;  %v3582_v39 = vadd.f32 %v5681_v7, %v5680_v45  ;;  %v7919_v19 = vadd.f32 %v3552_v50, %v3551_v49 }
 0x302   : >> { %vm2577_vm9 = vcmp.eq.s32.totalorder %v1997_v5, %v9400_v16  ;;  %vm2576_vm2 = vcmp.eq.s32.totalorder %v1993_v59, %v9400_v16  ;;  %v3570_v5 = vadd.f32 %v3569_v37, %v3568_v55  ;;  %v9688_v55 = vld [vmem:[#allocation20_spill] sm:$0xff]  ;;  %v9689_v37 = vld [vmem:[#allocation21_spill] sm:$0xff]  ;;  %v4100_v20 = vsel %vm4090_vm0, %v5819_v57, 0.0 }
 0x303   : >> { %v5743_v26 = vsel %vm2577_vm9, 1.0, %v9488_v11  ;;  %v5742_v15 = vsel %vm2576_vm2, 1.0, %v9488_v11  ;;  %9687 = vst [vmem:[#allocation18_spill] sm:$0xff] %v7919_v19  ;;  %vm2517_vm7 = vcmp.eq.s32.totalorder %v9688_v55, %v9400_v16  ;;  %vm2516_vm11 = vcmp.eq.s32.totalorder %v9689_v37, %v9400_v16 }
 0x304   : >> { %v7880_v13 = vadd.f32 %v5743_v26, %v5742_v15  ;;  %v3575_v15 = vadd.f32 %v5679_v9, %v5678_v10  ;;  %v3564_v49 = vrot.slane %v3563_v27, 2  ;;  %v5821_v45 = vsel %vm6685_vm1, 1.0, %v9488_v11 }
 0x305   : >> { %v2008_v17 = vpop.permute.xlu1 %2007  ;;  %v2004_v18 = vpop.permute.xlu0 %2003  ;;  %v5683_v57 = vsel %vm2517_vm7, 1.0, %v9488_v11  ;;  %v4106_v55 = vsel %vm4090_vm0, %v5821_v45, 0.0 }
 0x306   : >> { %vm2579_vm8 = vcmp.eq.s32.totalorder %v2008_v17, %v9400_v16  ;;  %4092 = vadd.xlane.f32.xlu0 %v4091_v23  ;;  %vm2578_vm5 = vcmp.eq.s32.totalorder %v2004_v18, %v9400_v16  ;;  %v5820_v18 = vsel %vm6638_vm14, 1.0, %v9488_v11  ;;  %v5682_v23 = vsel %vm2516_vm11, 1.0, %v9488_v11 }
 0x307   : >> { %v5745_v58 = vsel %vm2579_vm8, 1.0, %v9488_v11  ;;  %v5744_v59 = vsel %vm2578_vm5, 1.0, %v9488_v11  ;;  %v4103_v10 = vsel %vm4090_vm0, %v5820_v18, 0.0  ;;  %v7950_v18 = vadd.f32 %v3557_v53, %v7863_v44 }
 0x308   : >> { %v7914_v17 = vadd.f32 %v5745_v58, %v5744_v59  ;;  %v3571_v58 = vrot.slane %v3570_v5, 2  ;;  %v3583_v59 = vrot.slane %v3582_v39, 4  ;;  %v7955_v7 = vadd.f32 %v3564_v49, %v3563_v27  ;;  %v9696_v49 = vld [vmem:[#allocation23_spill] sm:$0xff] }
 0x309   : >> { %v2019_v28 = vpop.permute.xlu1 %2018  ;;  %v2015_v2 = vpop.permute.xlu0 %2014  ;;  %v3589_v53 = vadd.f32 %v5683_v57, %v5682_v23  ;;  %vm2519_vm9 = vcmp.eq.s32.totalorder %v9696_v49, %v9400_v16  ;;  %v9701_v49 = vld [vmem:[#allocation99_spill] sm:$0xff] }
 0x30a   : >> { %vm2581_vm12 = vcmp.eq.s32.totalorder %v2019_v28, %v9400_v16  ;;  %vm2580_vm15 = vcmp.eq.s32.totalorder %v2015_v2, %v9400_v16  ;;  %4098 = vadd.xlane.f32.xlu0 %v4097_v0  ;;  %v3576_v0 = vrot.slane %v3575_v15, 4  ;;  %v7968_v27 = vadd.f32 %v3583_v59, %v3582_v39  ;;  %v9704_v39 = vld [vmem:[#allocation100_spill] sm:$0xff] }
 0x30b   : >> { %v5747_v9 = vsel %vm2581_vm12, 1.0, %v9488_v11  ;;  %v5746_v14 = vsel %vm2580_vm15, 1.0, %v9488_v11  ;;  %4095 = vadd.xlane.f32.xlu1 %v4094_v3  ;;  %v5822_v3 = vsel %vm6732_vm6, 1.0, %v9488_v11  ;;  %vm2521_vm12 = vcmp.eq.s32.totalorder %v9701_v49, %v9400_v16 }
 0x30c   : >> { %v7930_v50 = vadd.f32 %v5747_v9, %v5746_v14  ;;  %v4109_v37 = vsel %vm4090_vm0, %v5822_v3, 0.0  ;;  %v3577_v44 = vadd.f32 %v3576_v0, %v3575_v15  ;;  %vm2520_vm11 = vcmp.eq.s32.totalorder %v9704_v39, %v9400_v16 }
 0x30d   : >> { %v2030_v26 = vpop.permute.xlu1 %2029  ;;  %v2026_v28 = vpop.permute.xlu0 %2025  ;;  %v9715_v63 = vrot.slane %v7955_v7, 1 }
 0x30e   : >> { %vm2583_vm14 = vcmp.eq.s32.totalorder %v2030_v26, %v9400_v16  ;;  %vm2582_vm1 = vcmp.eq.s32.totalorder %v2026_v28, %v9400_v16  ;;  %4101 = vadd.xlane.f32.xlu0 %v4100_v20  ;;  %v9692_v26 = vld [vmem:[#allocation28_spill] sm:$0xff]  ;;  %v7963_v28 = vadd.f32 %v3571_v58, %v3570_v5 }
 0x30f   : >> { %v5749_v9 = vsel %vm2583_vm14, 1.0, %v9488_v11  ;;  %v5748_v14 = vsel %vm2582_vm1, 1.0, %v9488_v11  ;;  %4104 = vadd.xlane.f32.xlu1 %v4103_v10  ;;  %vm9693_vm6 = vnez %v9692_v26  ;;  %v9694_v10 = vld [vmem:[#allocation45_spill] sm:$0xff]  ;;  %v9697_v5 = vld [vmem:[#allocation24_spill] sm:$0xff]  ;;  %v5826_v26 = vsel %vm6993_vm13, 1.0, %v9488_v11 }
 0x310   : >> { %v7957_v2 = vadd.f32 %v5749_v9, %v5748_v14  ;;  %v5823_v20 = vsel %vm9693_vm6, 1.0, %v9488_v11  ;;  %vm9695_vm3 = vnez %v9694_v10  ;;  %vm2518_vm8 = vcmp.eq.s32.totalorder %v9697_v5, %v9400_v16 }
 0x311   : >> { %v2041_v19 = vpop.permute.xlu1 %2040  ;;  %v2037_v31 = vpop.permute.xlu0 %2036  ;;  %v5824_v45 = vsel %vm9695_vm3, 1.0, %v9488_v11  ;;  %v4112_v0 = vsel %vm4090_vm0, %v5823_v20, 0.0  ;;  %v3578_v9 = vrot.slane %v3577_v44, 2  ;;  %v3590_v20 = vrot.slane %v3589_v53, 4 }
 0x312   : >> { %vm2585_vm2 = vcmp.eq.s32.totalorder %v2041_v19, %v9400_v16  ;;  %vm2584_vm4 = vcmp.eq.s32.totalorder %v2037_v31, %v9400_v16  ;;  %4107 = vadd.xlane.f32.xlu0 %v4106_v55  ;;  %v4115_v3 = vsel %vm4090_vm0, %v5824_v45, 0.0  ;;  %v9698_v19 = vld [vmem:[#allocation62_spill] sm:$0xff]  ;;  %v5685_v10 = vsel %vm2519_vm9, 1.0, %v9488_v11 }
 0x313   : >> { %v5751_v15 = vsel %vm2585_vm2, 1.0, %v9488_v11  ;;  %v5750_v58 = vsel %vm2584_vm4, 1.0, %v9488_v11  ;;  %4110 = vadd.xlane.f32.xlu1 %v4109_v37  ;;  %vm9699_vm5 = vnez %v9698_v19  ;;  %v5684_v45 = vsel %vm2518_vm8, 1.0, %v9488_v11  ;;  %v8005_v37 = vld [vmem:[%s6552_s30 + $0x78] sm:$0xff] }
 0x314   : >> { %v7980_v59 = vadd.f32 %v5751_v15, %v5750_v58  ;;  %v5825_v31 = vsel %vm9699_vm5, 1.0, %v9488_v11  ;;  %v3585_v15 = vrot.slane %v7968_v27, 2  ;;  %v4121_v23 = vsel %vm4090_vm0, %v5826_v26, 0.0 }
 0x315   : >> { %v2052_v14 = vpop.permute.xlu1 %2051  ;;  %v2048_v55 = vpop.permute.xlu0 %2047  ;;  %v4118_v19 = vsel %vm4090_vm0, %v5825_v31, 0.0  ;;  %v3596_v57 = vadd.f32 %v5685_v10, %v5684_v45  ;;  %vm9706_vm14 = vnez %v9705_v41  ;;  %vm937_vm3 = vcmp.le.s32.totalorder %v8005_v37, 40 }
 0x316   : >> { %vm2587_vm7 = vcmp.eq.s32.totalorder %v2052_v14, %v9400_v16  ;;  %4113 = vadd.xlane.f32.xlu0 %v4112_v0  ;;  %vm2586_vm13 = vcmp.eq.s32.totalorder %v2048_v55, %v9400_v16  ;;  %v9702_v0 = vld [vmem:[#allocation93_spill] sm:$0xff]  ;;  %v5828_v49 = vsel %vm9706_vm14, 1.0, %v9488_v11  ;;  %vm953_vm9 = vcmp.ne.s32.totalorder %v8005_v37, 0 }
 0x317   : >> { %v5753_v58 = vsel %vm2587_vm7, 1.0, %v9488_v11  ;;  %4116 = vadd.xlane.f32.xlu1 %v4115_v3  ;;  %v5752_v5 = vsel %vm2586_vm13, 1.0, %v9488_v11  ;;  %vm9703_vm15 = vnez %v9702_v0  ;;  %v5687_v26 = vsel %vm2521_vm12, 1.0, %v9488_v11  ;;  %vm8043_vm4 = vmand %vm937_vm3, %vm953_vm9 }
 0x318   : >> { %v5827_v14 = vsel %vm9703_vm15, 1.0, %v9488_v11  ;;  %v8016_v3 = vadd.f32 %v5753_v58, %v5752_v5  ;;  %v5686_v41 = vsel %vm2520_vm11, 1.0, %v9488_v11  ;;  %v4127_v5 = vsel %vm4090_vm0, %v5828_v49, 0.0  ;;  %v9711_v49 = vld [vmem:[#allocation101_spill] sm:$0xff] }
 0x319   : >> { %v2063_v31 = vpop.permute.xlu1 %2062  ;;  %v2059_v55 = vpop.permute.xlu0 %2058  ;;  %v4124_v45 = vsel %vm4090_vm0, %v5827_v14, 0.0  ;;  %v3597_v42 = vrot.slane %v3596_v57, 4  ;;  %vm2523_vm8 = vcmp.eq.s32.totalorder %v9711_v49, %v9400_v16  ;;  %v3603_v46 = vadd.f32 %v5687_v26, %v5686_v41 }
 0x31a   : >> { %vm2589_vm1 = vcmp.eq.s32.totalorder %v2063_v31, %v9400_v16  ;;  %vm2588_vm6 = vcmp.eq.s32.totalorder %v2059_v55, %v9400_v16  ;;  %4119 = vadd.xlane.f32.xlu0 %v4118_v19  ;;  %v9707_v19 = vld [vmem:[#allocation55_spill] sm:$0xff]  ;;  %v3579_v31 = vadd.f32 %v3578_v9, %v3577_v44  ;;  %v3591_v55 = vadd.f32 %v3590_v20, %v3589_v53  ;;  %v9712_v44 = vld [vmem:[#allocation102_spill] sm:$0xff] }
 0x31b   : >> { %v5755_v39 = vsel %vm2589_vm1, 1.0, %v9488_v11  ;;  %v5754_v10 = vsel %vm2588_vm6, 1.0, %v9488_v11  ;;  %4122 = vadd.xlane.f32.xlu1 %v4121_v23  ;;  %vm9708_vm2 = vnez %v9707_v19  ;;  %v5830_v23 = vsel %vm7702_vm10, 1.0, %v9488_v11 }
 0x31c   : >> { %v8030_v58 = vadd.f32 %v5755_v39, %v5754_v10  ;;  %v5829_v0 = vsel %vm9708_vm2, 1.0, %v9488_v11  ;;  %vm2522_vm5 = vcmp.eq.s32.totalorder %v9712_v44, %v9400_v16  ;;  %v3586_v39 = vadd.f32 %v3585_v15, %v7968_v27 }
 0x31d   : >> { %v2074_v48 = vpop.permute.xlu1 %2073  ;;  %v2070_v4 = vpop.permute.xlu0 %2069  ;;  %v4130_v20 = vsel %vm4090_vm0, %v5829_v0, 0.0  ;;  %v4133_v19 = vsel %vm4090_vm0, %v5830_v23, 0.0  ;;  %v5689_v26 = vsel %vm2523_vm8, 1.0, %v9488_v11  ;;  %v5688_v27 = vsel %vm2522_vm5, 1.0, %v9488_v11 }
 0x31e   : >> { %vm2591_vm7 = vcmp.eq.s32.totalorder %v2074_v48, %v9400_v16  ;;  %vm2590_vm13 = vcmp.eq.s32.totalorder %v2070_v4, %v9400_v16  ;;  %4125 = vadd.xlane.f32.xlu0 %v4124_v45  ;;  %v5831_v48 = vsel %vm8043_vm4, 1.0, %v9488_v11  ;;  %v3580_v4 = vrot.slane %v3579_v31, 1 }
 0x31f   : >> { %v5757_v53 = vsel %vm2591_vm7, 1.0, %v9488_v11  ;;  %v5756_v9 = vsel %vm2590_vm13, 1.0, %v9488_v11  ;;  %4128 = vadd.xlane.f32.xlu1 %v4127_v5  ;;  %v3592_v45 = vrot.slane %v3591_v55, 2  ;;  %v9713_v5 = vrot.slane %v7950_v18, 1 }
 0x320   : >> { %v8057_v10 = vadd.f32 %v5757_v53, %v5756_v9  ;;  %v3598_v23 = vadd.f32 %v3597_v42, %v3596_v57  ;;  %v3604_v49 = vrot.slane %v3603_v46, 4  ;;  %v4136_v44 = vsel %vm4090_vm0, %v5831_v48, 0.0 }
 0x321   : >> { %v2085_v15 = vpop.permute.xlu1 %2084  ;;  %v2081_v41 = vpop.permute.xlu0 %2080  ;;  %v8074_v0 = vadd.f32 %v9713_v5, %v7950_v18  ;;  %v8084_v47 = vadd.f32 %v9715_v63, %v7955_v7  ;;  %v3587_v18 = vrot.slane %v3586_v39, 1  ;;  %v3610_v42 = vadd.f32 %v5689_v26, %v5688_v27  ;;  %v9721_v63 = vld [vmem:[#allocation30_spill] sm:$0xff]  ;;  %v9723_v26 = vld [vmem:[#allocation103_spill] sm:$0xff] }
 0x322   : >> { %vm2593_vm10 = vcmp.eq.s32.totalorder %v2085_v15, %v9400_v16  ;;  %vm2592_vm12 = vcmp.eq.s32.totalorder %v2081_v41, %v9400_v16  ;;  %4131 = vadd.xlane.f32.xlu0 %v4130_v20  ;;  %v9717_v20 = vrot.slane %v7963_v28, 1  ;;  %v8093_v41 = vadd.f32 %v3580_v4, %v3579_v31  ;;  %v9722_v7 = vld [vmem:[#allocation34_spill] sm:$0xff] }
 0x323   : >> { %9714 = vst [vmem:[#allocation19_spill] sm:$0xff] %v8074_v0  ;;  %v5759_v53 = vsel %vm2593_vm10, 1.0, %v9488_v11  ;;  %v5758_v9 = vsel %vm2592_vm12, 1.0, %v9488_v11  ;;  %4134 = vadd.xlane.f32.xlu1 %v4133_v19  ;;  %9716 = vst [vmem:[#allocation13_spill] sm:$0xff] %v8084_v47  ;;  %v8095_v5 = vadd.f32 %v3592_v45, %v3591_v55  ;;  %v9720_v19 = vld [vmem:[#allocation29_spill] sm:$0xff]  ;;  %vm2524_vm15 = vcmp.eq.s32.totalorder %v9721_v63, %v9400_v16 }
 0x324   : >> { %v8086_v57 = vadd.f32 %v5759_v53, %v5758_v9  ;;  %v8091_v15 = vadd.f32 %v9717_v20, %v7963_v28  ;;  %9719 = vst [vmem:[#allocation14_spill] sm:$0xff] %v8093_v41  ;;  %vm2525_vm0 = vcmp.eq.s32.totalorder %v9720_v19, %v9400_v16  ;;  %vm2527_vm11 = vcmp.eq.s32.totalorder %v9722_v7, %v9400_v16 }
 0x325   : >> { %v2096_v48 = vpop.permute.xlu1 %2095  ;;  %v2092_v0 = vpop.permute.xlu0 %2091  ;;  %vm2526_vm14 = vcmp.eq.s32.totalorder %v9723_v26, %v9400_v16  ;;  %v3599_v28 = vrot.slane %v3598_v23, 2  ;;  %v3605_v31 = vadd.f32 %v3604_v49, %v3603_v46  ;;  %v8108_v4 = vadd.f32 %v3587_v18, %v3586_v39  ;;  %v9726_v39 = vld [vmem:[#allocation105_spill] sm:$0xff] }
 0x326   : >> { %9718 = vst [vmem:[#allocation12_spill] sm:$0xff] %v8091_v15  ;;  %vm2595_vm1 = vcmp.eq.s32.totalorder %v2096_v48, %v9400_v16  ;;  %4137 = vadd.xlane.f32.xlu0 %v4136_v44  ;;  %vm2594_vm6 = vcmp.eq.s32.totalorder %v2092_v0, %v9400_v16  ;;  %v3611_v45 = vrot.slane %v3610_v42, 4  ;;  %v5691_v27 = vsel %vm2525_vm0, 1.0, %v9488_v11  ;;  %v9725_v48 = vld [vmem:[#allocation36_spill] sm:$0xff]  ;;  %v9730_v15 = vld [vmem:[#allocation43_spill] sm:$0xff] }
 0x327   : >> { %v5761_v55 = vsel %vm2595_vm1, 1.0, %v9488_v11  ;;  %9724 = vst [vmem:[#allocation15_spill] sm:$0xff] %v8108_v4  ;;  %v5760_v53 = vsel %vm2594_vm6, 1.0, %v9488_v11  ;;  %v5690_v9 = vsel %vm2524_vm15, 1.0, %v9488_v11  ;;  %v5693_v20 = vsel %vm2527_vm11, 1.0, %v9488_v11 }
 0x328   : >> { %v5692_v19 = vsel %vm2526_vm14, 1.0, %v9488_v11  ;;  %v8115_v44 = vadd.f32 %v5761_v55, %v5760_v53  ;;  %vm2529_vm3 = vcmp.eq.s32.totalorder %v9725_v48, %v9400_v16  ;;  %vm2528_vm9 = vcmp.eq.s32.totalorder %v9726_v39, %v9400_v16 }
 0x329   : >> { %v2107_v46 = vpop.permute.xlu1 %2106  ;;  %v2103_v49 = vpop.permute.xlu0 %2102  ;;  %v3600_v0 = vadd.f32 %v3599_v28, %v3598_v23  ;;  %v3606_v18 = vrot.slane %v3605_v31, 2  ;;  %v3594_v26 = vrot.slane %v8095_v5, 1  ;;  %v3612_v55 = vadd.f32 %v3611_v45, %v3610_v42  ;;  %v9728_v42 = vld [vmem:[#allocation40_spill] sm:$0xff] }
 0x32a   : >> { %vm2597_vm2 = vcmp.eq.s32.totalorder %v2107_v46, %v9400_v16  ;;  %vm2596_vm8 = vcmp.eq.s32.totalorder %v2103_v49, %v9400_v16  ;;  %v3617_v53 = vadd.f32 %v5691_v27, %v5690_v9  ;;  %v3624_v48 = vadd.f32 %v5693_v20, %v5692_v19  ;;  %v9727_v49 = vld [vmem:[#allocation39_spill] sm:$0xff] }
 0x32b   : >> { %v5763_v63 = vsel %vm2597_vm2, 1.0, %v9488_v11  ;;  %v5762_v7 = vsel %vm2596_vm8, 1.0, %v9488_v11  ;;  %v5695_v41 = vsel %vm2529_vm3, 1.0, %v9488_v11  ;;  %v5694_v39 = vsel %vm2528_vm9, 1.0, %v9488_v11 }
 0x32c   : >> { %v8126_v4 = vadd.f32 %v5763_v63, %v5762_v7  ;;  %v8133_v23 = vsel %vm8043_vm4, %v8005_v37, 4294967295  ;;  %vm2531_vm5 = vcmp.eq.s32.totalorder %v9727_v49, %v9400_v16  ;;  %vm2530_vm7 = vcmp.eq.s32.totalorder %v9728_v42, %v9400_v16 }
 0x32d   : >> { %v2118_v28 = vpop.permute.xlu1 %2117  ;;  %v2114_v46 = vpop.permute.xlu0 %2113  ;;  %v3601_v45 = vrot.slane %v3600_v0, 1  ;;  %v8141_v27 = vadd.f32 %v3606_v18, %v3605_v31  ;;  %v3613_v14 = vrot.slane %v3612_v55, 2  ;;  %v3618_v20 = vrot.slane %v3617_v53, 4  ;;  %v9729_v18 = vld [vmem:[#allocation42_spill] sm:$0xff] }
 0x32e   : >> { %vm2599_vm13 = vcmp.eq.s32.totalorder %v2118_v28, %v9400_v16  ;;  %vm2598_vm10 = vcmp.eq.s32.totalorder %v2114_v46, %v9400_v16  ;;  %v2320_v63 = vrot.slane %v8133_v23, %v6555_v24  ;;  %v3625_v7 = vrot.slane %v3624_v48, 4  ;;  %v9731_v24 = vld [vmem:[#allocation46_spill] sm:$0xff] }
 0x32f   : >> { %v5765_v9 = vsel %vm2599_vm13, 1.0, %v9488_v11  ;;  %v5764_v37 = vsel %vm2598_vm10, 1.0, %v9488_v11  ;;  %v3631_v49 = vadd.f32 %v5695_v41, %v5694_v39  ;;  %v5697_v28 = vsel %vm2531_vm5, 1.0, %v9488_v11  ;;  %v9732_v41 = vld [vmem:[#allocation47_spill] sm:$0xff] }
 0x330   : >> { %v8145_v19 = vadd.f32 %v5765_v9, %v5764_v37  ;;  %v5696_v46 = vsel %vm2530_vm7, 1.0, %v9488_v11  ;;  %vm2533_vm4 = vcmp.eq.s32.totalorder %v9729_v18, %v9400_v16  ;;  %vm2532_vm12 = vcmp.eq.s32.totalorder %v9730_v15, %v9400_v16 }
 0x331   : >> { %v2129_v42 = vpop.permute.xlu1 %2128  ;;  %v2125_v31 = vpop.permute.xlu0 %2124  ;;  %vm2535_vm11 = vcmp.eq.s32.totalorder %v9731_v24, %v9400_v16  ;;  %vm2534_vm14 = vcmp.eq.s32.totalorder %v9732_v41, %v9400_v16  ;;  %v3614_v37 = vadd.f32 %v3613_v14, %v3612_v55  ;;  %v3619_v47 = vadd.f32 %v3618_v20, %v3617_v53 }
 0x332   : >> { %vm2601_vm0 = vcmp.eq.s32.totalorder %v2129_v42, %v9400_v16  ;;  %vm2600_vm15 = vcmp.eq.s32.totalorder %v2125_v31, %v9400_v16  ;;  %v2243_v15 = vrot.slane %v7719_v12, %v6567_v30  ;;  %v3632_v42 = vrot.slane %v3631_v49, 4 }
 0x333   : >> { %v5767_v39 = vsel %vm2601_vm0, 1.0, %v9488_v11  ;;  %v5766_v9 = vsel %vm2600_vm15, 1.0, %v9488_v11  ;;  %v3638_v31 = vadd.f32 %v5697_v28, %v5696_v46  ;;  %v5699_v38 = vsel %vm2533_vm4, 1.0, %v9488_v11 }
 0x334   : >> { %v8163_v18 = vadd.f32 %v5767_v39, %v5766_v9  ;;  %2322 = vbcast.lane.b32.xlu1 %v2320_v63, 256  ;;  %v5698_v33 = vsel %vm2532_vm12, 1.0, %v9488_v11  ;;  %v3626_v35 = vadd.f32 %v3625_v7, %v3624_v48  ;;  %v5701_v55 = vsel %vm2535_vm11, 1.0, %v9488_v11 }
 0x335   : >> { %v2140_v43 = vpop.permute.xlu1 %2139  ;;  %v2136_v52 = vpop.permute.xlu0 %2135  ;;  %v5700_v53 = vsel %vm2534_vm14, 1.0, %v9488_v11  ;;  %v8179_v14 = vadd.f32 %v3594_v26, %v8095_v5  ;;  %v8181_v20 = vadd.f32 %v3601_v45, %v3600_v0  ;;  %v3608_v48 = vrot.slane %v8141_v27, 1 }
 0x336   : >> { %vm2603_vm1 = vcmp.eq.s32.totalorder %v2140_v43, %v9400_v16  ;;  %vm2602_vm6 = vcmp.eq.s32.totalorder %v2136_v52, %v9400_v16  ;;  %v3620_v7 = vrot.slane %v3619_v47, 2  ;;  %v3645_v46 = vadd.f32 %v5699_v38, %v5698_v33  ;;  %v9735_v52 = vld [vmem:[#allocation48_spill] sm:$0xff]  ;;  %v9736_v38 = vld [vmem:[#allocation49_spill] sm:$0xff] }
 0x337   : >> { %9733 = vst [vmem:[#allocation20_spill] sm:$0xff] %v8179_v14  ;;  %9734 = vst [vmem:[#allocation21_spill] sm:$0xff] %v8181_v20  ;;  %v5769_v28 = vsel %vm2603_vm1, 1.0, %v9488_v11  ;;  %v5768_v24 = vsel %vm2602_vm6, 1.0, %v9488_v11  ;;  %v3633_v41 = vadd.f32 %v3632_v42, %v3631_v49  ;;  %v3639_v39 = vrot.slane %v3638_v31, 4 }
 0x338   : >> { %2245 = vbcast.lane.b32.xlu1 %v2243_v15, 256  ;;  %v3652_v9 = vadd.f32 %v5701_v55, %v5700_v53  ;;  %v8187_v43 = vadd.f32 %v5769_v28, %v5768_v24  ;;  %v3615_v0 = vrot.slane %v3614_v37, 1  ;;  %v3627_v45 = vrot.slane %v3626_v35, 2 }
 0x339   : >> { %v2151_v5 = vpop.permute.xlu1 %2150  ;;  %v2147_v26 = vpop.permute.xlu0 %2146  ;;  %vm2537_vm2 = vcmp.eq.s32.totalorder %v9735_v52, %v9400_v16  ;;  %vm2536_vm8 = vcmp.eq.s32.totalorder %v9736_v38, %v9400_v16  ;;  %v3621_v42 = vadd.f32 %v3620_v7, %v3619_v47  ;;  %v3646_v55 = vrot.slane %v3645_v46, 4 }
 0x33a   : >> { %vm2605_vm3 = vcmp.eq.s32.totalorder %v2151_v5, %v9400_v16  ;;  %vm2604_vm9 = vcmp.eq.s32.totalorder %v2147_v26, %v9400_v16  ;;  %v2331_v28 = vrot.slane %v8133_v23, %v6567_v30  ;;  %v8202_v24 = vadd.f32 %v3608_v48, %v8141_v27 }
 0x33b   : >> { %v5771_v33 = vsel %vm2605_vm3, 1.0, %v9488_v11  ;;  %v5770_v49 = vsel %vm2604_vm9, 1.0, %v9488_v11  ;;  %v3634_v5 = vrot.slane %v3633_v41, 2  ;;  %v3640_v26 = vadd.f32 %v3639_v39, %v3638_v31 }
 0x33c   : >> { %v8197_v53 = vadd.f32 %v5771_v33, %v5770_v49  ;;  %2326 = vbcast.lane.b32.xlu0 %v2320_v63, 264  ;;  %2249 = vbcast.lane.b32.xlu1 %v2243_v15, 264  ;;  %9737 = vst [vmem:[#allocation16_spill] sm:$0xff] %v8202_v24  ;;  %v3653_v20 = vrot.slane %v3652_v9, 4  ;;  %v5703_v47 = vsel %vm2537_vm2, 1.0, %v9488_v11  ;;  %v5702_v63 = vsel %vm2536_vm8, 1.0, %v9488_v11 }
 0x33d   : >> { %v2162_v14 = vpop.permute.xlu1 %2161  ;;  %v2158_v62 = vpop.permute.xlu0 %2157  ;;  %v8214_v30 = vadd.f32 %v3615_v0, %v3614_v37  ;;  %v3628_v27 = vadd.f32 %v3627_v45, %v3626_v35  ;;  %v3622_v48 = vrot.slane %v3621_v42, 1  ;;  %v3647_v7 = vadd.f32 %v3646_v55, %v3645_v46  ;;  %v9740_v35 = vld [vmem:[#allocation50_spill] sm:$0xff]  ;;  %v9741_v45 = vld [vmem:[#allocation51_spill] sm:$0xff]  ;;  %v9742_v46 = vld [vmem:[#allocation53_spill] sm:$0xff] }
 0x33e   : >> { %vm2607_vm5 = vcmp.eq.s32.totalorder %v2162_v14, %v9400_v16  ;;  %vm2606_vm7 = vcmp.eq.s32.totalorder %v2158_v62, %v9400_v16  ;;  %v2254_v52 = vrot.slane %v7719_v12, %v6570_v32  ;;  %v3635_v38 = vadd.f32 %v3634_v5, %v3633_v41  ;;  %v9743_v41 = vld [vmem:[#allocation54_spill] sm:$0xff] }
 0x33f   : >> { %9738 = vst [vmem:[#allocation17_spill] sm:$0xff] %v8214_v30  ;;  %v5773_v15 = vsel %vm2607_vm5, 1.0, %v9488_v11  ;;  %v5772_v31 = vsel %vm2606_vm7, 1.0, %v9488_v11  ;;  %v3641_v14 = vrot.slane %v3640_v26, 2  ;;  %v3654_v33 = vadd.f32 %v3653_v20, %v3652_v9 }
 0x340   : >> { %v8218_v39 = vadd.f32 %v5773_v15, %v5772_v31  ;;  %2337 = vbcast.lane.b32.xlu1 %v2331_v28, 264  ;;  %2333 = vbcast.lane.b32.xlu0 %v2331_v28, 256  ;;  %v3659_v62 = vadd.f32 %v5703_v47, %v5702_v63  ;;  %vm2539_vm13 = vcmp.eq.s32.totalorder %v9740_v35, %v9400_v16  ;;  %v3629_v49 = vrot.slane %v3628_v27, 1 }
 0x341   : >> { %v2173_v37 = vpop.permute.xlu1 %2172  ;;  %v2169_v0 = vpop.permute.xlu0 %2168  ;;  %vm2538_vm10 = vcmp.eq.s32.totalorder %v9741_v45, %v9400_v16  ;;  %vm2541_vm0 = vcmp.eq.s32.totalorder %v9742_v46, %v9400_v16  ;;  %vm2540_vm15 = vcmp.eq.s32.totalorder %v9743_v41, %v9400_v16  ;;  %v3648_v55 = vrot.slane %v3647_v7, 2 }
 0x342   : >> { %9739 = vst [vmem:[#allocation28_spill] sm:$0xff] %v8218_v39  ;;  %vm2609_vm4 = vcmp.eq.s32.totalorder %v2173_v37, %v9400_v16  ;;  %vm2608_vm12 = vcmp.eq.s32.totalorder %v2169_v0, %v9400_v16  ;;  %v2309_v5 = vrot.slane %v8133_v23, %v6557_v25  ;;  %v3636_v47 = vrot.slane %v3635_v38, 1 }
 0x343   : >> { %v5775_v20 = vsel %vm2609_vm4, 1.0, %v9488_v11  ;;  %v5774_v9 = vsel %vm2608_vm12, 1.0, %v9488_v11  ;;  %v3642_v63 = vadd.f32 %v3641_v14, %v3640_v26  ;;  %v3655_v15 = vrot.slane %v3654_v33, 2 }
 0x344   : >> { %v8234_v28 = vadd.f32 %v5775_v20, %v5774_v9  ;;  %2260 = vbcast.lane.b32.xlu1 %v2254_v52, 264  ;;  %2256 = vbcast.lane.b32.xlu0 %v2254_v52, 256  ;;  %v5705_v31 = vsel %vm2539_vm13, 1.0, %v9488_v11  ;;  %v5704_v20 = vsel %vm2538_vm10, 1.0, %v9488_v11  ;;  %v5707_v25 = vsel %vm2541_vm0, 1.0, %v9488_v11 }
 0x345   : >> { %v2184_v37 = vpop.permute.xlu1 %2183  ;;  %v2180_v0 = vpop.permute.xlu0 %2179  ;;  %v5706_v26 = vsel %vm2540_vm15, 1.0, %v9488_v11  ;;  %v8255_v52 = vadd.f32 %v3622_v48, %v3621_v42  ;;  %v3660_v14 = vrot.slane %v3659_v62, 4  ;;  %v8259_v45 = vadd.f32 %v3629_v49, %v3628_v27  ;;  %v9749_v49 = vld [vmem:[#allocation56_spill] sm:$0xff] }
 0x346   : >> { %9744 = vst [vmem:[#allocation45_spill] sm:$0xff] %v8234_v28  ;;  %vm2611_vm11 = vcmp.eq.s32.totalorder %v2184_v37, %v9400_v16  ;;  %vm2610_vm14 = vcmp.eq.s32.totalorder %v2180_v0, %v9400_v16  ;;  %v3649_v9 = vadd.f32 %v3648_v55, %v3647_v7  ;;  %v2342_v41 = vrot.slane %v8133_v23, %v6570_v32 }
 0x347   : >> { %9745 = vst [vmem:[#allocation23_spill] sm:$0xff] %v8255_v52  ;;  %v5777_v35 = vsel %vm2611_vm11, 1.0, %v9488_v11  ;;  %9746 = vst [vmem:[#allocation24_spill] sm:$0xff] %v8259_v45  ;;  %v5776_v46 = vsel %vm2610_vm14, 1.0, %v9488_v11  ;;  %v8264_v30 = vadd.f32 %v3636_v47, %v3635_v38  ;;  %v3666_v37 = vadd.f32 %v5705_v31, %v5704_v20 }
 0x348   : >> { %2315 = vbcast.lane.b32.xlu1 %v2309_v5, 264  ;;  %2311 = vbcast.lane.b32.xlu0 %v2309_v5, 256  ;;  %v3673_v42 = vadd.f32 %v5707_v25, %v5706_v26  ;;  %v8266_v48 = vadd.f32 %v5777_v35, %v5776_v46  ;;  %v3643_v60 = vrot.slane %v3642_v63, 1  ;;  %v3656_v0 = vadd.f32 %v3655_v15, %v3654_v33  ;;  %v9751_v5 = vld [vmem:[#allocation59_spill] sm:$0xff] }
 0x349   : >> { %9747 = vst [vmem:[#allocation62_spill] sm:$0xff] %v8264_v30  ;;  %v2195_v52 = vpop.permute.xlu1 %2194  ;;  %v2191_v24 = vpop.permute.xlu0 %2190  ;;  %v3661_v27 = vadd.f32 %v3660_v14, %v3659_v62  ;;  %vm2543_vm3 = vcmp.eq.s32.totalorder %v7529_v22, %v9400_v16  ;;  %v3650_v38 = vrot.slane %v3649_v9, 1  ;;  %vm2542_vm9 = vcmp.eq.s32.totalorder %v9749_v49, %v9400_v16 }
 0x34a   : >> { %9748 = vst [vmem:[#allocation79_spill] sm:$0xff] %v8266_v48  ;;  %vm2613_vm1 = vcmp.eq.s32.totalorder %v2195_v52, %v9400_v16  ;;  %vm2612_vm6 = vcmp.eq.s32.totalorder %v2191_v24, %v9400_v16  ;;  %v2265_v33 = vrot.slane %v7719_v12, %v6573_v34  ;;  %v3667_v24 = vrot.slane %v3666_v37, 4 }
 0x34b   : >> { %v5779_v32 = vsel %vm2613_vm1, 1.0, %v9488_v11  ;;  %v5778_v7 = vsel %vm2612_vm6, 1.0, %v9488_v11  ;;  %v3674_v62 = vrot.slane %v3673_v42, 4  ;;  %vm2545_vm2 = vcmp.eq.s32.totalorder %v7549_v21, %v9400_v16 }
 0x34c   : >> { %v8276_v55 = vadd.f32 %v5779_v32, %v5778_v7  ;;  %2348 = vbcast.lane.b32.xlu1 %v2342_v41, 264  ;;  %2344 = vbcast.lane.b32.xlu0 %v2342_v41, 256  ;;  %vm2544_vm8 = vcmp.eq.s32.totalorder %v9751_v5, %v9400_v16  ;;  %v8284_v31 = vadd.f32 %v3643_v60, %v3642_v63  ;;  %v3657_v20 = vrot.slane %v3656_v0, 1 }
 0x34d   : >> { %v2206_v47 = vpop.permute.xlu1 %2205  ;;  %v2202_v15 = vpop.permute.xlu0 %2201  ;;  %v5709_v25 = vsel %vm2543_vm3, 1.0, %v9488_v11  ;;  %v5708_v21 = vsel %vm2542_vm9, 1.0, %v9488_v11  ;;  %v5711_v63 = vsel %vm2545_vm2, 1.0, %v9488_v11  ;;  %v5710_v52 = vsel %vm2544_vm8, 1.0, %v9488_v11 }
 0x34e   : >> { %9750 = vst [vmem:[#allocation99_spill] sm:$0xff] %v8276_v55  ;;  %9752 = vst [vmem:[#allocation93_spill] sm:$0xff] %v8284_v31  ;;  %vm2615_vm5 = vcmp.eq.s32.totalorder %v2206_v47, %v9400_v16  ;;  %vm2614_vm7 = vcmp.eq.s32.totalorder %v2202_v15, %v9400_v16  ;;  %v2353_v22 = vrot.slane %v8133_v23, %v6573_v34  ;;  %v3662_v46 = vrot.slane %v3661_v27, 2  ;;  %v9772_v31 = vld [vmem:[#allocation11_spill] sm:$0xff] }
 0x34f   : >> { %v5781_v26 = vsel %vm2615_vm5, 1.0, %v9488_v11  ;;  %v5780_v60 = vsel %vm2614_vm7, 1.0, %v9488_v11  ;;  %v8304_v35 = vadd.f32 %v3650_v38, %v3649_v9  ;;  %v8306_v41 = vadd.f32 %v3667_v24, %v3666_v37 }
 0x350   : >> { %v8300_v14 = vadd.f32 %v5781_v26, %v5780_v60  ;;  %2271 = vbcast.lane.b32.xlu1 %v2265_v33, 264  ;;  %2267 = vbcast.lane.b32.xlu0 %v2265_v33, 256  ;;  %v8308_v32 = vadd.f32 %v3674_v62, %v3673_v42  ;;  %vm2547_vm13 = vcmp.eq.s32.totalorder %v7567_v8, %v9400_v16 }
 0x351   : >> { %9754 = vst [vmem:[#allocation31_spill] sm:$0xff] %v8304_v35  ;;  %v2217_v7 = vpop.permute.xlu1 %2216  ;;  %v2213_v49 = vpop.permute.xlu0 %2212  ;;  %vm2546_vm10 = vcmp.eq.s32.totalorder %v7569_v54, %v9400_v16  ;;  %v3680_v34 = vadd.f32 %v5709_v25, %v5708_v21  ;;  %v3687_v9 = vadd.f32 %v5711_v63, %v5710_v52  ;;  %v8318_v42 = vadd.f32 %v3657_v20, %v3656_v0  ;;  %v9757_v63 = vld [vmem:[#allocation63_spill] sm:$0xff]  ;;  %v9758_v52 = vld [vmem:[#allocation64_spill] sm:$0xff] }
 0x352   : >> { %9753 = vst [vmem:[#allocation100_spill] sm:$0xff] %v8300_v14  ;;  %vm2617_vm4 = vcmp.eq.s32.totalorder %v2217_v7, %v9400_v16  ;;  %vm2616_vm12 = vcmp.eq.s32.totalorder %v2213_v49, %v9400_v16  ;;  %v2276_v8 = vrot.slane %v7719_v12, %v6576_v36  ;;  %v8324_v54 = vadd.f32 %v3662_v46, %v3661_v27  ;;  %v9760_v49 = vld [vmem:[#allocation65_spill] sm:$0xff] }
 0x353   : >> { %v5783_v38 = vsel %vm2617_vm4, 1.0, %v9488_v11  ;;  %v5782_v37 = vsel %vm2616_vm12, 1.0, %v9488_v11  ;;  %9755 = vst [vmem:[#allocation55_spill] sm:$0xff] %v8318_v42  ;;  %v5713_v24 = vsel %vm2547_vm13, 1.0, %v9488_v11  ;;  %v5712_v62 = vsel %vm2546_vm10, 1.0, %v9488_v11 }
 0x354   : >> { %v8320_v33 = vadd.f32 %v5783_v38, %v5782_v37  ;;  %2359 = vbcast.lane.b32.xlu1 %v2353_v22, 264  ;;  %2355 = vbcast.lane.b32.xlu0 %v2353_v22, 256  ;;  %vm2549_vm0 = vcmp.eq.s32.totalorder %v7595_v61, %v9400_v16  ;;  %v3669_v0 = vrot.slane %v8306_v41, 2  ;;  %v3676_v15 = vrot.slane %v8308_v32, 2  ;;  %v9761_v38 = vld [vmem:[#allocation66_spill] sm:$0xff] }
 0x355   : >> { %v2228_v5 = vpop.permute.xlu1 %2227  ;;  %v2224_v47 = vpop.permute.xlu0 %2223  ;;  %vm2548_vm15 = vcmp.eq.s32.totalorder %v7597_v40, %v9400_v16  ;;  %v3681_v27 = vrot.slane %v3680_v34, 4  ;;  %v3688_v20 = vrot.slane %v3687_v9, 4  ;;  %v8337_v21 = vadd.f32 %v5713_v24, %v5712_v62 }
 0x356   : >> { %9756 = vst [vmem:[#allocation101_spill] sm:$0xff] %v8320_v33  ;;  %vm2619_vm11 = vcmp.eq.s32.totalorder %v2228_v5, %v9400_v16  ;;  %vm2618_vm14 = vcmp.eq.s32.totalorder %v2224_v47, %v9400_v16  ;;  %v5715_v61 = vsel %vm2549_vm0, 1.0, %v9488_v11  ;;  %v2364_v60 = vrot.slane %v8133_v23, %v6576_v36 }
 0x357   : >> { %v5785_v25 = vsel %vm2619_vm11, 1.0, %v9488_v11  ;;  %v5784_v26 = vsel %vm2618_vm14, 1.0, %v9488_v11  ;;  %v5714_v40 = vsel %vm2548_vm15, 1.0, %v9488_v11  ;;  %vm2551_vm1 = vcmp.eq.s32.totalorder %v9757_v63, %v9400_v16  ;;  %v9767_v63 = vld [vmem:[#allocation75_spill] sm:$0xff] }
 0x358   : >> { %2282 = vbcast.lane.b32.xlu1 %v2276_v8, 264  ;;  %2278 = vbcast.lane.b32.xlu0 %v2276_v8, 256  ;;  %vm2550_vm6 = vcmp.eq.s32.totalorder %v9758_v52, %v9400_v16  ;;  %v8348_v22 = vadd.f32 %v5785_v25, %v5784_v26  ;;  %vm2553_vm3 = vcmp.eq.s32.totalorder %v9760_v49, %v9400_v16  ;;  %v3695_v62 = vrot.slane %v8337_v21, 4  ;;  %v9763_v25 = vld [vmem:[#allocation10_spill] sm:$0xff]  ;;  %v9768_v52 = vld [vmem:[#allocation76_spill] sm:$0xff] }
 0x359   : >> { %v2239_v46 = vpop.permute.xlu1 %2238  ;;  %v2235_v7 = vpop.permute.xlu0 %2234  ;;  %vm2552_vm9 = vcmp.eq.s32.totalorder %v9761_v38, %v9400_v16  ;;  %v8356_v36 = vadd.f32 %v3681_v27, %v3680_v34  ;;  %v8358_v37 = vadd.f32 %v3688_v20, %v3687_v9  ;;  %v3701_v5 = vadd.f32 %v5715_v61, %v5714_v40  ;;  %v9764_v61 = vld [vmem:[#allocation69_spill] sm:$0xff]  ;;  %v9766_v40 = vld [vmem:[#allocation74_spill] sm:$0xff]  ;;  %v9771_v49 = vld [vmem:[#allocation80_spill] sm:$0xff] }
 0x35a   : >> { %9759 = vst [vmem:[#allocation102_spill] sm:$0xff] %v8348_v22  ;;  %vm2621_vm2 = vcmp.eq.s32.totalorder %v2239_v46, %v9400_v16  ;;  %vm2620_vm8 = vcmp.eq.s32.totalorder %v2235_v7, %v9400_v16  ;;  %v2287_v26 = vrot.slane %v7719_v12, %v9763_v25  ;;  %v5717_v34 = vsel %vm2551_vm1, 1.0, %v9488_v11  ;;  %v9769_v46 = vld [vmem:[#allocation77_spill] sm:$0xff]  ;;  %v9770_v7 = vld [vmem:[#allocation78_spill] sm:$0xff] }
 0x35b   : >> { %v5787_v8 = vsel %vm2621_vm2, 1.0, %v9488_v11  ;;  %v5786_v24 = vsel %vm2620_vm8, 1.0, %v9488_v11  ;;  %v5716_v9 = vsel %vm2550_vm6, 1.0, %v9488_v11  ;;  %v5719_v27 = vsel %vm2553_vm3, 1.0, %v9488_v11 }
 0x35c   : >> { %v8363_v47 = vadd.f32 %v5787_v8, %v5786_v24  ;;  %2370 = vbcast.lane.b32.xlu1 %v2364_v60, 264  ;;  %2366 = vbcast.lane.b32.xlu0 %v2364_v60, 256  ;;  %v5718_v20 = vsel %vm2552_vm9, 1.0, %v9488_v11  ;;  %vm2555_vm5 = vcmp.eq.s32.totalorder %v9764_v61, %v9400_v16  ;;  %v9765_v60 = vld [vmem:[#allocation70_spill] sm:$0xff]  ;;  %vm2557_vm13 = vcmp.eq.s32.totalorder %v9766_v40, %v9400_v16 }
 0x35d   : >> { %vm2554_vm7 = vcmp.eq.s32.totalorder %v9765_v60, %v9400_v16  ;;  %vm2556_vm10 = vcmp.eq.s32.totalorder %v9767_v63, %v9400_v16  ;;  %vm2559_vm4 = vcmp.eq.s32.totalorder %v9768_v52, %v9400_v16  ;;  %vm2558_vm12 = vcmp.eq.s32.totalorder %v9769_v46, %v9400_v16 }
 0x35e   : >> { %9762 = vst [vmem:[#allocation29_spill] sm:$0xff] %v8363_v47  ;;  %vm2561_vm0 = vcmp.eq.s32.totalorder %v9770_v7, %v9400_v16  ;;  %vm2560_vm15 = vcmp.eq.s32.totalorder %v9771_v49, %v9400_v16  ;;  %v3702_v38 = vrot.slane %v3701_v5, 4  ;;  %v3708_v8 = vadd.f32 %v5717_v34, %v5716_v9 }
 0x35f   : >> { %v3715_v24 = vadd.f32 %v5719_v27, %v5718_v20  ;;  %v2375_v61 = vrot.slane %v8133_v23, %v9763_v25  ;;  %v5721_v60 = vsel %vm2555_vm5, 1.0, %v9488_v11  ;;  %v5720_v40 = vsel %vm2554_vm7, 1.0, %v9488_v11 }
 0x360   : >> { %2293 = vbcast.lane.b32.xlu1 %v2287_v26, 264  ;;  %2289 = vbcast.lane.b32.xlu0 %v2287_v26, 256  ;;  %v5723_v63 = vsel %vm2557_vm13, 1.0, %v9488_v11  ;;  %v5722_v52 = vsel %vm2556_vm10, 1.0, %v9488_v11  ;;  %v5725_v46 = vsel %vm2559_vm4, 1.0, %v9488_v11  ;;  %v5724_v7 = vsel %vm2558_vm12, 1.0, %v9488_v11 }
 0x361   : >> { %v5727_v34 = vsel %vm2561_vm0, 1.0, %v9488_v11  ;;  %v5726_v9 = vsel %vm2560_vm15, 1.0, %v9488_v11  ;;  %v3664_v26 = vrot.slane %v8324_v54, 1  ;;  %v3670_v25 = vadd.f32 %v3669_v0, %v8306_v41  ;;  %v9774_v0 = vld [vmem:[#allocation82_spill] sm:$0xff] }
 0x362   : >> { %v3677_v27 = vadd.f32 %v3676_v15, %v8308_v32  ;;  %v3683_v20 = vrot.slane %v8356_v36, 2  ;;  %v3709_v49 = vrot.slane %v3708_v8, 4  ;;  %v3722_v42 = vadd.f32 %v5721_v60, %v5720_v40  ;;  %v9773_v32 = vld [vmem:[#allocation81_spill] sm:$0xff]  ;;  %v9775_v15 = vld [vmem:[#allocation111_spill] sm:$0xff] }
 0x363   : >> { %v3729_v35 = vadd.f32 %v5723_v63, %v5722_v52  ;;  %v2298_v30 = vrot.slane %v7719_v12, %v9772_v31  ;;  %v3690_v45 = vrot.slane %v8358_v37, 2  ;;  %v3696_v1 = vadd.f32 %v3695_v62, %v8337_v21  ;;  %v9777_v12 = vld [vmem:[#allocation86_spill] sm:$0xff]  ;;  %v9778_v21 = vld [vmem:[#allocation113_spill] sm:$0xff] }
 0x364   : >> { %2381 = vbcast.lane.b32.xlu1 %v2375_v61, 264  ;;  %2377 = vbcast.lane.b32.xlu0 %v2375_v61, 256  ;;  %v3736_v47 = vadd.f32 %v5725_v46, %v5724_v7  ;;  %v3743_v22 = vadd.f32 %v5727_v34, %v5726_v9  ;;  %v3703_v33 = vadd.f32 %v3702_v38, %v3701_v5  ;;  %v3716_v41 = vrot.slane %v3715_v24, 4  ;;  %v9776_v61 = vld [vmem:[#allocation112_spill] sm:$0xff] }
 0x365   : >> { %vm2563_vm11 = vcmp.eq.s32.totalorder %v9773_v32, %v9400_v16  ;;  %vm2562_vm14 = vcmp.eq.s32.totalorder %v9774_v0, %v9400_v16  ;;  %vm2565_vm1 = vcmp.eq.s32.totalorder %v9775_v15, %v9400_v16  ;;  %vm2564_vm6 = vcmp.eq.s32.totalorder %v9776_v61, %v9400_v16 }
 0x366   : >> { %vm2567_vm3 = vcmp.eq.s32.totalorder %v9777_v12, %v9400_v16  ;;  %vm2566_vm9 = vcmp.eq.s32.totalorder %v9778_v21, %v9400_v16  ;;  %v3710_v62 = vadd.f32 %v3709_v49, %v3708_v8  ;;  %v3723_v5 = vrot.slane %v3722_v42, 4 }
 0x367   : >> { %v3730_v38 = vrot.slane %v3729_v35, 4  ;;  %v2386_v60 = vrot.slane %v8133_v23, %v9772_v31  ;;  %v3737_v40 = vrot.slane %v3736_v47, 4  ;;  %v3744_v63 = vrot.slane %v3743_v22, 4 }
 0x368   : >> { %2304 = vbcast.lane.b32.xlu1 %v2298_v30, 264  ;;  %2300 = vbcast.lane.b32.xlu0 %v2298_v30, 256  ;;  %v5729_v52 = vsel %vm2563_vm11, 1.0, %v9488_v11  ;;  %v5728_v46 = vsel %vm2562_vm14, 1.0, %v9488_v11  ;;  %v5731_v7 = vsel %vm2565_vm1, 1.0, %v9488_v11  ;;  %v5730_v34 = vsel %vm2564_vm6, 1.0, %v9488_v11 }
 0x369   : >> { %v5733_v9 = vsel %vm2567_vm3, 1.0, %v9488_v11  ;;  %v5732_v8 = vsel %vm2566_vm9, 1.0, %v9488_v11  ;;  %v3671_v49 = vrot.slane %v3670_v25, 1  ;;  %v3678_v32 = vrot.slane %v3677_v27, 1 }
 0x36a   : >> { %v3684_v30 = vadd.f32 %v3683_v20, %v8356_v36  ;;  %v3717_v0 = vadd.f32 %v3716_v41, %v3715_v24  ;;  %v3691_v23 = vadd.f32 %v3690_v45, %v8358_v37  ;;  %v3697_v31 = vrot.slane %v3696_v1, 2 }
 0x36b   : >> { %v3704_v15 = vrot.slane %v3703_v33, 2  ;;  %v3750_v61 = vadd.f32 %v5729_v52, %v5728_v46  ;;  %v3724_v12 = vadd.f32 %v3723_v5, %v3722_v42  ;;  %v3731_v21 = vadd.f32 %v3730_v38, %v3729_v35 }
 0x36c   : >> { %2392 = vbcast.lane.b32.xlu1 %v2386_v60, 264  ;;  %2388 = vbcast.lane.b32.xlu0 %v2386_v60, 256  ;;  %v3757_v16 = vadd.f32 %v5731_v7, %v5730_v34  ;;  %v3764_v14 = vadd.f32 %v5733_v9, %v5732_v8  ;;  %v8440_v55 = vadd.f32 %v3664_v26, %v8324_v54  ;;  %v3711_v11 = vrot.slane %v3710_v62, 2 }
 0x36d   : >> { %v3738_v48 = vadd.f32 %v3737_v40, %v3736_v47  ;;  %v3745_v28 = vadd.f32 %v3744_v63, %v3743_v22  ;;  %v8442_v39 = vadd.f32 %v3671_v49, %v3670_v25  ;;  %v8444_v36 = vadd.f32 %v3678_v32, %v3677_v27 }
 0x36e   : >> { %v3685_v45 = vrot.slane %v3684_v30, 1  ;;  %v3718_v37 = vrot.slane %v3717_v0, 2  ;;  %v3692_v24 = vrot.slane %v3691_v23, 1  ;;  %v3698_v20 = vadd.f32 %v3697_v31, %v3696_v1 }
 0x36f   : >> { %v3705_v41 = vadd.f32 %v3704_v15, %v3703_v33  ;;  %v3751_v60 = vrot.slane %v3750_v61, 4  ;;  %v3725_v42 = vrot.slane %v3724_v12, 2  ;;  %v3732_v35 = vrot.slane %v3731_v21, 2 }
 0x370   : >> { %v3758_v5 = vrot.slane %v3757_v16, 4  ;;  %v3765_v38 = vrot.slane %v3764_v14, 4  ;;  %v3712_v52 = vadd.f32 %v3711_v11, %v3710_v62  ;;  %v3739_v54 = vrot.slane %v3738_v48, 2 }
 0x371   : >> { %v3746_v26 = vrot.slane %v3745_v28, 2  ;;  %v3772_v47 = vrot.slane %v7814_v6, 4  ;;  %v8447_v22 = vadd.f32 %v3685_v45, %v3684_v30  ;;  %v3719_v25 = vadd.f32 %v3718_v37, %v3717_v0 }
 0x372   : >> { %v3779_v27 = vrot.slane %v7830_v29, 4  ;;  %v3786_v40 = vrot.slane %v7844_v56, 4  ;;  %v8451_v63 = vadd.f32 %v3692_v24, %v3691_v23  ;;  %v3699_v1 = vrot.slane %v3698_v20, 1 }
 0x373   : >> { %v3706_v33 = vrot.slane %v3705_v41, 1  ;;  %v3752_v46 = vadd.f32 %v3751_v60, %v3750_v61  ;;  %v3726_v7 = vadd.f32 %v3725_v42, %v3724_v12  ;;  %v3733_v34 = vadd.f32 %v3732_v35, %v3731_v21 }
 0x374   : >> { %v3759_v11 = vadd.f32 %v3758_v5, %v3757_v16  ;;  %v3766_v62 = vadd.f32 %v3765_v38, %v3764_v14  ;;  %v3713_v9 = vrot.slane %v3712_v52, 1  ;;  %v3740_v8 = vadd.f32 %v3739_v54, %v3738_v48 }
 0x375   : >> { %v3747_v49 = vadd.f32 %v3746_v26, %v3745_v28  ;;  %v3773_v32 = vadd.f32 %v3772_v47, %v7814_v6  ;;  %v3720_v30 = vrot.slane %v3719_v25, 1  ;;  %v3780_v0 = vadd.f32 %v3779_v27, %v7830_v29 }
 0x376   : >> { %v3787_v31 = vadd.f32 %v3786_v40, %v7844_v56  ;;  %v3793_v23 = vrot.slane %v7858_v51, 4  ;;  %v8458_v15 = vadd.f32 %v3699_v1, %v3698_v20  ;;  %v8460_v61 = vadd.f32 %v3706_v33, %v3705_v41 }
 0x377   : >> { %v3753_v16 = vrot.slane %v3752_v46, 2  ;;  %v3800_v14 = vrot.slane %v7880_v13, 4  ;;  %v3727_v48 = vrot.slane %v3726_v7, 1  ;;  %v3734_v28 = vrot.slane %v3733_v34, 1 }
 0x378   : >> { %v3760_v12 = vrot.slane %v3759_v11, 2  ;;  %v3767_v6 = vrot.slane %v3766_v62, 2  ;;  %v8463_v21 = vadd.f32 %v3713_v9, %v3712_v52  ;;  %v3741_v29 = vrot.slane %v3740_v8, 1 }
 0x379   : >> { %v3748_v45 = vrot.slane %v3747_v49, 1  ;;  %v3774_v56 = vrot.slane %v3773_v32, 2  ;;  %v8465_v37 = vadd.f32 %v3720_v30, %v3719_v25  ;;  %v3781_v24 = vrot.slane %v3780_v0, 2 }
 0x37a   : >> { %v3788_v20 = vrot.slane %v3787_v31, 2  ;;  %v3794_v60 = vadd.f32 %v3793_v23, %v7858_v51  ;;  %v3754_v41 = vadd.f32 %v3753_v16, %v3752_v46  ;;  %v3801_v42 = vadd.f32 %v3800_v14, %v7880_v13 }
 0x37b   : >> { %v3807_v35 = vrot.slane %v7914_v17, 4  ;;  %v3814_v5 = vrot.slane %v7930_v50, 4  ;;  %v8473_v38 = vadd.f32 %v3727_v48, %v3726_v7  ;;  %v8475_v52 = vadd.f32 %v3734_v28, %v3733_v34 }
 0x37c   : >> { %v3761_v54 = vadd.f32 %v3760_v12, %v3759_v11  ;;  %v3768_v26 = vadd.f32 %v3767_v6, %v3766_v62  ;;  %v8477_v47 = vadd.f32 %v3741_v29, %v3740_v8  ;;  %v8479_v25 = vadd.f32 %v3748_v45, %v3747_v49 }
 0x37d   : >> { %v3775_v51 = vadd.f32 %v3774_v56, %v3773_v32  ;;  %v3821_v27 = vrot.slane %v7957_v2, 4  ;;  %v3782_v40 = vadd.f32 %v3781_v24, %v3780_v0  ;;  %v3789_v1 = vadd.f32 %v3788_v20, %v3787_v31 }
 0x37e   : >> { %v3795_v13 = vrot.slane %v3794_v60, 2  ;;  %v8482_v33 = vstv %s4156_s4  ;;  %v3755_v46 = vrot.slane %v3754_v41, 1  ;;  %v3802_v9 = vrot.slane %v3801_v42, 2 }
 0x37f   : >> { %v3808_v7 = vadd.f32 %v3807_v35, %v7914_v17  ;;  %v3815_v34 = vadd.f32 %v3814_v5, %v7930_v50  ;;  %v3762_v11 = vrot.slane %v3761_v54, 1  ;;  %v3769_v62 = vrot.slane %v3768_v26, 1 }
 0x380   : >> { %v3828_v8 = vrot.slane %v7980_v59, 4  ;;  %v3835_v49 = vrot.slane %v8016_v3, 4  ;;  %v3776_v32 = vrot.slane %v3775_v51, 1  ;;  %v3822_v30 = vadd.f32 %v3821_v27, %v7957_v2 }
 0x381   : >> { %v3842_v0 = vrot.slane %v8030_v58, 4  ;;  %v3849_v31 = vrot.slane %v8057_v10, 4  ;;  %v3783_v23 = vrot.slane %v3782_v40, 1  ;;  %v3790_v16 = vrot.slane %v3789_v1, 1 }
 0x382   : >> { %v3796_v14 = vadd.f32 %v3795_v13, %v3794_v60  ;;  %v3856_v17 = vrot.slane %v8086_v57, 4  ;;  %v8492_v48 = vadd.f32 %v3755_v46, %v3754_v41  ;;  %v3803_v50 = vadd.f32 %v3802_v9, %v3801_v42 }
 0x383   : >> { %v3809_v28 = vrot.slane %v3808_v7, 2  ;;  %v3816_v12 = vrot.slane %v3815_v34, 2  ;;  %v8494_v6 = vadd.f32 %v3762_v11, %v3761_v54  ;;  %v8496_v29 = vadd.f32 %v3769_v62, %v3768_v26 }
 0x384   : >> { %v3829_v2 = vadd.f32 %v3828_v8, %v7980_v59  ;;  %v3836_v45 = vadd.f32 %v3835_v49, %v8016_v3  ;;  %v8500_v56 = vadd.f32 %v3776_v32, %v3775_v51  ;;  %v3823_v24 = vrot.slane %v3822_v30, 2 }
 0x385   : >> { %v3843_v20 = vadd.f32 %v3842_v0, %v8030_v58  ;;  %v3850_v60 = vadd.f32 %v3849_v31, %v8057_v10  ;;  %v8504_v41 = vadd.f32 %v3783_v23, %v3782_v40  ;;  %v8506_v42 = vadd.f32 %v3790_v16, %v3789_v1 }
 0x386   : >> { %v3797_v35 = vrot.slane %v3796_v14, 1  ;;  %v3857_v5 = vadd.f32 %v3856_v17, %v8086_v57  ;;  %v3804_v54 = vrot.slane %v3803_v50, 1  ;;  %v3810_v26 = vadd.f32 %v3809_v28, %v3808_v7 }
 0x387   : >> { %9779 = vst [vmem:[#allocation30_spill] sm:$0xff] %v8504_v41  ;;  %v3817_v27 = vadd.f32 %v3816_v12, %v3815_v34  ;;  %v3863_v59 = vrot.slane %v8115_v44, 4  ;;  %v3830_v3 = vrot.slane %v3829_v2, 2  ;;  %v3837_v51 = vrot.slane %v3836_v45, 2 }
 0x388   : >> { %v3870_v13 = vrot.slane %v8126_v4, 4  ;;  %v3877_v58 = vrot.slane %v8145_v19, 4  ;;  %v3824_v46 = vadd.f32 %v3823_v24, %v3822_v30  ;;  %v3844_v10 = vrot.slane %v3843_v20, 2  ;;  %v9782_v24 = vld [vmem:[#allocation28_spill] sm:$0xff] }
 0x389   : >> { %v3851_v40 = vrot.slane %v3850_v60, 2  ;;  %v3884_v1 = vrot.slane %v8163_v18, 4  ;;  %v8513_v9 = vadd.f32 %v3797_v35, %v3796_v14  ;;  %v3858_v11 = vrot.slane %v3857_v5, 2 }
 0x38a   : >> { %v3891_v57 = vrot.slane %v8187_v43, 4  ;;  %v3898_v7 = vrot.slane %v8197_v53, 4  ;;  %v8517_v34 = vadd.f32 %v3804_v54, %v3803_v50  ;;  %v3811_v62 = vrot.slane %v3810_v26, 1 }
 0x38b   : >> { %9780 = vst [vmem:[#allocation34_spill] sm:$0xff] %v8513_v9  ;;  %v3818_v8 = vrot.slane %v3817_v27, 1  ;;  %v3864_v49 = vadd.f32 %v3863_v59, %v8115_v44  ;;  %v3831_v32 = vadd.f32 %v3830_v3, %v3829_v2  ;;  %v3838_v0 = vadd.f32 %v3837_v51, %v3836_v45 }
 0x38c   : >> { %9781 = vst [vmem:[#allocation103_spill] sm:$0xff] %v8517_v34  ;;  %v3871_v30 = vadd.f32 %v3870_v13, %v8126_v4  ;;  %v3878_v31 = vadd.f32 %v3877_v58, %v8145_v19  ;;  %v3825_v23 = vrot.slane %v3824_v46, 1  ;;  %v3845_v16 = vadd.f32 %v3844_v10, %v3843_v20  ;;  %v9785_v4 = vld [vmem:[#allocation45_spill] sm:$0xff]  ;;  %v9818_v34 = vld [vmem:[#allocation38_spill] sm:$0xff] }
 0x38d   : >> { %v3852_v14 = vadd.f32 %v3851_v40, %v3850_v60  ;;  %v3885_v17 = vadd.f32 %v3884_v1, %v8163_v18  ;;  %v3859_v28 = vadd.f32 %v3858_v11, %v3857_v5  ;;  %v3892_v12 = vadd.f32 %v3891_v57, %v8187_v43  ;;  %v9787_v40 = vld [vmem:[#allocation79_spill] sm:$0xff] }
 0x38e   : >> { %v3899_v50 = vadd.f32 %v3898_v7, %v8197_v53  ;;  %v3905_v35 = vrot.slane %v9782_v24, 4  ;;  %v8526_v54 = vadd.f32 %v3811_v62, %v3810_v26  ;;  %v8528_v44 = vadd.f32 %v3818_v8, %v3817_v27 }
 0x38f   : >> { %v3865_v2 = vrot.slane %v3864_v49, 2  ;;  %v3912_v45 = vrot.slane %v9785_v4, 4  ;;  %v3832_v19 = vrot.slane %v3831_v32, 1  ;;  %v3839_v59 = vrot.slane %v3838_v0, 1 }
 0x390   : >> { %9783 = vst [vmem:[#allocation36_spill] sm:$0xff] %v8526_v54  ;;  %9784 = vst [vmem:[#allocation105_spill] sm:$0xff] %v8528_v44  ;;  %v3872_v20 = vrot.slane %v3871_v30, 2  ;;  %v3879_v60 = vrot.slane %v3878_v31, 2  ;;  %v8531_v3 = vadd.f32 %v3825_v23, %v3824_v46  ;;  %v3846_v18 = vrot.slane %v3845_v16, 1  ;;  %v4157_v44 = vld [vmem:[#allocation2] sm:$0xff] }
 0x391   : >> { %v3853_v5 = vrot.slane %v3852_v14, 1  ;;  %v3886_v43 = vrot.slane %v3885_v17, 2  ;;  %v3860_v51 = vrot.slane %v3859_v28, 1  ;;  %v3893_v53 = vrot.slane %v3892_v12, 2 }
 0x392   : >> { %9786 = vst [vmem:[#allocation39_spill] sm:$0xff] %v8531_v3  ;;  %v3900_v13 = vrot.slane %v3899_v50, 2  ;;  %v3906_v26 = vadd.f32 %v3905_v35, %v9782_v24  ;;  %v3866_v27 = vadd.f32 %v3865_v2, %v3864_v49  ;;  %v3913_v10 = vadd.f32 %v3912_v45, %v9785_v4 }
 0x393   : >> { %v4093_v58 = vpop.xlane.xlu0 %4092  ;;  %v3919_v1 = vrot.slane %v9787_v40, 4  ;;  %v8536_v57 = vadd.f32 %v3832_v19, %v3831_v32  ;;  %v8538_v7 = vadd.f32 %v3839_v59, %v3838_v0  ;;  %v3873_v46 = vadd.f32 %v3872_v20, %v3871_v30 }
 0x394   : >> { %v4139_v11 = vadd.f32 1e-12, %v4093_v58  ;;  %v3880_v62 = vadd.f32 %v3879_v60, %v3878_v31  ;;  %v8540_v8 = vadd.f32 %v3846_v18, %v3845_v16  ;;  %v8542_v23 = vadd.f32 %v3853_v5, %v3852_v14  ;;  %v9793_v16 = vld [vmem:[#allocation99_spill] sm:$0xff]  ;;  %v9794_v14 = vld [vmem:[#allocation100_spill] sm:$0xff]  ;;  %v9795_v60 = vld [vmem:[#allocation101_spill] sm:$0xff] }
 0x395   : >> { %9788 = vst [vmem:[#allocation40_spill] sm:$0xff] %v8536_v57  ;;  %9789 = vst [vmem:[#allocation42_spill] sm:$0xff] %v8538_v7  ;;  %v3887_v41 = vadd.f32 %v3886_v43, %v3885_v17  ;;  %v8544_v24 = vadd.f32 %v3860_v51, %v3859_v28  ;;  %v3894_v49 = vadd.f32 %v3893_v53, %v3892_v12  ;;  %v3907_v2 = vrot.slane %v3906_v26, 2  ;;  %v9796_v18 = vld [vmem:[#allocation102_spill] sm:$0xff]  ;;  %v9816_v57 = vld [vmem:[#allocation35_spill] sm:$0xff] }
 0x396   : >> { %9790 = vst [vmem:[#allocation43_spill] sm:$0xff] %v8540_v8  ;;  %9791 = vst [vmem:[#allocation46_spill] sm:$0xff] %v8542_v23  ;;  %5966 = vrcp.f32 %v4139_v11  ;;  %v3901_v35 = vadd.f32 %v3900_v13, %v3899_v50  ;;  %v3867_v45 = vrot.slane %v3866_v27, 1  ;;  %v3914_v58 = vrot.slane %v3913_v10, 2 }
 0x397   : >> { %9792 = vst [vmem:[#allocation47_spill] sm:$0xff] %v8544_v24  ;;  %v4099_v4 = vpop.xlane.xlu0 %4098  ;;  %v3920_v32 = vadd.f32 %v3919_v1, %v9787_v40  ;;  %v3874_v30 = vrot.slane %v3873_v46, 1  ;;  %v3881_v31 = vrot.slane %v3880_v62, 1  ;;  %v3926_v59 = vrot.slane %v9793_v16, 4 }
 0x398   : >> { %v4141_v0 = vadd.f32 1e-12, %v4099_v4  ;;  %v4096_v19 = vpop.xlane.xlu1 %4095  ;;  %v3933_v20 = vrot.slane %v9794_v14, 4  ;;  %v3888_v17 = vrot.slane %v3887_v41, 1  ;;  %v3940_v28 = vrot.slane %v9795_v60, 4 }
 0x399   : >> { %v3947_v12 = vrot.slane %v9796_v18, 4  ;;  %v3895_v50 = vrot.slane %v3894_v49, 1  ;;  %v3902_v5 = vrot.slane %v3901_v35, 1  ;;  %v8551_v43 = vadd.f32 %v3907_v2, %v3906_v26 }
 0x39a   : >> { %5968 = vrcp.f32 %v4141_v0  ;;  %v4140_v51 = vadd.f32 1e-12, %v4096_v19  ;;  %v8553_v13 = vadd.f32 %v3867_v45, %v3866_v27  ;;  %v8555_v40 = vadd.f32 %v3914_v58, %v3913_v10  ;;  %v9808_v58 = vld [vmem:[#allocation89_spill] sm:$0xff] }
 0x39b   : >> { %v4102_v53 = vpop.xlane.xlu0 %4101  ;;  %v3921_v1 = vrot.slane %v3920_v32, 2  ;;  %v8557_v7 = vadd.f32 %v3874_v30, %v3873_v46  ;;  %v8560_v24 = vadd.f32 %v3926_v59, %v9793_v16  ;;  %v8563_v0 = vadd.f32 %v3933_v20, %v9794_v14  ;;  %v9803_v20 = vld [vmem:[#allocation29_spill] sm:$0xff]  ;;  %v9809_v14 = vld [vmem:[#allocation90_spill] sm:$0xff] }
 0x39c   : >> { %9797 = vst [vmem:[#allocation48_spill] sm:$0xff] %v8553_v13  ;;  %v4142_v11 = vadd.f32 1e-12, %v4102_v53  ;;  %v4105_v4 = vpop.xlane.xlu1 %4104  ;;  %v8565_v26 = vadd.f32 %v3881_v31, %v3880_v62  ;;  %v8567_v2 = vadd.f32 %v3888_v17, %v3887_v41  ;;  %v8570_v27 = vadd.f32 %v3940_v28, %v9795_v60  ;;  %v9804_v53 = vld [vmem:[#allocation84_spill] sm:$0xff] }
 0x39d   : >> { %9798 = vst [vmem:[#allocation49_spill] sm:$0xff] %v8557_v7  ;;  %v4143_v23 = vadd.f32 1e-12, %v4105_v4  ;;  %v8573_v10 = vadd.f32 %v3947_v12, %v9796_v18  ;;  %vm4719_vm2 = vcmask 1041409   ;;  %v8575_v46 = vadd.f32 %v3895_v50, %v3894_v49  ;;  %v9806_v4 = vld [vmem:[#allocation85_spill] sm:$0xff]  ;;  %v9810_v49 = vld [vmem:[#allocation91_spill] sm:$0xff] }
 0x39e   : >> { %9799 = vst [vmem:[#allocation50_spill] sm:$0xff] %v8565_v26  ;;  %9800 = vst [vmem:[#allocation51_spill] sm:$0xff] %v8567_v2  ;;  %v8577_v45 = vadd.f32 %v3902_v5, %v3901_v35  ;;  %vm4722_vm8 = vcmask 1042434   ;;  %5970 = vrcp.f32 %v4140_v51  ;;  %v8581_v30 = vadd.f32 %v3921_v1, %v3920_v32  ;;  %v9805_v1 = vld [vmem:[#allocation83_spill] sm:$0xff] }
 0x39f   : >> { %9801 = vst [vmem:[#allocation53_spill] sm:$0xff] %v8575_v46  ;;  %v4108_v19 = vpop.xlane.xlu0 %4107  ;;  %vm4725_vm5 = vcmask 1043459   ;;  %5972 = vrcp.f32 %v4142_v11  ;;  %vm4728_vm7 = vcmask 1044484   ;;  %v3954_v17 = vrot.slane %v9803_v20, 4  ;;  %v9811_v46 = vld [vmem:[#allocation92_spill] sm:$0xff] }
 0x3a0   : >> { %9802 = vst [vmem:[#allocation54_spill] sm:$0xff] %v8577_v45  ;;  %v5967_v62 = vpop.eup %5966  ;;  %v4144_v31 = vadd.f32 1e-12, %v4108_v19  ;;  %5974 = vrcp.f32 %v4143_v23  ;;  %vm4731_vm13 = vcmask 1045509   ;;  %vm4734_vm10 = vcmask 1046534  }
 0x3a1   : >> { %v4175_v35 = vmul.f32 %v5967_v62, %v8482_v33  ;;  %vm4737_vm4 = vcmask 1047559   ;;  %v9807_v62 = vld [vmem:[#allocation88_spill] sm:$0xff] }
 0x3a2   : >> { %5976 = vrcp.f32 %v4144_v31 }
 0x3a3   : >> { %v4222_v32 = vrot.slane %v4175_v35, 1  ;;  %v4223_v60 = vrot.slane %v4175_v35, 2  ;;  %v4224_v28 = vrot.slane %v4175_v35, 3  ;;  %v4225_v18 = vrot.slane %v4175_v35, 4 }
 0x3a4   : >> { %v5969_v12 = vpop.eup %5968  ;;  %v4226_v50 = vrot.slane %v4175_v35, 5  ;;  %v4227_v5 = vrot.slane %v4175_v35, 6  ;;  %v4228_v51 = vrot.slane %v4175_v35, 7  ;;  %v4462_v23 = vmul.f32 %v4175_v35, %v9804_v53 }
 0x3a5   : >> { %v4463_v11 = vmul.f32 %v4222_v32, %v9805_v1  ;;  %v4464_v19 = vmul.f32 %v4223_v60, %v9806_v4  ;;  %v4465_v41 = vmul.f32 %v4224_v28, %v9807_v62  ;;  %v4466_v31 = vmul.f32 %v4225_v18, %v9808_v58 }
 0x3a6   : >> { %v4467_v59 = vmul.f32 %v4226_v50, %v9809_v14  ;;  %v4468_v16 = vmul.f32 %v4227_v5, %v9810_v49  ;;  %v4469_v45 = vmul.f32 %v4228_v51, %v9811_v46  ;;  %v4179_v2 = vmul.f32 %v5969_v12, %v8482_v33 }
 0x3a7   : >> { %v4718_v26 = vrot.slane %v4463_v11, 7  ;;  %v4721_v7 = vrot.slane %v4464_v19, 6  ;;  %v4724_v13 = vrot.slane %v4465_v41, 5  ;;  %v4727_v35 = vrot.slane %v4466_v31, 4  ;;  %v9812_v11 = vld [vmem:[#allocation27_spill] sm:$0xff]  ;;  %v9814_v19 = vld [vmem:[#allocation33_spill] sm:$0xff] }
 0x3a8   : >> { %v4730_v53 = vrot.slane %v4467_v59, 3  ;;  %v4733_v32 = vrot.slane %v4468_v16, 2  ;;  %v4736_v1 = vrot.slane %v4469_v45, 1  ;;  %v4236_v60 = vrot.slane %v4179_v2, 1  ;;  %v5971_v4 = vpop.eup %5970  ;;  %v9813_v16 = vld [vmem:[#allocation32_spill] sm:$0xff] }
 0x3a9   : >> { %v4720_v28 = vsel %vm4719_vm2, %v4718_v26, %v4462_v23  ;;  %v4237_v58 = vrot.slane %v4179_v2, 2  ;;  %v4238_v18 = vrot.slane %v4179_v2, 3  ;;  %v4239_v14 = vrot.slane %v4179_v2, 4  ;;  %v5973_v50 = vpop.eup %5972  ;;  %v9815_v23 = vld [vmem:[#allocation104_spill] sm:$0xff] }
 0x3aa   : >> { %v4723_v49 = vsel %vm4722_vm8, %v4721_v7, %v4720_v28  ;;  %v4240_v46 = vrot.slane %v4179_v2, 5  ;;  %v4241_v5 = vrot.slane %v4179_v2, 6  ;;  %v4242_v12 = vrot.slane %v4179_v2, 7  ;;  %v5975_v51 = vpop.eup %5974  ;;  %v9817_v7 = vld [vmem:[#allocation37_spill] sm:$0xff] }
 0x3ab   : >> { %v4726_v41 = vsel %vm4725_vm5, %v4724_v13, %v4723_v49  ;;  %v4478_v59 = vmul.f32 %v4179_v2, %v9812_v11  ;;  %v4479_v45 = vmul.f32 %v4236_v60, %v9813_v16  ;;  %v4480_v62 = vmul.f32 %v4237_v58, %v9814_v19  ;;  %v9819_v49 = vld [vmem:[#allocation41_spill] sm:$0xff] }
 0x3ac   : >> { %v5977_v31 = vpop.eup %5976  ;;  %v4729_v26 = vsel %vm4728_vm7, %v4727_v35, %v4726_v41  ;;  %v4481_v8 = vmul.f32 %v4238_v18, %v9815_v23  ;;  %v4482_v3 = vmul.f32 %v4239_v14, %v9816_v57  ;;  %v4483_v28 = vmul.f32 %v4240_v46, %v9817_v7  ;;  %v9820_v23 = vld [vmem:[#allocation95_spill] sm:$0xff] }
 0x3ad   : >> { %v4732_v54 = vsel %vm4731_vm13, %v4730_v53, %v4729_v26  ;;  %v4484_v13 = vmul.f32 %v4241_v5, %v9818_v34  ;;  %v4485_v2 = vmul.f32 %v4242_v12, %v9819_v49  ;;  %v4753_v11 = vrot.slane %v4479_v45, 7  ;;  %v9822_v49 = vld [vmem:[#allocation22_spill] sm:$0xff] }
 0x3ae   : >> { %v8612_v60 = vadd.f32 %v3954_v17, %v9803_v20  ;;  %v4735_v58 = vsel %vm4734_vm10, %v4733_v32, %v4732_v54  ;;  %v4755_v35 = vrot.slane %v4480_v62, 6  ;;  %v4757_v41 = vrot.slane %v4481_v8, 5 }
 0x3af   : >> { %v4738_v18 = vsel %vm4737_vm4, %v4736_v1, %v4735_v58  ;;  %v4754_v57 = vsel %vm4719_vm2, %v4753_v11, %v4478_v59  ;;  %v4759_v14 = vrot.slane %v4482_v3, 4  ;;  %v4761_v46 = vrot.slane %v4483_v28, 3  ;;  %v9821_v28 = vld [vmem:[#allocation96_spill] sm:$0xff]  ;;  %v9823_v11 = vld [vmem:[#allocation25_spill] sm:$0xff] }
 0x3b0   : >> { %v4965_v16 = vadd.f32 %v4738_v18, %v4157_v44  ;;  %v4756_v53 = vsel %vm4722_vm8, %v4755_v35, %v4754_v57  ;;  %v4763_v34 = vrot.slane %v4484_v13, 2  ;;  %v4177_v5 = vmul.f32 %v5971_v4, %v8482_v33  ;;  %v4159_v44 = vld [vmem:[#allocation2 + $0x10] sm:$0xff]  ;;  %v9825_v57 = vld [vmem:[#allocation97_spill] sm:$0xff] }
 0x3b1   : >> { %v4758_v12 = vsel %vm4725_vm5, %v4757_v41, %v4756_v53  ;;  %v4765_v20 = vrot.slane %v4485_v2, 1  ;;  %v4181_v17 = vmul.f32 %v5973_v50, %v8482_v33  ;;  %v8622_v54 = vmul.f32 %v5975_v51, %v8482_v33  ;;  %v9824_v41 = vld [vmem:[#allocation94_spill] sm:$0xff] }
 0x3b2   : >> { %4981 = vst [vmem:[#allocation2] sm:$0xff] %v4965_v16  ;;  %v4760_v8 = vsel %vm4728_vm7, %v4759_v14, %v4758_v12  ;;  %v4229_v32 = vrot.slane %v4177_v5, 1  ;;  %v4230_v3 = vrot.slane %v4177_v5, 2  ;;  %v4231_v1 = vrot.slane %v4177_v5, 3  ;;  %v9827_v53 = vld [vmem:[#allocation26_spill] sm:$0xff] }
 0x3b3   : >> { %v4762_v59 = vsel %vm4731_vm13, %v4761_v46, %v4760_v8  ;;  %v4232_v45 = vrot.slane %v4177_v5, 4  ;;  %v4233_v19 = vrot.slane %v4177_v5, 5  ;;  %v4234_v4 = vrot.slane %v4177_v5, 6  ;;  %v9826_v46 = vld [vmem:[#allocation98_spill] sm:$0xff] }
 0x3b4   : >> { %v4764_v62 = vsel %vm4734_vm10, %v4763_v34, %v4762_v59  ;;  %v4235_v26 = vrot.slane %v4177_v5, 7  ;;  %v4471_v50 = vmul.f32 %v4229_v32, %v9820_v23  ;;  %v8629_v51 = vmul.f32 %v5977_v31, %v8482_v33  ;;  %v8639_v32 = vpop.xlane.xlu1 %4110 }
 0x3b5   : >> { %v4766_v7 = vsel %vm4737_vm4, %v4765_v20, %v4764_v62  ;;  %v4472_v13 = vmul.f32 %v4230_v3, %v9821_v28  ;;  %v4473_v2 = vmul.f32 %v4231_v1, %v9822_v49  ;;  %v4474_v58 = vmul.f32 %v4232_v45, %v9823_v11  ;;  %v8641_v20 = vpop.xlane.xlu0 %4113 }
 0x3b6   : >> { %v4967_v35 = vadd.f32 %v4766_v7, %v4159_v44  ;;  %v4470_v18 = vmul.f32 %v4177_v5, %v9824_v41  ;;  %v4475_v14 = vmul.f32 %v4233_v19, %v9825_v57  ;;  %v4476_v16 = vmul.f32 %v4234_v4, %v9826_v46 }
 0x3b7   : >> { %v4477_v34 = vmul.f32 %v4235_v26, %v9827_v53  ;;  %v4739_v12 = vrot.slane %v4471_v50, 7  ;;  %v4741_v31 = vrot.slane %v4472_v13, 6  ;;  %v4743_v8 = vrot.slane %v4473_v2, 5  ;;  %v9828_v13 = vld [vmem:[#allocation52_spill] sm:$0xff]  ;;  %v9829_v2 = vld [vmem:[#allocation57_spill] sm:$0xff] }
 0x3b8   : >> { %4983 = vst [vmem:[#allocation2 + $0x10] sm:$0xff] %v4967_v35  ;;  %v4745_v3 = vrot.slane %v4474_v58, 4  ;;  %v4747_v1 = vrot.slane %v4475_v14, 3  ;;  %v4749_v59 = vrot.slane %v4476_v16, 2  ;;  %v4243_v44 = vrot.slane %v4181_v17, 1  ;;  %v9830_v35 = vld [vmem:[#allocation58_spill] sm:$0xff] }
 0x3b9   : >> { %v4740_v5 = vsel %vm4719_vm2, %v4739_v12, %v4470_v18  ;;  %v4244_v45 = vrot.slane %v4181_v17, 2  ;;  %v4245_v19 = vrot.slane %v4181_v17, 3  ;;  %v4246_v62 = vrot.slane %v4181_v17, 4  ;;  %v9831_v18 = vld [vmem:[#allocation106_spill] sm:$0xff]  ;;  %v9832_v14 = vld [vmem:[#allocation107_spill] sm:$0xff]  ;;  %v4158_v16 = vld [vmem:[#allocation2 + $0x8] sm:$0xff] }
 0x3ba   : >> { %v4742_v4 = vsel %vm4722_vm8, %v4741_v31, %v4740_v5  ;;  %v4247_v26 = vrot.slane %v4181_v17, 5  ;;  %v4248_v23 = vrot.slane %v4181_v17, 6  ;;  %v4249_v50 = vrot.slane %v4181_v17, 7  ;;  %v9833_v12 = vld [vmem:[#allocation44_spill] sm:$0xff] }
 0x3bb   : >> { %v4744_v7 = vsel %vm4725_vm5, %v4743_v8, %v4742_v4  ;;  %v4751_v28 = vrot.slane %v4477_v34, 1  ;;  %v4487_v49 = vmul.f32 %v4243_v44, %v9828_v13  ;;  %v4488_v11 = vmul.f32 %v4244_v45, %v9829_v2  ;;  %v9834_v5 = vld [vmem:[#allocation108_spill] sm:$0xff]  ;;  %v8655_v4 = vpop.xlane.xlu1 %4116  ;;  %v8657_v44 = vpop.xlane.xlu0 %4119  ;;  %v9835_v45 = vld [vmem:[#allocation109_spill] sm:$0xff] }
 0x3bc   : >> { %v4746_v58 = vsel %vm4728_vm7, %v4745_v3, %v4744_v7  ;;  %v4489_v41 = vmul.f32 %v4245_v19, %v9830_v35  ;;  %v4490_v57 = vmul.f32 %v4246_v62, %v9831_v18  ;;  %v4491_v46 = vmul.f32 %v4247_v26, %v9832_v14  ;;  %v4160_v14 = vld [vmem:[#allocation2 + $0x18] sm:$0xff] }
 0x3bd   : >> { %v4748_v53 = vsel %vm4731_vm13, %v4747_v1, %v4746_v58  ;;  %v4486_v31 = vmul.f32 %v4181_v17, %v9833_v12  ;;  %v4492_v8 = vmul.f32 %v4248_v23, %v9834_v5  ;;  %v4767_v34 = vrot.slane %v4487_v49, 7 }
 0x3be   : >> { %v4750_v3 = vsel %vm4734_vm10, %v4749_v59, %v4748_v53  ;;  %v4493_v19 = vmul.f32 %v4249_v50, %v9835_v45  ;;  %v4769_v7 = vrot.slane %v4488_v11, 6  ;;  %v4771_v62 = vrot.slane %v4489_v41, 5  ;;  %v9836_v53 = vld [vmem:[#allocation61_spill] sm:$0xff]  ;;  %v9838_v45 = vld [vmem:[#allocation67_spill] sm:$0xff] }
 0x3bf   : >> { %v4752_v26 = vsel %vm4737_vm4, %v4751_v28, %v4750_v3  ;;  %v4768_v13 = vsel %vm4719_vm2, %v4767_v34, %v4486_v31  ;;  %v4773_v1 = vrot.slane %v4490_v57, 4  ;;  %v4775_v2 = vrot.slane %v4491_v46, 3  ;;  %v9837_v31 = vld [vmem:[#allocation110_spill] sm:$0xff]  ;;  %v8678_v34 = vpop.xlane.xlu0 %4125 }
 0x3c0   : >> { %v4966_v17 = vadd.f32 %v4752_v26, %v4158_v16  ;;  %v4770_v23 = vsel %vm4722_vm8, %v4769_v7, %v4768_v13  ;;  %v4777_v49 = vrot.slane %v4492_v8, 2  ;;  %v4250_v58 = vrot.slane %v8622_v54, 1  ;;  %v8676_v8 = vpop.xlane.xlu1 %4122  ;;  %v9840_v13 = vld [vmem:[#allocation71_spill] sm:$0xff] }
 0x3c1   : >> { %v4772_v35 = vsel %vm4725_vm5, %v4771_v62, %v4770_v23  ;;  %v4251_v59 = vrot.slane %v8622_v54, 2  ;;  %v4252_v50 = vrot.slane %v8622_v54, 3  ;;  %v4253_v11 = vrot.slane %v8622_v54, 4  ;;  %v9839_v62 = vld [vmem:[#allocation68_spill] sm:$0xff] }
 0x3c2   : >> { %4982 = vst [vmem:[#allocation2 + $0x8] sm:$0xff] %v4966_v17  ;;  %v4774_v28 = vsel %vm4728_vm7, %v4773_v1, %v4772_v35  ;;  %v4254_v41 = vrot.slane %v8622_v54, 5  ;;  %v4255_v18 = vrot.slane %v8622_v54, 6  ;;  %v4256_v57 = vrot.slane %v8622_v54, 7  ;;  %v9842_v23 = vld [vmem:[#allocation72_spill] sm:$0xff] }
 0x3c3   : >> { %v4776_v46 = vsel %vm4731_vm13, %v4775_v2, %v4774_v28  ;;  %v4779_v16 = vrot.slane %v4493_v19, 1  ;;  %v4495_v12 = vmul.f32 %v4250_v58, %v9836_v53  ;;  %v4496_v5 = vmul.f32 %v4251_v59, %v9837_v31  ;;  %v9841_v2 = vld [vmem:[#allocation60_spill] sm:$0xff]  ;;  %v9843_v28 = vld [vmem:[#allocation73_spill] sm:$0xff] }
 0x3c4   : >> { %v4778_v3 = vsel %vm4734_vm10, %v4777_v49, %v4776_v46  ;;  %v4497_v7 = vmul.f32 %v4252_v50, %v9838_v45  ;;  %v4498_v26 = vmul.f32 %v4253_v11, %v9839_v62  ;;  %v4499_v1 = vmul.f32 %v4254_v41, %v9840_v13  ;;  %v9844_v13 = vld [vmem:[#allocation115_spill] sm:$0xff] }
 0x3c5   : >> { %v4780_v17 = vsel %vm4737_vm4, %v4779_v16, %v4778_v3  ;;  %v4494_v19 = vmul.f32 %v8622_v54, %v9841_v2  ;;  %v4500_v58 = vmul.f32 %v4255_v18, %v9842_v23  ;;  %v4781_v35 = vrot.slane %v4495_v12, 7  ;;  %v4132_v3 = vpop.xlane.xlu0 %4131  ;;  %v9845_v23 = vld [vmem:[#allocation116_spill] sm:$0xff] }
 0x3c6   : >> { %v4968_v59 = vadd.f32 %v4780_v17, %v4160_v14  ;;  %v4501_v53 = vmul.f32 %v4256_v57, %v9843_v28  ;;  %v4783_v31 = vrot.slane %v4496_v5, 6  ;;  %v4145_v49 = vadd.f32 1e-12, %v8639_v32  ;;  %v4129_v5 = vpop.xlane.xlu1 %4128  ;;  %v4161_v17 = vld [vmem:[#allocation2 + $0x20] sm:$0xff] }
 0x3c7   : >> { %v4782_v50 = vsel %vm4719_vm2, %v4781_v35, %v4494_v19  ;;  %v4785_v46 = vrot.slane %v4497_v7, 5  ;;  %v4787_v11 = vrot.slane %v4498_v26, 4  ;;  %v4789_v45 = vrot.slane %v4499_v1, 3  ;;  %v9846_v35 = vld [vmem:[#allocation117_spill] sm:$0xff] }
 0x3c8   : >> { %4984 = vst [vmem:[#allocation2 + $0x18] sm:$0xff] %v4968_v59  ;;  %v4784_v41 = vsel %vm4722_vm8, %v4783_v31, %v4782_v50  ;;  %v4257_v16 = vrot.slane %v8629_v51, 1  ;;  %v4258_v54 = vrot.slane %v8629_v51, 2  ;;  %v4259_v18 = vrot.slane %v8629_v51, 3  ;;  %v9847_v50 = vld [vmem:[#allocation114_spill] sm:$0xff] }
 0x3c9   : >> { %v4786_v14 = vsel %vm4725_vm5, %v4785_v46, %v4784_v41  ;;  %v4791_v57 = vrot.slane %v4500_v58, 2  ;;  %v4260_v12 = vrot.slane %v8629_v51, 4  ;;  %v4261_v32 = vrot.slane %v8629_v51, 5 }
 0x3ca   : >> { %v4788_v7 = vsel %vm4728_vm7, %v4787_v11, %v4786_v14  ;;  %v4262_v62 = vrot.slane %v8629_v51, 6  ;;  %v4263_v26 = vrot.slane %v8629_v51, 7  ;;  %v4503_v1 = vmul.f32 %v4257_v16, %v9844_v13  ;;  %v9848_v11 = vld [vmem:[#allocation118_spill] sm:$0xff]  ;;  %v9849_v16 = vld [vmem:[#allocation119_spill] sm:$0xff] }
 0x3cb   : >> { %v4790_v2 = vsel %vm4731_vm13, %v4789_v45, %v4788_v7  ;;  %v4793_v19 = vrot.slane %v4501_v53, 1  ;;  %v4504_v58 = vmul.f32 %v4258_v54, %v9845_v23  ;;  %v4505_v59 = vmul.f32 %v4259_v18, %v9846_v35  ;;  %v9851_v7 = vld [vmem:[#allocation120_spill] sm:$0xff]  ;;  %v9852_v35 = vld [vmem:[#allocation121_spill] sm:$0xff] }
 0x3cc   : >> { %v3956_v28 = vrot.slane %v8612_v60, 2  ;;  %v4792_v31 = vsel %vm4734_vm10, %v4791_v57, %v4790_v2  ;;  %v4502_v46 = vmul.f32 %v8629_v51, %v9847_v50  ;;  %v4506_v41 = vmul.f32 %v4260_v12, %v9848_v11  ;;  %v4162_v11 = vld [vmem:[#allocation2 + $0x28] sm:$0xff] }
 0x3cd   : >> { %v4794_v14 = vsel %vm4737_vm4, %v4793_v19, %v4792_v31  ;;  %v4507_v13 = vmul.f32 %v4261_v32, %v9849_v16  ;;  %v4795_v9 = vrot.slane %v4503_v1, 7  ;;  %v4797_v45 = vrot.slane %v4504_v58, 6  ;;  %v4135_v19 = vpop.xlane.xlu1 %4134  ;;  %v8719_v31 = vpop.xlane.xlu0 %4137 }
 0x3ce   : >> { %v9850_v53 = vrot.slane %v8560_v24, 2  ;;  %v4969_v18 = vadd.f32 %v4794_v14, %v4161_v17  ;;  %v4508_v23 = vmul.f32 %v4262_v62, %v9851_v7  ;;  %v4509_v57 = vmul.f32 %v4263_v26, %v9852_v35 }
 0x3cf   : >> { %v4796_v2 = vsel %vm4719_vm2, %v4795_v9, %v4502_v46  ;;  %v4799_v51 = vrot.slane %v4505_v59, 5  ;;  %5978 = vrcp.f32 %v4145_v49  ;;  %v4146_v12 = vadd.f32 1e-12, %v8641_v20 }
 0x3d0   : >> { %v3929_v54 = vadd.f32 %v9850_v53, %v8560_v24  ;;  %v9853_v32 = vrot.slane %v8563_v0, 2  ;;  %v9854_v24 = vrot.slane %v8570_v27, 2  ;;  %4985 = vst [vmem:[#allocation2 + $0x20] sm:$0xff] %v4969_v18  ;;  %v4798_v62 = vsel %vm4722_vm8, %v4797_v45, %v4796_v2 }
 0x3d1   : >> { %v4801_v26 = vrot.slane %v4506_v41, 4  ;;  %v9855_v9 = vrot.slane %v8573_v10, 2  ;;  %v3957_v20 = vadd.f32 %v3956_v28, %v8612_v60  ;;  %v4800_v58 = vsel %vm4725_vm5, %v4799_v51, %v4798_v62  ;;  %v2323_v7 = vpop.permute.xlu1 %2322 }
 0x3d2   : >> { %v3936_v1 = vadd.f32 %v9853_v32, %v8563_v0  ;;  %v3943_v17 = vadd.f32 %v9854_v24, %v8570_v27  ;;  %v4803_v59 = vrot.slane %v4507_v13, 3  ;;  %v4805_v0 = vrot.slane %v4508_v23, 2  ;;  %v2327_v23 = vpop.permute.xlu0 %2326  ;;  %v9858_v24 = vld [vmem:[#allocation8_spill] sm:$0xff] }
 0x3d3   : >> { %v3950_v49 = vadd.f32 %v9855_v9, %v8573_v10  ;;  %v4802_v50 = vsel %vm4728_vm7, %v4801_v26, %v4800_v58  ;;  %5980 = vrcp.f32 %v4146_v12  ;;  %v4147_v46 = vadd.f32 1e-12, %v8655_v4 }
 0x3d4   : >> { %v3923_v27 = vrot.slane %v8581_v30, 1  ;;  %v4804_v41 = vsel %vm4731_vm13, %v4803_v59, %v4802_v50  ;;  %v4807_v14 = vrot.slane %v4509_v57, 1  ;;  %v4148_v16 = vadd.f32 1e-12, %v8657_v44 }
 0x3d5   : >> { %v3930_v10 = vrot.slane %v3929_v54, 1  ;;  %v3937_v45 = vrot.slane %v3936_v1, 1  ;;  %v4806_v60 = vsel %vm4734_vm10, %v4805_v0, %v4804_v41  ;;  %v4149_v28 = vadd.f32 1e-12, %v8676_v8 }
 0x3d6   : >> { %v3944_v13 = vrot.slane %v3943_v17, 1  ;;  %v3951_v53 = vrot.slane %v3950_v49, 1  ;;  %v4808_v18 = vsel %vm4737_vm4, %v4807_v14, %v4806_v60  ;;  %v4150_v4 = vadd.f32 1e-12, %v8678_v34  ;;  %v9866_v14 = vld [vmem:[#allocation122_spill] sm:$0xff] }
 0x3d7   : >> { %v3958_v35 = vrot.slane %v3957_v20, 1  ;;  %v4970_v2 = vadd.f32 %v4808_v18, %v4162_v11  ;;  %5982 = vrcp.f32 %v4147_v46  ;;  %v4151_v57 = vadd.f32 1e-12, %v4129_v5  ;;  %v9865_v11 = vld [vmem:[#allocation87_spill] sm:$0xff] }
 0x3d8   : >> { %v9856_v44 = vrot.slane %v8551_v43, 1  ;;  %v9857_v8 = vrot.slane %v8555_v40, 1  ;;  %5984 = vrcp.f32 %v4148_v16  ;;  %v4152_v32 = vadd.f32 1e-12, %v4132_v3 }
 0x3d9   : >> { %v8753_v34 = vadd.f32 %v3923_v27, %v8581_v30  ;;  %4986 = vst [vmem:[#allocation2 + $0x28] sm:$0xff] %v4970_v2  ;;  %5986 = vrcp.f32 %v4149_v28  ;;  %vm2636_vm12 = vcmp.eq.s32.totalorder %v2323_v7, %v9858_v24  ;;  %vm2637_vm0 = vcmp.eq.s32.totalorder %v2327_v23, %v9858_v24  ;;  %v5979_v5 = vpop.eup %5978  ;;  %v9869_v28 = vld [vmem:[#allocation125_spill] sm:$0xff]  ;;  %v9872_v23 = vld [vmem:[#allocation18_spill] sm:$0xff] }
 0x3da   : >> { %v8745_v51 = vadd.f32 %v9856_v44, %v8551_v43  ;;  %v8750_v12 = vadd.f32 %v9857_v8, %v8555_v40  ;;  %v8757_v62 = vadd.f32 %v3930_v10, %v3929_v54  ;;  %v8759_v43 = vadd.f32 %v3937_v45, %v3936_v1  ;;  %v9867_v10 = vld [vmem:[#allocation123_spill] sm:$0xff]  ;;  %v9868_v45 = vld [vmem:[#allocation124_spill] sm:$0xff] }
 0x3db   : >> { %v8761_v26 = vadd.f32 %v3944_v13, %v3943_v17  ;;  %5988 = vrcp.f32 %v4150_v4  ;;  %v8763_v40 = vadd.f32 %v3951_v53, %v3950_v49  ;;  %v8765_v3 = vadd.f32 %v3958_v35, %v3957_v20  ;;  %v9870_v53 = vld [vmem:[#allocation126_spill] sm:$0xff]  ;;  %v9871_v4 = vld [vmem:[#allocation9_spill] sm:$0xff] }
 0x3dc   : >> { %9859 = vst [vmem:[#allocation56_spill] sm:$0xff] %v8757_v62  ;;  %9860 = vst [vmem:[#allocation59_spill] sm:$0xff] %v8759_v43  ;;  %v4187_v30 = vmul.f32 %v5979_v5, %v8482_v33  ;;  %5990 = vrcp.f32 %v4151_v57  ;;  %v4153_v9 = vadd.f32 1e-12, %v4135_v19  ;;  %v9864_v58 = vmov 0.0   ;;  %v4163_v43 = vld [vmem:[#allocation2 + $0x30] sm:$0xff] }
 0x3dd   : >> { %9861 = vst [vmem:[#allocation63_spill] sm:$0xff] %v8761_v26  ;;  %9862 = vst [vmem:[#allocation64_spill] sm:$0xff] %v8763_v40  ;;  %5992 = vrcp.f32 %v4152_v32  ;;  %v8769_v59 = vsel %vm2636_vm12, 1.0, %v9864_v58  ;;  %v8772_v54 = vsel %vm2637_vm0, 1.0, %v9864_v58  ;;  %v5981_v1 = vpop.eup %5980 }
 0x3de   : >> { %9863 = vst [vmem:[#allocation65_spill] sm:$0xff] %v8765_v3  ;;  %v4264_v50 = vrot.slane %v4187_v30, 1  ;;  %v4265_v17 = vrot.slane %v4187_v30, 2  ;;  %v4266_v0 = vrot.slane %v4187_v30, 3  ;;  %v4267_v46 = vrot.slane %v4187_v30, 4  ;;  %v9878_v3 = vld [vmem:[#allocation20_spill] sm:$0xff] }
 0x3df   : >> { %v4268_v49 = vrot.slane %v4187_v30, 5  ;;  %v4269_v27 = vrot.slane %v4187_v30, 6  ;;  %v4270_v20 = vrot.slane %v4187_v30, 7  ;;  %v4510_v41 = vmul.f32 %v4187_v30, %v9865_v11 }
 0x3e0   : >> { %v4511_v16 = vmul.f32 %v4264_v50, %v9866_v14  ;;  %v4512_v19 = vmul.f32 %v4265_v17, %v9867_v10  ;;  %v4513_v60 = vmul.f32 %v4266_v0, %v9868_v45  ;;  %v4514_v13 = vmul.f32 %v4267_v46, %v9869_v28 }
 0x3e1   : >> { %v4515_v18 = vmul.f32 %v4268_v49, %v9870_v53  ;;  %v4516_v7 = vmul.f32 %v4269_v27, %v9871_v4  ;;  %v4517_v35 = vmul.f32 %v4270_v20, %v9872_v23  ;;  %v4189_v2 = vmul.f32 %v5981_v1, %v8482_v33  ;;  %v5983_v57 = vpop.eup %5982 }
 0x3e2   : >> { %v4809_v44 = vrot.slane %v4511_v16, 7  ;;  %v4811_v8 = vrot.slane %v4512_v19, 6  ;;  %v4813_v32 = vrot.slane %v4513_v60, 5  ;;  %v4815_v5 = vrot.slane %v4514_v13, 4  ;;  %v5985_v30 = vpop.eup %5984  ;;  %v9873_v13 = vld [vmem:[#allocation19_spill] sm:$0xff] }
 0x3e3   : >> { %v4817_v50 = vrot.slane %v4515_v18, 3  ;;  %v4819_v17 = vrot.slane %v4516_v7, 2  ;;  %v4821_v11 = vrot.slane %v4517_v35, 1  ;;  %v4271_v0 = vrot.slane %v4189_v2, 1  ;;  %v5987_v14 = vpop.eup %5986  ;;  %v9874_v18 = vld [vmem:[#allocation13_spill] sm:$0xff]  ;;  %v9875_v7 = vld [vmem:[#allocation12_spill] sm:$0xff] }
 0x3e4   : >> { %v4810_v46 = vsel %vm4719_vm2, %v4809_v44, %v4510_v41  ;;  %v4272_v49 = vrot.slane %v4189_v2, 2  ;;  %v4273_v10 = vrot.slane %v4189_v2, 3  ;;  %v4274_v27 = vrot.slane %v4189_v2, 4  ;;  %v9876_v44 = vld [vmem:[#allocation14_spill] sm:$0xff] }
 0x3e5   : >> { %v5989_v45 = vpop.eup %5988  ;;  %v4812_v20 = vsel %vm4722_vm8, %v4811_v8, %v4810_v46  ;;  %v4275_v1 = vrot.slane %v4189_v2, 5  ;;  %v4276_v28 = vrot.slane %v4189_v2, 6  ;;  %v4277_v16 = vrot.slane %v4189_v2, 7  ;;  %v9877_v8 = vld [vmem:[#allocation15_spill] sm:$0xff] }
 0x3e6   : >> { %v8785_v19 = vpop.eup %5990  ;;  %v4814_v60 = vsel %vm4725_vm5, %v4813_v32, %v4812_v20  ;;  %v4518_v53 = vmul.f32 %v4189_v2, %v9873_v13  ;;  %v4519_v4 = vmul.f32 %v4271_v0, %v9874_v18  ;;  %v4520_v23 = vmul.f32 %v4272_v49, %v9875_v7  ;;  %v9879_v32 = vld [vmem:[#allocation21_spill] sm:$0xff]  ;;  %v9880_v2 = vld [vmem:[#allocation16_spill] sm:$0xff] }
 0x3e7   : >> { %v8791_v41 = vpop.eup %5992  ;;  %v4816_v35 = vsel %vm4728_vm7, %v4815_v5, %v4814_v60  ;;  %v4521_v40 = vmul.f32 %v4273_v10, %v9876_v44  ;;  %v4522_v46 = vmul.f32 %v4274_v27, %v9877_v8  ;;  %v4523_v26 = vmul.f32 %v4275_v1, %v9878_v3  ;;  %v8812_v44 = vpop.permute.xlu1 %2245 }
 0x3e8   : >> { %v4818_v62 = vsel %vm4731_vm13, %v4817_v50, %v4816_v35  ;;  %v4524_v20 = vmul.f32 %v4276_v28, %v9879_v32  ;;  %v4525_v13 = vmul.f32 %v4277_v16, %v9880_v2  ;;  %v4823_v0 = vrot.slane %v4519_v4, 7  ;;  %v9882_v2 = vld [vmem:[#allocation24_spill] sm:$0xff] }
 0x3e9   : >> { %v4820_v49 = vsel %vm4734_vm10, %v4819_v17, %v4818_v62  ;;  %v4825_v18 = vrot.slane %v4520_v23, 6  ;;  %v4827_v7 = vrot.slane %v4521_v40, 5  ;;  %5994 = vrcp.f32 %v4153_v9 }
 0x3ea   : >> { %v4822_v5 = vsel %vm4737_vm4, %v4821_v11, %v4820_v49  ;;  %v4824_v10 = vsel %vm4719_vm2, %v4823_v0, %v4518_v53  ;;  %v4829_v27 = vrot.slane %v4522_v46, 4  ;;  %v4831_v60 = vrot.slane %v4523_v26, 3  ;;  %v9881_v46 = vld [vmem:[#allocation23_spill] sm:$0xff]  ;;  %v9883_v0 = vld [vmem:[#allocation62_spill] sm:$0xff] }
 0x3eb   : >> { %v4971_v3 = vadd.f32 %v4822_v5, %v4163_v43  ;;  %v4826_v1 = vsel %vm4722_vm8, %v4825_v18, %v4824_v10  ;;  %v4833_v50 = vrot.slane %v4524_v20, 2  ;;  %v4191_v28 = vmul.f32 %v5983_v57, %v8482_v33  ;;  %v4164_v43 = vld [vmem:[#allocation2 + $0x38] sm:$0xff]  ;;  %v9884_v18 = vld [vmem:[#allocation93_spill] sm:$0xff] }
 0x3ec   : >> { %v4828_v16 = vsel %vm4725_vm5, %v4827_v7, %v4826_v1  ;;  %v4835_v4 = vrot.slane %v4525_v13, 1  ;;  %v4193_v62 = vmul.f32 %v5985_v30, %v8482_v33  ;;  %v8808_v40 = vmul.f32 %v5987_v14, %v8482_v33  ;;  %v9885_v10 = vld [vmem:[#allocation17_spill] sm:$0xff]  ;;  %v9887_v1 = vld [vmem:[#allocation55_spill] sm:$0xff] }
 0x3ed   : >> { %4987 = vst [vmem:[#allocation2 + $0x30] sm:$0xff] %v4971_v3  ;;  %v4830_v9 = vsel %vm4728_vm7, %v4829_v27, %v4828_v16  ;;  %v4278_v17 = vrot.slane %v4191_v28, 1  ;;  %v4279_v11 = vrot.slane %v4191_v28, 2  ;;  %v4280_v26 = vrot.slane %v4191_v28, 3 }
 0x3ee   : >> { %v4832_v53 = vsel %vm4731_vm13, %v4831_v60, %v4830_v9  ;;  %v4281_v23 = vrot.slane %v4191_v28, 4  ;;  %v4282_v35 = vrot.slane %v4191_v28, 5  ;;  %v4283_v57 = vrot.slane %v4191_v28, 6  ;;  %v9886_v60 = vld [vmem:[#allocation31_spill] sm:$0xff] }
 0x3ef   : >> { %v4834_v8 = vsel %vm4734_vm10, %v4833_v50, %v4832_v53  ;;  %v4284_v30 = vrot.slane %v4191_v28, 7  ;;  %v4527_v14 = vmul.f32 %v4278_v17, %v9881_v46  ;;  %v8817_v32 = vmul.f32 %v5989_v45, %v8482_v33 }
 0x3f0   : >> { %v4836_v20 = vsel %vm4737_vm4, %v4835_v4, %v4834_v8  ;;  %v4528_v13 = vmul.f32 %v4279_v11, %v9882_v2  ;;  %v4529_v49 = vmul.f32 %v4280_v26, %v9883_v0  ;;  %v4530_v7 = vmul.f32 %v4281_v23, %v9884_v18 }
 0x3f1   : >> { %v4972_v5 = vadd.f32 %v4836_v20, %v4164_v43  ;;  %v4526_v27 = vmul.f32 %v4191_v28, %v9885_v10  ;;  %v4531_v3 = vmul.f32 %v4282_v35, %v9886_v60  ;;  %v4532_v50 = vmul.f32 %v4283_v57, %v9887_v1  ;;  %v8830_v35 = vpop.permute.xlu1 %2249  ;;  %v4165_v10 = vld [vmem:[#allocation2 + $0x40] sm:$0xff] }
 0x3f2   : >> { %v4533_v16 = vmul.f32 %v4284_v30, %v8440_v55  ;;  %v4837_v9 = vrot.slane %v4527_v14, 7  ;;  %v4839_v45 = vrot.slane %v4528_v13, 6  ;;  %v4841_v17 = vrot.slane %v4529_v49, 5 }
 0x3f3   : >> { %v8827_v53 = vpop.eup %5994  ;;  %4988 = vst [vmem:[#allocation2 + $0x38] sm:$0xff] %v4972_v5  ;;  %v4843_v4 = vrot.slane %v4530_v7, 4  ;;  %v4845_v11 = vrot.slane %v4531_v3, 3  ;;  %v4847_v26 = vrot.slane %v4532_v50, 2  ;;  %v4285_v8 = vrot.slane %v4193_v62, 1 }
 0x3f4   : >> { %v4838_v43 = vsel %vm4719_vm2, %v4837_v9, %v4526_v27  ;;  %v4286_v23 = vrot.slane %v4193_v62, 2  ;;  %v4287_v28 = vrot.slane %v4193_v62, 3  ;;  %v4288_v46 = vrot.slane %v4193_v62, 4 }
 0x3f5   : >> { %v4840_v57 = vsel %vm4722_vm8, %v4839_v45, %v4838_v43  ;;  %v4289_v55 = vrot.slane %v4193_v62, 5  ;;  %v4290_v30 = vrot.slane %v4193_v62, 6  ;;  %v4291_v14 = vrot.slane %v4193_v62, 7  ;;  %v8847_v45 = vpop.permute.xlu1 %2337 }
 0x3f6   : >> { %v4842_v20 = vsel %vm4725_vm5, %v4841_v17, %v4840_v57  ;;  %v4849_v2 = vrot.slane %v4533_v16, 1  ;;  %v4535_v13 = vmul.f32 %v4285_v8, %v8444_v36  ;;  %v4536_v0 = vmul.f32 %v4286_v23, %v8447_v22  ;;  %v4166_v57 = vld [vmem:[#allocation2 + $0x48] sm:$0xff] }
 0x3f7   : >> { %v4844_v49 = vsel %vm4728_vm7, %v4843_v4, %v4842_v20  ;;  %v4537_v18 = vmul.f32 %v4287_v28, %v8451_v63  ;;  %v4538_v7 = vmul.f32 %v4288_v46, %v8458_v15  ;;  %v4539_v5 = vmul.f32 %v4289_v55, %v8460_v61  ;;  %v8859_v46 = vpop.permute.xlu0 %2333 }
 0x3f8   : >> { %v4846_v27 = vsel %vm4731_vm13, %v4845_v11, %v4844_v49  ;;  %v4534_v60 = vmul.f32 %v4193_v62, %v8442_v39  ;;  %v4540_v3 = vmul.f32 %v4290_v30, %v8463_v21  ;;  %v4851_v1 = vrot.slane %v4535_v13, 7 }
 0x3f9   : >> { %v4848_v36 = vsel %vm4734_vm10, %v4847_v26, %v4846_v27  ;;  %v4541_v22 = vmul.f32 %v4291_v14, %v8465_v37  ;;  %v4853_v50 = vrot.slane %v4536_v0, 6  ;;  %v4855_v16 = vrot.slane %v4537_v18, 5 }
 0x3fa   : >> { %v4850_v63 = vsel %vm4737_vm4, %v4849_v2, %v4848_v36  ;;  %v4852_v15 = vsel %vm4719_vm2, %v4851_v1, %v4534_v60  ;;  %v4857_v9 = vrot.slane %v4538_v7, 4  ;;  %v4859_v61 = vrot.slane %v4539_v5, 3 }
 0x3fb   : >> { %v4973_v17 = vadd.f32 %v4850_v63, %v4165_v10  ;;  %v4854_v39 = vsel %vm4722_vm8, %v4853_v50, %v4852_v15  ;;  %v4861_v62 = vrot.slane %v4540_v3, 2  ;;  %v4292_v21 = vrot.slane %v8808_v40, 1 }
 0x3fc   : >> { %v4856_v4 = vsel %vm4725_vm5, %v4855_v16, %v4854_v39  ;;  %v4293_v37 = vrot.slane %v8808_v40, 2  ;;  %v4294_v11 = vrot.slane %v8808_v40, 3  ;;  %v4295_v26 = vrot.slane %v8808_v40, 4  ;;  %v4167_v39 = vld [vmem:[#allocation2 + $0x50] sm:$0xff] }
 0x3fd   : >> { %4989 = vst [vmem:[#allocation2 + $0x40] sm:$0xff] %v4973_v17  ;;  %v4858_v8 = vsel %vm4728_vm7, %v4857_v9, %v4856_v4  ;;  %v4296_v43 = vrot.slane %v8808_v40, 5  ;;  %v4297_v23 = vrot.slane %v8808_v40, 6  ;;  %v4298_v28 = vrot.slane %v8808_v40, 7 }
 0x3fe   : >> { %v4860_v55 = vsel %vm4731_vm13, %v4859_v61, %v4858_v8  ;;  %v4863_v30 = vrot.slane %v4541_v22, 1  ;;  %v4543_v14 = vmul.f32 %v4292_v21, %v8475_v52  ;;  %v4544_v20 = vmul.f32 %v4293_v37, %v8477_v47  ;;  %v8874_v47 = vpop.permute.xlu1 %2260  ;;  %v8882_v22 = vpop.permute.xlu0 %2256  ;;  %v9888_v21 = vld [vmem:[#allocation34_spill] sm:$0xff]  ;;  %v9889_v37 = vld [vmem:[#allocation103_spill] sm:$0xff] }
 0x3ff   : >> { %vm2622_vm15 = vcmp.eq.s32.totalorder %v8812_v44, %v9858_v24  ;;  %v4862_v2 = vsel %vm4734_vm10, %v4861_v62, %v4860_v55  ;;  %v4545_v13 = vmul.f32 %v4294_v11, %v8479_v25  ;;  %v4546_v0 = vmul.f32 %v4295_v26, %v8492_v48  ;;  %v9890_v26 = vld [vmem:[#allocation36_spill] sm:$0xff]  ;;  %v9892_v55 = vld [vmem:[#allocation39_spill] sm:$0xff] }
 0x400   : >> { %v4547_v49 = vmul.f32 %v4296_v43, %v8494_v6  ;;  %v4864_v18 = vsel %vm4737_vm4, %v4863_v30, %v4862_v2  ;;  %v4542_v7 = vmul.f32 %v8808_v40, %v8473_v38  ;;  %v4548_v52 = vmul.f32 %v4297_v23, %v8496_v29  ;;  %v9894_v2 = vld [vmem:[#allocation30_spill] sm:$0xff] }
 0x401   : >> { %v4865_v5 = vrot.slane %v4543_v14, 7  ;;  %v4974_v10 = vadd.f32 %v4864_v18, %v4166_v57  ;;  %v4549_v27 = vmul.f32 %v4298_v28, %v8500_v56  ;;  %v4867_v60 = vrot.slane %v4544_v20, 6  ;;  %v9891_v28 = vld [vmem:[#allocation105_spill] sm:$0xff]  ;;  %v9893_v14 = vld [vmem:[#allocation40_spill] sm:$0xff] }
 0x402   : >> { %v4869_v3 = vrot.slane %v4545_v13, 5  ;;  %v4871_v48 = vrot.slane %v4546_v0, 4  ;;  %v4873_v1 = vrot.slane %v4547_v49, 3  ;;  %v4875_v6 = vrot.slane %v4548_v52, 2  ;;  %v8895_v43 = vpop.permute.xlu1 %2315 }
 0x403   : >> { %v4866_v25 = vsel %vm4719_vm2, %v4865_v5, %v4542_v7  ;;  %4990 = vst [vmem:[#allocation2 + $0x48] sm:$0xff] %v4974_v10  ;;  %v4299_v38 = vrot.slane %v8817_v32, 1  ;;  %v4300_v29 = vrot.slane %v8817_v32, 2  ;;  %v4301_v40 = vrot.slane %v8817_v32, 3  ;;  %v8917_v10 = vpop.permute.xlu0 %2311 }
 0x404   : >> { %v4868_v36 = vsel %vm4722_vm8, %v4867_v60, %v4866_v25  ;;  %v4302_v50 = vrot.slane %v8817_v32, 4  ;;  %v4303_v16 = vrot.slane %v8817_v32, 5  ;;  %v4304_v63 = vrot.slane %v8817_v32, 6 }
 0x405   : >> { %v4870_v56 = vsel %vm4725_vm5, %v4869_v3, %v4868_v36  ;;  %v4877_v9 = vrot.slane %v4549_v27, 1  ;;  %v4305_v61 = vrot.slane %v8817_v32, 7  ;;  %v4551_v17 = vmul.f32 %v4299_v38, %v8506_v42 }
 0x406   : >> { %v4872_v15 = vsel %vm4728_vm7, %v4871_v48, %v4870_v56  ;;  %v4552_v4 = vmul.f32 %v4300_v29, %v9888_v21  ;;  %v4553_v11 = vmul.f32 %v4301_v40, %v9889_v37  ;;  %v4554_v8 = vmul.f32 %v4302_v50, %v9890_v26  ;;  %v8924_v36 = vpop.permute.xlu1 %2348  ;;  %v4168_v50 = vld [vmem:[#allocation2 + $0x58] sm:$0xff] }
 0x407   : >> { %v4874_v62 = vsel %vm4731_vm13, %v4873_v1, %v4872_v15  ;;  %v4555_v57 = vmul.f32 %v4303_v16, %v9891_v28  ;;  %v4556_v30 = vmul.f32 %v4304_v63, %v9892_v55  ;;  %v4557_v20 = vmul.f32 %v4305_v61, %v9893_v14  ;;  %v9895_v63 = vld [vmem:[#allocation43_spill] sm:$0xff]  ;;  %v9900_v28 = vld [vmem:[#allocation49_spill] sm:$0xff] }
 0x408   : >> { %v4876_v23 = vsel %vm4734_vm10, %v4875_v6, %v4874_v62  ;;  %v4550_v13 = vmul.f32 %v8817_v32, %v9894_v2  ;;  %v4879_v0 = vrot.slane %v4551_v17, 7  ;;  %v4881_v49 = vrot.slane %v4552_v4, 6  ;;  %v9896_v17 = vld [vmem:[#allocation46_spill] sm:$0xff]  ;;  %v9897_v62 = vld [vmem:[#allocation47_spill] sm:$0xff]  ;;  %v9898_v4 = vld [vmem:[#allocation48_spill] sm:$0xff] }
 0x409   : >> { %v4878_v42 = vsel %vm4737_vm4, %v4877_v9, %v4876_v23  ;;  %v8905_v7 = vadd.f32 1e-12, %v8719_v31  ;;  %v8909_v52 = vadd.f32 %v8772_v54, %v8769_v59  ;;  %v8915_v5 = vsel %vm2622_vm15, 1.0, %v9864_v58  ;;  %v9902_v2 = vld [vmem:[#allocation51_spill] sm:$0xff] }
 0x40a   : >> { %v4975_v18 = vadd.f32 %v4878_v42, %v4167_v39  ;;  %v4880_v32 = vsel %vm4719_vm2, %v4879_v0, %v4550_v13  ;;  %v4883_v27 = vrot.slane %v4553_v11, 5  ;;  %v4885_v60 = vrot.slane %v4554_v8, 4  ;;  %v8937_v11 = vpop.permute.xlu0 %2344  ;;  %v9899_v8 = vld [vmem:[#allocation42_spill] sm:$0xff] }
 0x40b   : >> { %v4199_v31 = vmul.f32 %v8785_v19, %v8482_v33  ;;  %v4882_v3 = vsel %vm4722_vm8, %v4881_v49, %v4880_v32  ;;  %v4887_v59 = vrot.slane %v4555_v57, 3  ;;  %v4889_v54 = vrot.slane %v4556_v30, 2  ;;  %v9901_v30 = vld [vmem:[#allocation50_spill] sm:$0xff]  ;;  %v8949_v32 = vpop.permute.xlu1 %2271 }
 0x40c   : >> { %4991 = vst [vmem:[#allocation2 + $0x50] sm:$0xff] %v4975_v18  ;;  %v4891_v25 = vrot.slane %v4557_v20, 1  ;;  %v4884_v48 = vsel %vm4725_vm5, %v4883_v27, %v4882_v3  ;;  %v4201_v9 = vmul.f32 %v8791_v41, %v8482_v33  ;;  %vm2623_vm11 = vcmp.eq.s32.totalorder %v8830_v35, %v9858_v24 }
 0x40d   : >> { %v4306_v44 = vrot.slane %v4199_v31, 1  ;;  %v4307_v1 = vrot.slane %v4199_v31, 2  ;;  %v4308_v6 = vrot.slane %v4199_v31, 3  ;;  %v4886_v38 = vsel %vm4728_vm7, %v4885_v60, %v4884_v48 }
 0x40e   : >> { %v4309_v29 = vrot.slane %v4199_v31, 4  ;;  %v4310_v40 = vrot.slane %v4199_v31, 5  ;;  %v4311_v56 = vrot.slane %v4199_v31, 6  ;;  %v4888_v19 = vsel %vm4731_vm13, %v4887_v59, %v4886_v38  ;;  %v9903_v38 = vld [vmem:[#allocation54_spill] sm:$0xff] }
 0x40f   : >> { %v4312_v16 = vrot.slane %v4199_v31, 7  ;;  %v4559_v15 = vmul.f32 %v4306_v44, %v9895_v63  ;;  %v4890_v61 = vsel %vm4734_vm10, %v4889_v54, %v4888_v19  ;;  %v4560_v39 = vmul.f32 %v4307_v1, %v9896_v17 }
 0x410   : >> { %v4561_v21 = vmul.f32 %v4308_v6, %v9897_v62  ;;  %v4562_v37 = vmul.f32 %v4309_v29, %v9898_v4  ;;  %v4892_v26 = vsel %vm4737_vm4, %v4891_v25, %v4890_v61  ;;  %v4558_v23 = vmul.f32 %v4199_v31, %v9899_v8  ;;  %v8955_v29 = vpop.permute.xlu0 %2267  ;;  %v9904_v61 = vld [vmem:[#allocation53_spill] sm:$0xff]  ;;  %v8965_v8 = vpop.permute.xlu1 %2359 }
 0x411   : >> { %v4563_v57 = vmul.f32 %v4310_v40, %v9900_v28  ;;  %v4010_v41 = vrot.slane %v8909_v52, 4  ;;  %v4976_v55 = vadd.f32 %v4892_v26, %v4168_v50  ;;  %v4564_v14 = vmul.f32 %v4311_v56, %v9901_v30  ;;  %v9907_v28 = vld [vmem:[#allocation63_spill] sm:$0xff] }
 0x412   : >> { %v4893_v20 = vrot.slane %v4559_v15, 7  ;;  %v4895_v42 = vrot.slane %v4560_v39, 6  ;;  %v4565_v13 = vmul.f32 %v4312_v16, %v9902_v2  ;;  %v4897_v0 = vrot.slane %v4561_v21, 5  ;;  %v4169_v16 = vld [vmem:[#allocation2 + $0x60] sm:$0xff] }
 0x413   : >> { %v4899_v49 = vrot.slane %v4562_v37, 4  ;;  %v8947_v18 = vmul.f32 %v8827_v53, %v8482_v33  ;;  %4992 = vst [vmem:[#allocation2 + $0x58] sm:$0xff] %v4976_v55  ;;  %v4313_v60 = vrot.slane %v4201_v9, 1  ;;  %v4314_v31 = vrot.slane %v4201_v9, 2  ;;  %v9905_v21 = vld [vmem:[#allocation56_spill] sm:$0xff] }
 0x414   : >> { %v4894_v27 = vsel %vm4719_vm2, %v4893_v20, %v4558_v23  ;;  %v4315_v3 = vrot.slane %v4201_v9, 3  ;;  %v4901_v54 = vrot.slane %v4563_v57, 3  ;;  %v4316_v25 = vrot.slane %v4201_v9, 4  ;;  %v9906_v23 = vld [vmem:[#allocation59_spill] sm:$0xff] }
 0x415   : >> { %v4896_v59 = vsel %vm4722_vm8, %v4895_v42, %v4894_v27  ;;  %v4317_v48 = vrot.slane %v4201_v9, 5  ;;  %v4903_v1 = vrot.slane %v4564_v14, 2  ;;  %v4318_v6 = vrot.slane %v4201_v9, 6 }
 0x416   : >> { %v4898_v44 = vsel %vm4725_vm5, %v4897_v0, %v4896_v59  ;;  %v4567_v53 = vmul.f32 %v4313_v60, %v9903_v38  ;;  %v4319_v56 = vrot.slane %v4201_v9, 7  ;;  %v4568_v50 = vmul.f32 %v4314_v31, %v8745_v51  ;;  %v9908_v60 = vld [vmem:[#allocation65_spill] sm:$0xff] }
 0x417   : >> { %v4900_v40 = vsel %vm4728_vm7, %v4899_v49, %v4898_v44  ;;  %v4569_v19 = vmul.f32 %v4315_v3, %v8750_v12  ;;  %v4905_v15 = vrot.slane %v4565_v13, 1  ;;  %v4566_v17 = vmul.f32 %v4201_v9, %v9904_v61  ;;  %v4170_v3 = vld [vmem:[#allocation2 + $0x68] sm:$0xff]  ;;  %v9909_v44 = vld [vmem:[#allocation64_spill] sm:$0xff] }
 0x418   : >> { %v4902_v63 = vsel %vm4731_vm13, %v4901_v54, %v4900_v40  ;;  %v4570_v39 = vmul.f32 %v4316_v25, %v8753_v34  ;;  %v4571_v4 = vmul.f32 %v4317_v48, %v9905_v21  ;;  %v4907_v37 = vrot.slane %v4567_v53, 7  ;;  %v2283_v25 = vpop.permute.xlu1 %2282 }
 0x419   : >> { %v4904_v62 = vsel %vm4734_vm10, %v4903_v1, %v4902_v63  ;;  %v4909_v26 = vrot.slane %v4568_v50, 6  ;;  %v4572_v12 = vmul.f32 %v4318_v6, %v9906_v23  ;;  %5996 = vrcp.f32 %v8905_v7  ;;  %v8980_v7 = vpop.permute.xlu0 %2355 }
 0x41a   : >> { %v4906_v51 = vsel %vm4737_vm4, %v4905_v15, %v4904_v62  ;;  %v5789_v9 = vsel %vm2623_vm11, 1.0, %v9864_v58  ;;  %v4573_v57 = vmul.f32 %v4319_v56, %v9907_v28  ;;  %v4908_v55 = vsel %vm4719_vm2, %v4907_v37, %v4566_v17 }
 0x41b   : >> { %v4977_v34 = vadd.f32 %v4906_v51, %v4169_v16  ;;  %v4911_v30 = vrot.slane %v4569_v19, 5  ;;  %v4910_v14 = vsel %vm4722_vm8, %v4909_v26, %v4908_v55  ;;  %v4913_v20 = vrot.slane %v4570_v39, 4 }
 0x41c   : >> { %v4320_v42 = vrot.slane %v8947_v18, 1  ;;  %vm2639_vm14 = vcmp.eq.s32.totalorder %v8847_v45, %v9858_v24  ;;  %v4915_v2 = vrot.slane %v4571_v4, 3  ;;  %v4011_v13 = vadd.f32 %v4010_v41, %v8909_v52  ;;  %v2371_v63 = vpop.permute.xlu1 %2370 }
 0x41d   : >> { %4993 = vst [vmem:[#allocation2 + $0x60] sm:$0xff] %v4977_v34  ;;  %v4912_v35 = vsel %vm4725_vm5, %v4911_v30, %v4910_v14  ;;  %vm2638_vm1 = vcmp.eq.s32.totalorder %v8859_v46, %v9858_v24  ;;  %v4917_v49 = vrot.slane %v4572_v12, 2  ;;  %v3960_v27 = vadd.f32 %v5789_v9, %v8915_v5  ;;  %v2279_v56 = vpop.permute.xlu0 %2278 }
 0x41e   : >> { %v4914_v0 = vsel %vm4728_vm7, %v4913_v20, %v4912_v35  ;;  %v4575_v31 = vmul.f32 %v4320_v42, %v9908_v60  ;;  %v4919_v54 = vrot.slane %v4573_v57, 1  ;;  %v4574_v52 = vmul.f32 %v8947_v18, %v9909_v44 }
 0x41f   : >> { %v4916_v59 = vsel %vm4731_vm13, %v4915_v2, %v4914_v0  ;;  %v4012_v1 = vrot.slane %v4011_v13, 2  ;;  %v5805_v5 = vsel %vm2639_vm14, 1.0, %v9864_v58  ;;  %v5804_v6 = vsel %vm2638_vm1, 1.0, %v9864_v58 }
 0x420   : >> { %v4918_v48 = vsel %vm4734_vm10, %v4917_v49, %v4916_v59  ;;  %v4921_v41 = vrot.slane %v4575_v31, 7  ;;  %v3961_v53 = vrot.slane %v3960_v27, 4  ;;  %v4016_v19 = vadd.f32 %v5805_v5, %v5804_v6  ;;  %v2294_v21 = vpop.permute.xlu1 %2293 }
 0x421   : >> { %v4920_v46 = vsel %vm4737_vm4, %v4919_v54, %v4918_v48  ;;  %v4013_v16 = vadd.f32 %v4012_v1, %v4011_v13  ;;  %vm2625_vm6 = vcmp.eq.s32.totalorder %v8874_v47, %v9858_v24  ;;  %vm2624_vm3 = vcmp.eq.s32.totalorder %v8882_v22, %v9858_v24  ;;  %v2367_v47 = vpop.permute.xlu0 %2366 }
 0x422   : >> { %v4978_v38 = vadd.f32 %v4920_v46, %v4170_v3  ;;  %v9000_v40 = vsel %vm4719_vm2, %v4921_v41, %v4574_v52  ;;  %v3962_v15 = vadd.f32 %v3961_v53, %v3960_v27  ;;  %vm2635_vm9 = vcmp.eq.s32.totalorder %v8895_v43, %v9858_v24 }
 0x423   : >> { %v5997_v50 = vpop.eup %5996  ;;  %vm2634_vm12 = vcmp.eq.s32.totalorder %v8917_v10, %v9858_v24  ;;  %v4017_v61 = vrot.slane %v4016_v19, 4  ;;  %v5791_v17 = vsel %vm2625_vm6, 1.0, %v9864_v58  ;;  %vm2627_vm0 = vcmp.eq.s32.totalorder %v8949_v32, %v9858_v24 }
 0x424   : >> { %4994 = vst [vmem:[#allocation2 + $0x68] sm:$0xff] %v4978_v38  ;;  %v9007_v45 = vmul.f32 %v5997_v50, %v8482_v33  ;;  %vm2626_vm15 = vcmp.eq.s32.totalorder %v8955_v29, %v9858_v24  ;;  %v4014_v22 = vrot.slane %v4013_v16, 1  ;;  %v5790_v33 = vsel %vm2624_vm3, 1.0, %v9864_v58  ;;  %v2382_v35 = vpop.permute.xlu1 %2381 }
 0x425   : >> { %vm2641_vm11 = vcmp.eq.s32.totalorder %v8924_v36, %v9858_v24  ;;  %vm2640_vm14 = vcmp.eq.s32.totalorder %v8937_v11, %v9858_v24  ;;  %v3963_v43 = vrot.slane %v3962_v15, 2  ;;  %v5801_v10 = vsel %vm2635_vm9, 1.0, %v9864_v58  ;;  %v2290_v34 = vpop.permute.xlu0 %2289 }
 0x426   : >> { %v5800_v39 = vsel %vm2634_vm12, 1.0, %v9864_v58  ;;  %v4327_v32 = vrot.slane %v9007_v45, 1  ;;  %v5793_v62 = vsel %vm2627_vm0, 1.0, %v9864_v58  ;;  %v5792_v29 = vsel %vm2626_vm15, 1.0, %v9864_v58 }
 0x427   : >> { %vm2643_vm1 = vcmp.eq.s32.totalorder %v8965_v8, %v9858_v24  ;;  %v4018_v4 = vadd.f32 %v4017_v61, %v4016_v19  ;;  %v3967_v36 = vadd.f32 %v5791_v17, %v5790_v33  ;;  %v5807_v37 = vsel %vm2641_vm11, 1.0, %v9864_v58 }
 0x428   : >> { %v5806_v11 = vsel %vm2640_vm14, 1.0, %v9864_v58  ;;  %v4015_v26 = vadd.f32 %v4014_v22, %v4013_v16  ;;  %v4002_v51 = vadd.f32 %v5801_v10, %v5800_v39  ;;  %vm2642_vm6 = vcmp.eq.s32.totalorder %v8980_v7, %v9858_v24  ;;  %v2305_v19 = vpop.permute.xlu1 %2304 }
 0x429   : >> { %vm2629_vm3 = vcmp.eq.s32.totalorder %v2283_v25, %v9858_v24  ;;  %v3964_v23 = vadd.f32 %v3963_v43, %v3962_v15  ;;  %v3974_v12 = vadd.f32 %v5793_v62, %v5792_v29  ;;  %v5809_v9 = vsel %vm2643_vm1, 1.0, %v9864_v58  ;;  %v2378_v48 = vpop.permute.xlu0 %2377 }
 0x42a   : >> { %v5808_v8 = vsel %vm2642_vm6, 1.0, %v9864_v58  ;;  %v4023_v28 = vadd.f32 %v5807_v37, %v5806_v11  ;;  %v5795_v57 = vsel %vm2629_vm3, 1.0, %v9864_v58  ;;  %v4019_v55 = vrot.slane %v4018_v4, 2 }
 0x42b   : >> { %v3968_v30 = vrot.slane %v3967_v36, 4  ;;  %vm2628_vm9 = vcmp.eq.s32.totalorder %v2279_v56, %v9858_v24  ;;  %vm2645_vm12 = vcmp.eq.s32.totalorder %v2371_v63, %v9858_v24  ;;  %v9040_v14 = vmul.f32 %v4327_v32, %v4015_v26 }
 0x42c   : >> { %v4003_v20 = vrot.slane %v4002_v51, 4  ;;  %v4030_v42 = vadd.f32 %v5809_v9, %v5808_v8  ;;  %v5794_v7 = vsel %vm2628_vm9, 1.0, %v9864_v58  ;;  %v4321_v2 = vrot.slane %v8947_v18, 2 }
 0x42d   : >> { %v3965_v13 = vrot.slane %v3964_v23, 1  ;;  %v3975_v0 = vrot.slane %v3974_v12, 4  ;;  %v3981_v49 = vadd.f32 %v5795_v57, %v5794_v7  ;;  %v4328_v27 = vrot.slane %v9007_v45, 2  ;;  %v2301_v39 = vpop.permute.xlu0 %2300 }
 0x42e   : >> { %v4322_v60 = vrot.slane %v8947_v18, 3  ;;  %v4024_v31 = vrot.slane %v4023_v28, 4  ;;  %v5811_v3 = vsel %vm2645_vm12, 1.0, %v9864_v58  ;;  %v4020_v59 = vadd.f32 %v4019_v55, %v4018_v4 }
 0x42f   : >> { %v3969_v54 = vadd.f32 %v3968_v30, %v3967_v36  ;;  %v3982_v25 = vrot.slane %v3981_v49, 4  ;;  %vm2644_vm0 = vcmp.eq.s32.totalorder %v2367_v47, %v9858_v24  ;;  %v4935_v44 = vrot.slane %v9040_v14, 7 }
 0x430   : >> { %v4004_v52 = vadd.f32 %v4003_v20, %v4002_v51  ;;  %v4031_v41 = vrot.slane %v4030_v42, 4  ;;  %v5810_v46 = vsel %vm2644_vm0, 1.0, %v9864_v58  ;;  %v3966_v1 = vadd.f32 %v3965_v13, %v3964_v23  ;;  %v2393_v23 = vpop.permute.xlu1 %2392 }
 0x431   : >> { %v3976_v5 = vadd.f32 %v3975_v0, %v3974_v12  ;;  %v4037_v6 = vadd.f32 %v5811_v3, %v5810_v46  ;;  %vm2631_vm15 = vcmp.eq.s32.totalorder %v2294_v21, %v9858_v24  ;;  %v4329_v38 = vrot.slane %v9007_v45, 3  ;;  %v2389_v7 = vpop.permute.xlu0 %2388 }
 0x432   : >> { %v4025_v53 = vadd.f32 %v4024_v31, %v4023_v28  ;;  %v3983_v56 = vadd.f32 %v3982_v25, %v3981_v49  ;;  %v5797_v50 = vsel %vm2631_vm15, 1.0, %v9864_v58  ;;  %v4021_v16 = vrot.slane %v4020_v59, 1 }
 0x433   : >> { %v3970_v63 = vrot.slane %v3969_v54, 2  ;;  %v4038_v15 = vrot.slane %v4037_v6, 4  ;;  %vm2630_vm11 = vcmp.eq.s32.totalorder %v2290_v34, %v9858_v24  ;;  %v4005_v61 = vrot.slane %v4004_v52, 2 }
 0x434   : >> { %v4032_v17 = vadd.f32 %v4031_v41, %v4030_v42  ;;  %v5796_v47 = vsel %vm2630_vm11, 1.0, %v9864_v58  ;;  %vm2647_vm14 = vcmp.eq.s32.totalorder %v2382_v35, %v9858_v24  ;;  %v9056_v22 = vmul.f32 %v4321_v2, %v3966_v1 }
 0x435   : >> { %v3977_v33 = vrot.slane %v3976_v5, 2  ;;  %v4039_v43 = vadd.f32 %v4038_v15, %v4037_v6  ;;  %v3988_v10 = vadd.f32 %v5797_v50, %v5796_v47  ;;  %v4026_v32 = vrot.slane %v4025_v53, 2 }
 0x436   : >> { %v3984_v62 = vrot.slane %v3983_v56, 2  ;;  %v5813_v29 = vsel %vm2647_vm14, 1.0, %v9864_v58  ;;  %vm2646_vm1 = vcmp.eq.s32.totalorder %v2378_v48, %v9858_v24  ;;  %v4022_v21 = vadd.f32 %v4021_v16, %v4020_v59 }
 0x437   : >> { %v3971_v4 = vadd.f32 %v3970_v63, %v3969_v54  ;;  %v4323_v36 = vrot.slane %v8947_v18, 4  ;;  %v3989_v37 = vrot.slane %v3988_v10, 4  ;;  %v4006_v11 = vadd.f32 %v4005_v61, %v4004_v52 }
 0x438   : >> { %v4033_v26 = vrot.slane %v4032_v17, 2  ;;  %v5812_v51 = vsel %vm2646_vm1, 1.0, %v9864_v58  ;;  %vm2633_vm6 = vcmp.eq.s32.totalorder %v2305_v19, %v9858_v24  ;;  %v3978_v12 = vadd.f32 %v3977_v33, %v3976_v5 }
 0x439   : >> { %v4040_v9 = vrot.slane %v4039_v43, 2  ;;  %v3990_v8 = vadd.f32 %v3989_v37, %v3988_v10  ;;  %v4044_v34 = vadd.f32 %v5813_v29, %v5812_v51  ;;  %v4923_v28 = vrot.slane %v9056_v22, 6 }
 0x43a   : >> { %v4027_v57 = vadd.f32 %v4026_v32, %v4025_v53  ;;  %v3985_v55 = vadd.f32 %v3984_v62, %v3983_v56  ;;  %vm2632_vm3 = vcmp.eq.s32.totalorder %v2301_v39, %v9858_v24  ;;  %v5799_v42 = vsel %vm2633_vm6, 1.0, %v9864_v58 }
 0x43b   : >> { %v3991_v30 = vrot.slane %v3990_v8, 2  ;;  %v4045_v20 = vrot.slane %v4044_v34, 4  ;;  %vm2649_vm9 = vcmp.eq.s32.totalorder %v2393_v23, %v9858_v24  ;;  %v3972_v35 = vrot.slane %v3971_v4, 1 }
 0x43c   : >> { %v4007_v2 = vrot.slane %v4006_v11, 1  ;;  %v4034_v13 = vadd.f32 %v4033_v26, %v4032_v17  ;;  %v5798_v0 = vsel %vm2632_vm3, 1.0, %v9864_v58  ;;  %v3979_v49 = vrot.slane %v3978_v12, 1 }
 0x43d   : >> { %v4041_v31 = vadd.f32 %v4040_v9, %v4039_v43  ;;  %v3992_v3 = vadd.f32 %v3991_v30, %v3990_v8  ;;  %v4046_v59 = vadd.f32 %v4045_v20, %v4044_v34  ;;  %v3986_v54 = vrot.slane %v3985_v55, 1 }
 0x43e   : >> { %v3995_v25 = vadd.f32 %v5799_v42, %v5798_v0  ;;  %v5815_v48 = vsel %vm2649_vm9, 1.0, %v9864_v58  ;;  %vm2648_vm12 = vcmp.eq.s32.totalorder %v2389_v7, %v9858_v24  ;;  %v4584_v52 = vmul.f32 %v4328_v27, %v4022_v21 }
 0x43f   : >> { %v4028_v41 = vrot.slane %v4027_v57, 1  ;;  %v3993_v46 = vrot.slane %v3992_v3, 1  ;;  %v4047_v1 = vrot.slane %v4046_v59, 2  ;;  %v3973_v5 = vadd.f32 %v3972_v35, %v3971_v4 }
 0x440   : >> { %v4035_v6 = vrot.slane %v4034_v13, 1  ;;  %v3996_v53 = vrot.slane %v3995_v25, 4  ;;  %v5814_v56 = vsel %vm2648_vm12, 1.0, %v9864_v58  ;;  %v3980_v50 = vadd.f32 %v3979_v49, %v3978_v12 }
 0x441   : >> { %v4042_v19 = vrot.slane %v4041_v31, 1  ;;  %v4048_v16 = vadd.f32 %v4047_v1, %v4046_v59  ;;  %v4051_v63 = vadd.f32 %v5815_v48, %v5814_v56  ;;  %v4008_v15 = vadd.f32 %v4007_v2, %v4006_v11 }
 0x442   : >> { %v4330_v61 = vrot.slane %v9007_v45, 4  ;;  %v3987_v17 = vadd.f32 %v3986_v54, %v3985_v55  ;;  %v3997_v24 = vadd.f32 %v3996_v53, %v3995_v25  ;;  %v4029_v47 = vadd.f32 %v4028_v41, %v4027_v57 }
 0x443   : >> { %v3994_v22 = vadd.f32 %v3993_v46, %v3992_v3  ;;  %v4049_v27 = vrot.slane %v4048_v16, 1  ;;  %v4052_v33 = vrot.slane %v4051_v63, 4  ;;  %v4577_v43 = vmul.f32 %v4322_v60, %v3973_v5 }
 0x444   : >> { %v4036_v10 = vadd.f32 %v4035_v6, %v4034_v13  ;;  %v4324_v39 = vrot.slane %v8947_v18, 5  ;;  %v3998_v58 = vrot.slane %v3997_v24, 2  ;;  %v4578_v32 = vmul.f32 %v4323_v36, %v3980_v50  ;;  %v4172_v50 = vld [vmem:[#allocation2 + $0x78] sm:$0xff] }
 0x445   : >> { %v4043_v62 = vadd.f32 %v4042_v19, %v4041_v31  ;;  %v4325_v29 = vrot.slane %v8947_v18, 6  ;;  %v4053_v21 = vadd.f32 %v4052_v33, %v4051_v63  ;;  %v4582_v4 = vmul.f32 %v9007_v45, %v4008_v15  ;;  %v5005_v33 = vld [vmem:[#allocation2 + $0x40] sm:$0xff] (%p900_p0) }
 0x446   : >> { %v4579_v37 = vmul.f32 %v4324_v39, %v3987_v17  ;;  %v4050_v11 = vadd.f32 %v4049_v27, %v4048_v16  ;;  %v3999_v26 = vadd.f32 %v3998_v58, %v3997_v24  ;;  %v4585_v51 = vmul.f32 %v4329_v38, %v4029_v47  ;;  %v5999_v17 = vld [vmem:[%s9310_s2 + $0x8] sm:$0xff] (%p900_p0)   ;;  %v6000_v24 = vld [vmem:[%s9310_s2 + $0x10] sm:$0xff] (%p900_p0)   ;;  %v6001_v47 = vld [vmem:[%s9310_s2 + $0x18] sm:$0xff] (%p900_p0)  }
 0x447   : >> { %v4331_v23 = vrot.slane %v9007_v45, 5  ;;  %v4580_v60 = vmul.f32 %v4325_v29, %v3994_v22  ;;  %v4054_v12 = vrot.slane %v4053_v21, 2  ;;  %v4925_v9 = vrot.slane %v4577_v43, 5  ;;  %v4997_v22 = vld [vmem:[#allocation2] sm:$0xff] (%p900_p0)  ;;  %v4998_v27 = vld [vmem:[#allocation2 + $0x8] sm:$0xff] (%p900_p0)  ;;  %v6005_v29 = vld [vmem:[%s9310_s2 + $0x38] sm:$0xff] (%p900_p0)  }
 0x448   : >> { %v4586_v8 = vmul.f32 %v4330_v61, %v4036_v10  ;;  %v4332_v36 = vrot.slane %v9007_v45, 6  ;;  %v4000_v34 = vrot.slane %v3999_v26, 1  ;;  %v4924_v57 = vsel %vm4722_vm8, %v4923_v28, %v9000_v40  ;;  %v5998_v61 = vld [vmem:[%s9310_s2] sm:$0xff] (%p900_p0)   ;;  %v5006_v10 = vld [vmem:[#allocation2 + $0x48] sm:$0xff] (%p900_p0) }
 0x449   : >> { %v4927_v55 = vrot.slane %v4578_v32, 4  ;;  %v4587_v30 = vmul.f32 %v4331_v23, %v4043_v62  ;;  %v4055_v20 = vadd.f32 %v4054_v12, %v4053_v21  ;;  %v4929_v42 = vrot.slane %v4579_v37, 3  ;;  %5864 = vmatprep.subr.bf16.mxu0 (%p900_p0), %v5998_v61  ;;  %5896 = vmatprep.subr.bf16.mxu1 (%p900_p0), %v5998_v61  ;;  %v6002_v58 = vld [vmem:[%s9310_s2 + $0x20] sm:$0xff] (%p900_p0)   ;;  %v6003_v32 = vld [vmem:[%s9310_s2 + $0x28] sm:$0xff] (%p900_p0)   ;;  %v6004_v62 = vld [vmem:[%s9310_s2 + $0x30] sm:$0xff] (%p900_p0)  }
 0x44a   : >> { %v4588_v7 = vmul.f32 %v4332_v36, %v4050_v11  ;;  %v4326_v35 = vrot.slane %v8947_v18, 7  ;;  %v4001_v38 = vadd.f32 %v4000_v34, %v3999_v26  ;;  %v4936_v2 = vsel %vm4719_vm2, %v4935_v44, %v4582_v4  ;;  %v4171_v44 = vld [vmem:[#allocation2 + $0x70] sm:$0xff]  ;;  %5865 = vmatpush3.bf16.msra.mxu0 (%p900_p0), %v5998_v61  ;;  %5904 = vmatpush3.bf16.msra.mxu1 (%p900_p0), %v5998_v61  ;;  %v5000_v4 = vld [vmem:[#allocation2 + $0x18] sm:$0xff] (%p900_p0)  ;;  %v5001_v26 = vld [vmem:[#allocation2 + $0x20] sm:$0xff] (%p900_p0) }
 0x44b   : >> { %v4939_v13 = vrot.slane %v4585_v51, 5  ;;  %v4931_v0 = vrot.slane %v4580_v60, 2  ;;  %v4056_v49 = vrot.slane %v4055_v20, 1  ;;  %v4937_v31 = vrot.slane %v4584_v52, 6  ;;  %5866 = vmatprep.subr.bf16.mxu0 (%p900_p0), %v5999_v17  ;;  %5897 = vmatprep.subr.bf16.mxu1 (%p900_p0), %v5999_v17  ;;  %v4999_v21 = vld [vmem:[#allocation2 + $0x10] sm:$0xff] (%p900_p0)  ;;  %v5008_v11 = vld [vmem:[#allocation2 + $0x58] sm:$0xff] (%p900_p0) }
 0x44c   : >> { %v4926_v3 = vsel %vm4725_vm5, %v4925_v9, %v4924_v57  ;;  %v4941_v59 = vrot.slane %v4586_v8, 4  ;;  %v4581_v40 = vmul.f32 %v4326_v35, %v4001_v38  ;;  %v4943_v54 = vrot.slane %v4587_v30, 3  ;;  %v5007_v37 = vld [vmem:[#allocation2 + $0x50] sm:$0xff] (%p900_p0)  ;;  %v5002_v51 = vld [vmem:[#allocation2 + $0x28] sm:$0xff] (%p900_p0)  ;;  %v5009_v23 = vld [vmem:[#allocation2 + $0x60] sm:$0xff] (%p900_p0) }
 0x44d   : >> { %v4928_v28 = vsel %vm4728_vm7, %v4927_v55, %v4926_v3  ;;  %v4333_v25 = vrot.slane %v9007_v45, 7  ;;  %v4057_v48 = vadd.f32 %v4056_v49, %v4055_v20  ;;  %v4938_v18 = vsel %vm4722_vm8, %v4937_v31, %v4936_v2  ;;  %v5010_v60 = vld [vmem:[#allocation2 + $0x68] sm:$0xff] (%p900_p0)  ;;  %v5003_v34 = vld [vmem:[#allocation2 + $0x30] sm:$0xff] (%p900_p0)  ;;  %v5004_v57 = vld [vmem:[#allocation2 + $0x38] sm:$0xff] (%p900_p0) }
 0x44e   : >> { %v4930_v14 = vsel %vm4731_vm13, %v4929_v42, %v4928_v28  ;;  %v4945_v41 = vrot.slane %v4588_v7, 2  ;;  %v4933_v46 = vrot.slane %v4581_v40, 1  ;;  %v4940_v1 = vsel %vm4725_vm5, %v4939_v13, %v4938_v18  ;;  %5867 = vmatpush3.bf16.msra.mxu0 (%p900_p0), %v5999_v17  ;;  %5905 = vmatpush3.bf16.msra.mxu1 (%p900_p0), %v5999_v17 }
 0x44f   : >> { %v4932_v52 = vsel %vm4734_vm10, %v4931_v0, %v4930_v14  ;;  %v4589_v5 = vmul.f32 %v4333_v25, %v4057_v48  ;;  %v4942_v6 = vsel %vm4728_vm7, %v4941_v59, %v4940_v1  ;;  %5868 = vmatprep.subr.bf16.mxu0 (%p900_p0), %v6000_v24  ;;  %5898 = vmatprep.subr.bf16.mxu1 (%p900_p0), %v6000_v24  ;;  %vm5198_vm2 = vcmask (%p900_p0), 261120  }
 0x450   : >> { %v4934_v53 = vsel %vm4737_vm4, %v4933_v46, %v4932_v52  ;;  %v4944_v56 = vsel %vm4731_vm13, %v4943_v54, %v4942_v6  ;;  %902 = sbr.rel (!%p900_p0) target bundleno = 283 (0x11b), region = 165  ;;  %v5013_v43 = vpack.c.bf16 (%p900_p0), %v4998_v27, %v4997_v22  ;;  %v5017_v39 = vpack.c.bf16 (%p900_p0), %v5006_v10, %v5005_v33 }
 0x451   : >> { %v4979_v45 = vadd.f32 %v4934_v53, %v4171_v44  ;;  %v4947_v19 = vrot.slane %v4589_v5, 1  ;;  %v4946_v16 = vsel %vm4734_vm10, %v4945_v41, %v4944_v56  ;;  %v5014_v12 = vpack.c.bf16 (%p900_p0), %v5000_v4, %v4999_v21 }
 0x452   : > { %5869 = vmatpush3.bf16.msra.mxu0 (%p900_p0), %v6000_v24  ;;  %5906 = vmatpush3.bf16.msra.mxu1 (%p900_p0), %v6000_v24  ;;  %v5018_v9 = vpack.c.bf16 (%p900_p0), %v5008_v11, %v5007_v37  ;;  %v5015_v8 = vpack.c.bf16 (%p900_p0), %v5002_v51, %v5001_v26  ;;  %v5019_v36 = vpack.c.bf16 (%p900_p0), %v5010_v60, %v5009_v23 }
 0x453   : >> { %4995 = vst [vmem:[#allocation2 + $0x70] sm:$0xff] %v4979_v45  ;;  %v4948_v63 = vsel %vm4737_vm4, %v4947_v19, %v4946_v16  ;;  %5870 = vmatprep.subr.bf16.mxu0 (%p900_p0), %v6001_v47  ;;  %5899 = vmatprep.subr.bf16.mxu1 (%p900_p0), %v6001_v47  ;;  %v5016_v20 = vpack.c.bf16 (%p900_p0), %v5004_v57, %v5003_v34 }
 0x454   : >> { %v4980_v15 = vadd.f32 %v4948_v63, %v4172_v50  ;;  %5880 = vmatprep.mubr.bf16.mxu0 (%p900_p0), %v5013_v43  ;;  %5888 = vmatprep.mubr.bf16.mxu1 (%p900_p0), %v5017_v39 }
 0x456   : >> { %4996 = vst [vmem:[#allocation2 + $0x78] sm:$0xff] %v4980_v15  ;;  %5871 = vmatpush3.bf16.msra.mxu0 (%p900_p0), %v6001_v47  ;;  %5907 = vmatpush3.bf16.msra.mxu1 (%p900_p0), %v6001_v47 }
 0x457   : > { %5872 = vmatprep.subr.bf16.mxu0 %v6002_v58  ;;  %5900 = vmatprep.subr.bf16.mxu1 %v6002_v58 }
 0x45a   : > { %5873 = vmatpush3.bf16.msra.mxu0 %v6002_v58  ;;  %5908 = vmatpush3.bf16.msra.mxu1 %v6002_v58  ;;  %v5011_v55 = vld [vmem:[#allocation2 + $0x70] sm:$0xff] }
 0x45b   : > { %5874 = vmatprep.subr.bf16.mxu0 %v6003_v32  ;;  %5901 = vmatprep.subr.bf16.mxu1 %v6003_v32 }
 0x45d   : > { %v5012_v30 = vld [vmem:[#allocation2 + $0x78] sm:$0xff] }
 0x45e   : > { %5875 = vmatpush3.bf16.msra.mxu0 %v6003_v32  ;;  %5909 = vmatpush3.bf16.msra.mxu1 %v6003_v32  ;;  %v5020_v42 = vpack.c.bf16 %v5012_v30, %v5011_v55 }
 0x45f   : > { %5876 = vmatprep.subr.bf16.mxu0 %v6004_v62  ;;  %5902 = vmatprep.subr.bf16.mxu1 %v6004_v62 }
 0x462   : > { %5877 = vmatpush3.bf16.msra.mxu0 %v6004_v62  ;;  %5910 = vmatpush3.bf16.msra.mxu1 %v6004_v62 }
 0x463   : > { %5878 = vmatprep.subr.bf16.mxu0 %v6005_v29  ;;  %5903 = vmatprep.subr.bf16.mxu1 %v6005_v29 }
 0x466   : > { %5879 = vmatpush3.bf16.msra.mxu0 %v6005_v29  ;;  %5911 = vmatpush3.bf16.msra.mxu1 %v6005_v29 }
 0x469   : > { %5881 = vmatmul.mubr.bf16.vlgmr.msra.gmra.mrb[0].mxu0 %v5014_v12  ;;  %5889 = vmatmul.mubr.bf16.vlgmr.msra.gmra.mrb[0].mxu1 %v5018_v9 }
 0x46a   : > { %5884 = vmatprep.mubr.bf16.mxu0 %v5015_v8  ;;  %5892 = vmatprep.mubr.bf16.mxu1 %v5019_v36 }
 0x471   : > { %5885 = vmatmul.mubr.bf16.gmra.mrb[4].mxu0 %v5016_v20  ;;  %5893 = vmatmul.mubr.bf16.gmra.mrb[4].mxu1 %v5020_v42 }
 0x53c   : > { %v5882_v7 = vpop.f32.mrb[0].mxu0  ;;  %v5890_v35 = vpop.f32.mrb[0].mxu1 }
 0x53d   : > { %v5184_v38 = vmul.f32 %v5882_v7, %v5882_v7  ;;  %v5192_v2 = vmul.f32 %v5890_v35, %v5890_v35  ;;  %v5119_v13 = vpop.f32.mrb[1].mxu0  ;;  %v5151_v0 = vpop.f32.mrb[1].mxu1 }
 0x53e   : > { %v5883_v49 = vpop.f32.mrb[2].mxu0  ;;  %v5891_v31 = vpop.f32.mrb[2].mxu1  ;;  %v5182_v3 = vmul.f32 %v5119_v13, %v5119_v13  ;;  %v5190_v48 = vmul.f32 %v5151_v0, %v5151_v0 }
 0x53f   : > { %v5185_v59 = vmul.f32 %v5883_v49, %v5883_v49  ;;  %v5122_v40 = vpop.f32.mrb[3].mxu0  ;;  %v5154_v28 = vpop.f32.mrb[3].mxu1  ;;  %v5229_v54 = vsel %vm5198_vm2, %v5192_v2, 0.0  ;;  %v5205_v25 = vsel %vm5198_vm2, %v5184_v38, 0.0  ;;  %v5193_v18 = vmul.f32 %v5891_v31, %v5891_v31 }
 0x540   : > { %5230 = vadd.xlane.f32.xlu0 %v5229_v54  ;;  %5206 = vadd.xlane.f32.xlu1 %v5205_v25  ;;  %v5199_v14 = vsel %vm5198_vm2, %v5182_v3, 0.0  ;;  %v5183_v53 = vmul.f32 %v5122_v40, %v5122_v40  ;;  %v5191_v56 = vmul.f32 %v5154_v28, %v5154_v28  ;;  %v5223_v45 = vsel %vm5198_vm2, %v5190_v48, 0.0 }
 0x541   : > { %v5208_v41 = vsel %vm5198_vm2, %v5185_v59, 0.0  ;;  %v5232_v50 = vsel %vm5198_vm2, %v5193_v18, 0.0 }
 0x542   : > { %v5226_v61 = vsel %vm5198_vm2, %v5191_v56, 0.0  ;;  %v5202_v17 = vsel %vm5198_vm2, %v5183_v53, 0.0 }
 0x544   : > { %5200 = vadd.xlane.f32.xlu0 %v5199_v14  ;;  %5209 = vadd.xlane.f32.xlu1 %v5208_v41  ;;  %v5886_v44 = vpop.f32.mrb[4].mxu0  ;;  %v5894_v46 = vpop.f32.mrb[4].mxu1 }
 0x545   : > { %v5135_v1 = vpop.f32.mrb[5].mxu0  ;;  %v5167_v52 = vpop.f32.mrb[5].mxu1  ;;  %v5188_v63 = vmul.f32 %v5886_v44, %v5886_v44  ;;  %v5196_v58 = vmul.f32 %v5894_v46, %v5894_v46 }
 0x546   : > { %v5887_v5 = vpop.f32.mrb[6].mxu0  ;;  %v5895_v6 = vpop.f32.mrb[6].mxu1  ;;  %v5186_v24 = vmul.f32 %v5135_v1, %v5135_v1  ;;  %v5194_v33 = vmul.f32 %v5167_v52, %v5167_v52 }
 0x547   : > { %v5138_v19 = vpop.f32.mrb[7].mxu0  ;;  %v5170_v16 = vpop.f32.mrb[7].mxu1  ;;  %v5189_v15 = vmul.f32 %v5887_v5, %v5887_v5  ;;  %v5217_v22 = vsel %vm5198_vm2, %v5188_v63, 0.0  ;;  %v5197_v32 = vmul.f32 %v5895_v6, %v5895_v6  ;;  %v5241_v21 = vsel %vm5198_vm2, %v5196_v58, 0.0 }
 0x548   : > { %5224 = vadd.xlane.f32.xlu0 %v5223_v45  ;;  %5233 = vadd.xlane.f32.xlu1 %v5232_v50  ;;  %v5187_v47 = vmul.f32 %v5138_v19, %v5138_v19  ;;  %v5195_v43 = vmul.f32 %v5170_v16, %v5170_v16  ;;  %v5211_v10 = vsel %vm5198_vm2, %v5186_v24, 0.0  ;;  %v5235_v62 = vsel %vm5198_vm2, %v5194_v33, 0.0 }
 0x549   : > { %v5220_v27 = vsel %vm5198_vm2, %v5189_v15, 0.0  ;;  %v5244_v4 = vsel %vm5198_vm2, %v5197_v32, 0.0 }
 0x54a   : > { %v5214_v39 = vsel %vm5198_vm2, %v5187_v47, 0.0  ;;  %v5238_v29 = vsel %vm5198_vm2, %v5195_v43, 0.0 }
 0x54c   : > { %5227 = vadd.xlane.f32.xlu1 %v5226_v61  ;;  %5203 = vadd.xlane.f32.xlu0 %v5202_v17 }
 0x550   : > { %5218 = vadd.xlane.f32.xlu0 %v5217_v22  ;;  %5221 = vadd.xlane.f32.xlu1 %v5220_v27 }
 0x554   : > { %5212 = vadd.xlane.f32.xlu0 %v5211_v10  ;;  %5215 = vadd.xlane.f32.xlu1 %v5214_v39 }
 0x558   : > { %5236 = vadd.xlane.f32.xlu0 %v5235_v62  ;;  %5239 = vadd.xlane.f32.xlu1 %v5238_v29 }
 0x55c   : > { %5242 = vadd.xlane.f32.xlu0 %v5241_v21  ;;  %5245 = vadd.xlane.f32.xlu1 %v5244_v4 }
 0x5cd   : > { %v5231_v37 = vpop.xlane.xlu0 %5230  ;;  %v5207_v11 = vpop.xlane.xlu1 %5206 }
 0x5ce   : > { %6006 = vrsqrt.f32 %v5231_v37  ;;  %vm5319_vm8 = vcmp.eq.f32.partialorder %v5231_v37, inf  ;;  %vm5321_vm5 = vcmp.eq.f32.partialorder %v5231_v37, 0.0  ;;  %v5322_v57 = vand.u32 2147483648, %v5231_v37 }
 0x5cf   : > { %6008 = vrsqrt.f32 %v5207_v11  ;;  %vm5263_vm7 = vcmp.eq.f32.partialorder %v5207_v11, inf  ;;  %v5266_v20 = vand.u32 2147483648, %v5207_v11  ;;  %vm5265_vm13 = vcmp.eq.f32.partialorder %v5207_v11, 0.0 }
 0x5d1   : > { %v5201_v26 = vpop.xlane.xlu0 %5200  ;;  %v5210_v51 = vpop.xlane.xlu1 %5209 }
 0x5d2   : > { %6010 = vrsqrt.f32 %v5201_v26  ;;  %vm5249_vm10 = vcmp.eq.f32.partialorder %v5201_v26, inf  ;;  %vm5251_vm4 = vcmp.eq.f32.partialorder %v5201_v26, 0.0  ;;  %v5252_v59 = vand.u32 2147483648, %v5201_v26 }
 0x5d3   : > { %6012 = vrsqrt.f32 %v5210_v51  ;;  %vm5270_vm0 = vcmp.eq.f32.partialorder %v5210_v51, inf  ;;  %v5273_v54 = vand.u32 2147483648, %v5210_v51  ;;  %vm5272_vm15 = vcmp.eq.f32.partialorder %v5210_v51, 0.0 }
 0x5d5   : > { %v9144_v23 = vpop.xlane.xlu0 %5224  ;;  %v9146_v60 = vpop.xlane.xlu1 %5233 }
 0x5d6   : > { %6014 = vrsqrt.f32 %v9144_v23  ;;  %vm5305_vm11 = vcmp.eq.f32.partialorder %v9144_v23, inf  ;;  %vm5307_vm14 = vcmp.eq.f32.partialorder %v9144_v23, 0.0  ;;  %v5308_v6 = vand.u32 2147483648, %v9144_v23 }
 0x5d7   : > { %6016 = vrsqrt.f32 %v9146_v60  ;;  %vm5326_vm1 = vcmp.eq.f32.partialorder %v9146_v60, inf  ;;  %v5329_v45 = vand.u32 2147483648, %v9146_v60  ;;  %vm5328_vm6 = vcmp.eq.f32.partialorder %v9146_v60, 0.0 }
 0x5d8   : > { %v6007_v12 = vpop.eup %6006 }
 0x5d9   : > { %v6009_v9 = vpop.eup %6008  ;;  %v5318_v8 = vmul.f32 %v6007_v12, %v5231_v37  ;;  %v9150_v36 = vpop.xlane.xlu1 %5227 }
 0x5da   : > { %v9152_v34 = vpop.xlane.xlu0 %5203  ;;  %v5262_v55 = vmul.f32 %v6009_v9, %v5207_v11  ;;  %6018 = vrsqrt.f32 %v9150_v36  ;;  %vm5312_vm3 = vcmp.eq.f32.partialorder %v9150_v36, inf  ;;  %vm5314_vm9 = vcmp.eq.f32.partialorder %v9150_v36, 0.0 }
 0x5db   : > { %v5320_v30 = vsel %vm5319_vm8, %v5231_v37, %v5318_v8  ;;  %6020 = vrsqrt.f32 %v9152_v34  ;;  %v5315_v27 = vand.u32 2147483648, %v9150_v36  ;;  %vm5256_vm12 = vcmp.eq.f32.partialorder %v9152_v34, inf }
 0x5dc   : > { %v6011_v42 = vpop.eup %6010  ;;  %v5323_v7 = vsel %vm5321_vm5, %v5322_v57, %v5320_v30  ;;  %v5264_v35 = vsel %vm5263_vm7, %v5207_v11, %v5262_v55  ;;  %v5259_v10 = vand.u32 2147483648, %v9152_v34  ;;  %vm5258_vm2 = vcmp.eq.f32.partialorder %v9152_v34, 0.0 }
 0x5dd   : > { %v6013_v38 = vpop.eup %6012  ;;  %v5369_v2 = vmul.f32 0.33333334, %v5323_v7  ;;  %v5267_v13 = vsel %vm5265_vm13, %v5266_v20, %v5264_v35  ;;  %v5248_v0 = vmul.f32 %v6011_v42, %v5201_v26  ;;  %v9158_v31 = vpop.xlane.xlu1 %5221 }
 0x5de   : > { %v9156_v49 = vpop.xlane.xlu0 %5218  ;;  %v5361_v3 = vmul.f32 0.33333334, %v5267_v13  ;;  %v5269_v40 = vmul.f32 %v6013_v38, %v5210_v51  ;;  %vm5298_vm7 = vcmp.eq.f32.partialorder %v9158_v31, inf  ;;  %v5301_v12 = vand.u32 2147483648, %v9158_v31 }
 0x5df   : > { %6022 = vrsqrt.f32 %v9156_v49  ;;  %5385 = vst [vmem:[%s6542_s27 + $0x50] sm:$0xff] %v5369_v2  ;;  %v5250_v28 = vsel %vm5249_vm10, %v5201_v26, %v5248_v0  ;;  %vm5291_vm8 = vcmp.eq.f32.partialorder %v9156_v49, inf  ;;  %vm5293_vm5 = vcmp.eq.f32.partialorder %v9156_v49, 0.0 }
 0x5e0   : > { %6024 = vrsqrt.f32 %v9158_v31  ;;  %v6015_v25 = vpop.eup %6014  ;;  %5377 = vst [vmem:[%s6542_s27 + $0x10] sm:$0xff] %v5361_v3  ;;  %v5253_v48 = vsel %vm5251_vm4, %v5252_v59, %v5250_v28  ;;  %v5271_v18 = vsel %vm5270_vm0, %v5210_v51, %v5269_v40  ;;  %v5294_v51 = vand.u32 2147483648, %v9156_v49 }
 0x5e1   : > { %v6017_v14 = vpop.eup %6016  ;;  %v5359_v41 = vmul.f32 0.33333334, %v5253_v48  ;;  %v5274_v44 = vsel %vm5272_vm15, %v5273_v54, %v5271_v18  ;;  %v5304_v46 = vmul.f32 %v6015_v25, %v9144_v23  ;;  %v9169_v52 = vpop.xlane.xlu1 %5215  ;;  %vm5300_vm13 = vcmp.eq.f32.partialorder %v9158_v31, 0.0 }
 0x5e2   : > { %v9167_v1 = vpop.xlane.xlu0 %5212  ;;  %v5362_v5 = vmul.f32 0.33333334, %v5274_v44  ;;  %v5325_v53 = vmul.f32 %v6017_v14, %v9146_v60  ;;  %vm5284_vm0 = vcmp.eq.f32.partialorder %v9169_v52, inf  ;;  %v5287_v38 = vand.u32 2147483648, %v9169_v52 }
 0x5e3   : > { %6026 = vrsqrt.f32 %v9167_v1  ;;  %5375 = vst [vmem:[%s6542_s27] sm:$0xff] %v5359_v41  ;;  %v5306_v56 = vsel %vm5305_vm11, %v9144_v23, %v5304_v46  ;;  %vm5277_vm10 = vcmp.eq.f32.partialorder %v9167_v1, inf  ;;  %v5280_v42 = vand.u32 2147483648, %v9167_v1 }
 0x5e4   : > { %6028 = vrsqrt.f32 %v9169_v52  ;;  %v6019_v50 = vpop.eup %6018  ;;  %5378 = vst [vmem:[%s6542_s27 + $0x18] sm:$0xff] %v5362_v5  ;;  %v5309_v19 = vsel %vm5307_vm14, %v5308_v6, %v5306_v56  ;;  %v5327_v16 = vsel %vm5326_vm1, %v9146_v60, %v5325_v53  ;;  %vm5279_vm4 = vcmp.eq.f32.partialorder %v9167_v1, 0.0 }
 0x5e5   : > { %v6021_v63 = vpop.eup %6020  ;;  %v5367_v15 = vmul.f32 0.33333334, %v5309_v19  ;;  %v5330_v61 = vsel %vm5328_vm6, %v5329_v45, %v5327_v16  ;;  %v5311_v17 = vmul.f32 %v6019_v50, %v9150_v36  ;;  %v9187_v47 = vpop.xlane.xlu1 %5239  ;;  %vm5286_vm15 = vcmp.eq.f32.partialorder %v9169_v52, 0.0 }
 0x5e6   : > { %v9185_v24 = vpop.xlane.xlu0 %5236  ;;  %v5370_v22 = vmul.f32 0.33333334, %v5330_v61  ;;  %v5255_v33 = vmul.f32 %v6021_v63, %v9152_v34  ;;  %vm5340_vm1 = vcmp.eq.f32.partialorder %v9187_v47, inf  ;;  %v5343_v48 = vand.u32 2147483648, %v9187_v47 }
 0x5e7   : > { %6030 = vrsqrt.f32 %v9185_v24  ;;  %5383 = vst [vmem:[%s6542_s27 + $0x40] sm:$0xff] %v5367_v15  ;;  %v5313_v43 = vsel %vm5312_vm3, %v9150_v36, %v5311_v17  ;;  %vm5333_vm11 = vcmp.eq.f32.partialorder %v9185_v24, inf  ;;  %v5336_v28 = vand.u32 2147483648, %v9185_v24 }
 0x5e8   : > { %6032 = vrsqrt.f32 %v9187_v47  ;;  %5386 = vst [vmem:[%s6542_s27 + $0x58] sm:$0xff] %v5370_v22  ;;  %v5316_v58 = vsel %vm5314_vm9, %v5315_v27, %v5313_v43  ;;  %v5257_v32 = vsel %vm5256_vm12, %v9152_v34, %v5255_v33  ;;  %vm5335_vm14 = vcmp.eq.f32.partialorder %v9185_v24, 0.0 }
 0x5e9   : > { %v6023_v39 = vpop.eup %6022  ;;  %v5368_v29 = vmul.f32 0.33333334, %v5316_v58  ;;  %v5260_v21 = vsel %vm5258_vm2, %v5259_v10, %v5257_v32  ;;  %v9205_v11 = vpop.xlane.xlu1 %5245  ;;  %vm5342_vm6 = vcmp.eq.f32.partialorder %v9187_v47, 0.0 }
 0x5ea   : > { %v6025_v62 = vpop.eup %6024  ;;  %v5290_v4 = vmul.f32 %v6023_v39, %v9156_v49  ;;  %v9203_v37 = vpop.xlane.xlu0 %5242  ;;  %v5360_v26 = vmul.f32 0.33333334, %v5260_v21  ;;  %vm5354_vm12 = vcmp.eq.f32.partialorder %v9205_v11, inf  ;;  %v5357_v45 = vand.u32 2147483648, %v9205_v11 }
 0x5eb   : > { %v5297_v23 = vmul.f32 %v6025_v62, %v9158_v31  ;;  %6034 = vrsqrt.f32 %v9203_v37  ;;  %5384 = vst [vmem:[%s6542_s27 + $0x48] sm:$0xff] %v5368_v29  ;;  %vm5347_vm3 = vcmp.eq.f32.partialorder %v9203_v37, inf  ;;  %v5350_v6 = vand.u32 2147483648, %v9203_v37 }
 0x5ec   : > { %v5292_v60 = vsel %vm5291_vm8, %v9156_v49, %v5290_v4  ;;  %6036 = vrsqrt.f32 %v9205_v11  ;;  %5376 = vst [vmem:[%s6542_s27 + $0x8] sm:$0xff] %v5360_v26  ;;  %vm5349_vm9 = vcmp.eq.f32.partialorder %v9203_v37, 0.0  ;;  %vm5356_vm2 = vcmp.eq.f32.partialorder %v9205_v11, 0.0 }
 0x5ed   : > { %v6027_v9 = vpop.eup %6026  ;;  %v5295_v8 = vsel %vm5293_vm5, %v5294_v51, %v5292_v60  ;;  %v5299_v36 = vsel %vm5298_vm7, %v9158_v31, %v5297_v23 }
 0x5ee   : > { %v6029_v34 = vpop.eup %6028  ;;  %v5365_v57 = vmul.f32 0.33333334, %v5295_v8  ;;  %v5302_v55 = vsel %vm5300_vm13, %v5301_v12, %v5299_v36  ;;  %v5276_v30 = vmul.f32 %v6027_v9, %v9167_v1 }
 0x5ef   : > { %v5366_v20 = vmul.f32 0.33333334, %v5302_v55  ;;  %v5283_v7 = vmul.f32 %v6029_v34, %v9169_v52 }
 0x5f0   : > { %5381 = vst [vmem:[%s6542_s27 + $0x30] sm:$0xff] %v5365_v57  ;;  %v5278_v35 = vsel %vm5277_vm10, %v9167_v1, %v5276_v30 }
 0x5f1   : > { %v6031_v2 = vpop.eup %6030  ;;  %5382 = vst [vmem:[%s6542_s27 + $0x38] sm:$0xff] %v5366_v20  ;;  %v5281_v13 = vsel %vm5279_vm4, %v5280_v42, %v5278_v35  ;;  %v5285_v0 = vsel %vm5284_vm0, %v9169_v52, %v5283_v7 }
 0x5f2   : > { %v6033_v49 = vpop.eup %6032  ;;  %v5363_v31 = vmul.f32 0.33333334, %v5281_v13  ;;  %v5288_v3 = vsel %vm5286_vm15, %v5287_v38, %v5285_v0  ;;  %v5332_v59 = vmul.f32 %v6031_v2, %v9185_v24 }
 0x5f3   : > { %v5364_v40 = vmul.f32 0.33333334, %v5288_v3  ;;  %v5339_v54 = vmul.f32 %v6033_v49, %v9187_v47 }
 0x5f4   : > { %5379 = vst [vmem:[%s6542_s27 + $0x20] sm:$0xff] %v5363_v31  ;;  %v5334_v25 = vsel %vm5333_vm11, %v9185_v24, %v5332_v59 }
 0x5f5   : > { %v6035_v18 = vpop.eup %6034  ;;  %5380 = vst [vmem:[%s6542_s27 + $0x28] sm:$0xff] %v5364_v40  ;;  %v5337_v14 = vsel %vm5335_vm14, %v5336_v28, %v5334_v25  ;;  %v5341_v41 = vsel %vm5340_vm1, %v9187_v47, %v5339_v54 }
 0x5f6   : > { %v6037_v44 = vpop.eup %6036  ;;  %v5371_v46 = vmul.f32 0.33333334, %v5337_v14  ;;  %v5344_v1 = vsel %vm5342_vm6, %v5343_v48, %v5341_v41  ;;  %v5346_v52 = vmul.f32 %v6035_v18, %v9203_v37 }
 0x5f7   : > { %v5372_v5 = vmul.f32 0.33333334, %v5344_v1  ;;  %v5353_v53 = vmul.f32 %v6037_v44, %v9205_v11 }
 0x5f8   : > { %5387 = vst [vmem:[%s6542_s27 + $0x60] sm:$0xff] %v5371_v46  ;;  %v5348_v56 = vsel %vm5347_vm3, %v9203_v37, %v5346_v52 }
 0x5f9   : > { %5388 = vst [vmem:[%s6542_s27 + $0x68] sm:$0xff] %v5372_v5  ;;  %v5351_v50 = vsel %vm5349_vm9, %v5350_v6, %v5348_v56  ;;  %v5355_v19 = vsel %vm5354_vm12, %v9205_v11, %v5353_v53 }
 0x5fa   : > { %v5373_v16 = vmul.f32 0.33333334, %v5351_v50  ;;  %v5358_v63 = vsel %vm5356_vm2, %v5357_v45, %v5355_v19 }
 0x5fb   : > { %v5374_v15 = vmul.f32 0.33333334, %v5358_v63 }
 0x5fc   : > { %5389 = vst [vmem:[%s6542_s27 + $0x70] sm:$0xff] %v5373_v16 }
 0x5fd   : > { %5390 = vst [vmem:[%s6542_s27 + $0x78] sm:$0xff] %v5374_v15 }
 0x5fe   : > { %6051 = shalt.err (!%p6048_p10)
}
 0x5ff   : > { %s6052_s27 = scalar_lea.hbm %s9260_s8, 2048  ;;  %s6056_s26 = scalar_lea.hbm %s9311_s3, 4096 }
 0x600   : > { %p6053_p11 = scmp.ne.s32.totalorder %s9260_s8, %s6052_s27  ;;  %p6057_p0 = scmp.lt.u32.totalorder %s9260_s8, %s9311_s3 }
 0x601   : > { %p6058_p1 = scmp.lt.u32.totalorder %s6056_s26, %s6052_s27  ;;  %p6060_p3 = scmp.lt.u32.totalorder %s6052_s27, %s9260_s8 }
 0x602   : > { %p6054_p12 = pnand %p6053_p11, %p6178_p6 }
 0x603   : > { %p6059_p2 = por %p6058_p1, %p6057_p0 }
 0x604   : > { %p6055_p13 = pneg %p6054_p12 }
 0x605   : > { %p6061_p4 = por %p6060_p3, %p6059_p2 }
 0x607   : > { %p6062_p5 = pnand %p6061_p4, %p6055_p13 }
 0x609   : > { %6065 = shalt.err (!%p6062_p5)
}
 0x60a   : > { %s6114_s30 = smov 128   ;;  %s6115_s4 = smov 8  }
 0x60b   : > { %5912 = dma.vmem_to_hbm [thread:$0]  (%p6178_p6), %s9262_s6, 2048, %s9260_s8, %s5392_s9, %s6114_s30, %s6114_s30, %s6115_s4  }
 0x60c PF: > { %s5420_s5 = sand.u32 1, %s6092_s12   ;;  %p5915_p7 = pnand %p5500_p9, %p6182_p8 }
 0x60d   : > { %s5421_s16 = scalar_lea.sflag [#allocation6], %s5420_s5 }
 0x60e   : > { %6087 = dma.done.wait (!%p5915_p7), %s5421_s16, 2048  }
 0x60f   : > { %6089 = vsyncadd (!%p5915_p7), %s5421_s16, 4294965248  ;;  %p13_p10 = scmp.ge.s32.totalorder %s6159_s18, 4   ;;  %s9910_s12 = smov %s6096_s13 }
 0x610   : > { %s9911_s13 = smov %s6100_s14  ;;  %s9912_s14 = smov %s6172_s21 }
 0x611   : > { %s9913_s15 = smov %s6159_s18  ;;  %15 = sbr.rel (!%p13_p10) target bundleno = 3 (0x3), region = 176 }
 0x618   :  { %5426 = vsyncpa [#allocation6], 1 }
 0x619   :  { %5428 = vsyncpa [#allocation6 + $0x1], 1 }

</bundles_post_ra>
